<compile_context>
chip_gen: v6e
topology: v6e:2x2x1
jax: 0.10.0
libtpu: 0.0.40
codegen_flags: <defaults>
</compile_context>

<pallas_src>
import jax
import jax.numpy as jnp
import numpy as np
from jax import lax
from jax.experimental import pallas as pl
from jax.experimental.pallas import tpu as pltpu

COMPUTE_DTYPE = jnp.bfloat16   # MXU operand dtype for the big matmuls (f32 accum)

# Geometry implied by the module: (B,4,64,64) -conv1(5,s2)-> (B,4,30,30)
#   -conv2(5,s2,p2)-> (B,8,15,15) -> 1800 -> MLP tail -> (B,1).
H_IN = W_IN = 64
C_IN = 4
KSZ = 5
OH1 = OW1 = 30
C1 = 4
OH2 = OW2 = 15
C2 = 8
LB = 128                  # lane block per conv tap-row (>= OW1*C1 = OW2*C2 = 120)
HALF1 = OH1 // 2          # 15 even / 15 odd conv1 output rows
TILE_B = 8                # samples per grid step


# ----------------------------------------------------------------------------
# Fused forward kernel (one grid step = TILE_B samples, everything in VMEM)
# ----------------------------------------------------------------------------
def _critic_kernel(x_ref, act_ref,
                   c1w_ref, c1b_ref, c2w_ref, c2b_ref,
                   fc1w_ref, fc1b_ref, fc2w_ref, fc2b_ref,
                   a1w_ref, a1b_ref, a2w_ref, a2b_ref,
                   o1wa_ref, o1ws_ref, o1b_ref, o2w_ref, o2b_ref,
                   o3w_ref, o3b_ref, out_ref):
    f32 = jnp.float32
    tb = x_ref.shape[0]
    nt = KSZ * LB                               # 640 lanes: 5 tap-row blocks

    # ---- conv1: width-direction banded matmul over every input row ---------
    # x_ref[b, p, i, w*4 + c] = input[b, c, 4*i + p, w]   (bf16, lane-dense 256)
    x_rows = x_ref[...].reshape(tb * 4 * (H_IN // 4), W_IN * C_IN)
    u = jnp.dot(x_rows, c1w_ref[...], preferred_element_type=f32)
    u = u.reshape(tb, 4, H_IN // 4, nt)         # (tb, phase, row-in-phase, 640)

    b1 = c1b_ref[...].reshape(1, 1, LB)

    def tap1(p, i0, kh):                        # 15 rows of phase p, tap-row kh
        return u[:, p, i0:i0 + HALF1, kh * LB:(kh + 1) * LB]

    # conv1 output rows split by parity: y_even[m] = row 2m, y_odd[m] = row 2m+1
    # (input row 2*oh + kh  ->  phase (2*oh+kh) % 4, index (2*oh+kh) // 4)
    y_even = jnp.maximum(tap1(0, 0, 0) + tap1(1, 0, 1) + tap1(2, 0, 2)
                         + tap1(3, 0, 3) + tap1(0, 1, 4) + b1, 0.0)
    y_odd = jnp.maximum(tap1(2, 0, 0) + tap1(3, 0, 1) + tap1(0, 1, 2)
                        + tap1(1, 1, 3) + tap1(2, 1, 4) + b1, 0.0)
    # (tb, 15, 128) f32, lanes = ow*4 + c_out (lanes 120..127 stay zero)

    # ---- conv2: banded matmul per parity + shifted-row sum (H padding = the
    # prepended zero rows; W padding is folded into the banded weights) ------
    def wconv2(y):
        y16 = jnp.concatenate([y, jnp.zeros((tb, 1, LB), f32)], axis=1)
        y16 = y16.astype(COMPUTE_DTYPE).reshape(tb * 16, LB)
        v = jnp.dot(y16, c2w_ref[...], preferred_element_type=f32)
        v = v.reshape(tb, 16, nt)
        return jnp.concatenate([jnp.zeros((tb, 1, nt), f32), v], axis=1)

    v_even = wconv2(y_even)                     # (tb, 17, 640); rows 0 & 16 = 0
    v_odd = wconv2(y_odd)

    b2 = c2b_ref[...].reshape(1, 1, LB)

    def tap2(v, j0, kh):
        return v[:, j0:j0 + OH2, kh * LB:(kh + 1) * LB]

    z = jnp.maximum(tap2(v_even, 0, 0) + tap2(v_odd, 0, 1) + tap2(v_even, 1, 2)
                    + tap2(v_odd, 1, 3) + tap2(v_even, 2, 4) + b2, 0.0)
    # (tb, 15, 128) f32, lanes = ow2*8 + c_out2 (lanes 120..127 zero)

    # ---- state branch: fc_1 (ReLU) -> fc_2 (tanh) ---------------------------
    # NHWC flatten via lane-concat of the 15 output rows; PyTorch's (C,H,W)
    # flatten order and the 120->128 lane padding are absorbed into fc1_w rows.
    state_feat = jnp.concatenate([z[:, r, :] for r in range(OH2)], axis=-1)
    state_feat = state_feat.astype(COMPUTE_DTYPE)            # (tb, 1920) bf16

    def dense(x, w_ref, b_ref):
        return jnp.dot(x, w_ref[...], preferred_element_type=f32) + b_ref[...]

    s = jnp.maximum(dense(state_feat, fc1w_ref, fc1b_ref), 0.0)
    s = jnp.tanh(dense(s, fc2w_ref, fc2b_ref))                # (tb, 32) f32

    # ---- action branch (tiny, kept f32; K=2 layer done on the VPU) ---------
    act = act_ref[...]                                        # (tb, 2) f32
    a1w = a1w_ref[...]
    a = act[:, 0:1] * a1w[0:1, :] + act[:, 1:2] * a1w[1:2, :] + a1b_ref[...]
    a = jnp.maximum(a, 0.0)
    a = jnp.maximum(dense(a, a2w_ref, a2b_ref), 0.0)          # (tb, 16) f32

    # ---- head: concat([a, s]) @ out_fc1  ==  a @ W[:16] + s @ W[16:] -------
    o = (jnp.dot(a, o1wa_ref[...], preferred_element_type=f32)
         + jnp.dot(s, o1ws_ref[...], preferred_element_type=f32)
         + o1b_ref[...])
    o = jnp.maximum(o, 0.0)
    o = jnp.maximum(dense(o, o2w_ref, o2b_ref), 0.0)
    # out_fc3 (N=1) as a lane reduction to avoid a 1-lane MXU result
    out_ref[...] = (jnp.sum(o * o3w_ref[...], axis=-1, keepdims=True)
                    + o3b_ref[...])


_WEIGHT_ORDER = ("c1_w", "c1_b", "c2_w", "c2_b", "fc1_w", "fc1_b",
                 "fc2_w", "fc2_b", "a1_w", "a1_b", "a2_w", "a2_b",
                 "o1_wa", "o1_ws", "o1_b", "o2_w", "o2_b", "o3_w", "o3_b")


def _vmem_budget_bytes(tile_b, weights):
    # double-buffered pipelined blocks (input phases + action + output)
    block = tile_b * (4 * (H_IN // 4) * W_IN * C_IN * 2 + 2 * 4 + 1 * 4)
    weight = sum(int(np.prod(w.shape)) * w.dtype.itemsize for w in weights)
    # live f32 intermediates inside one grid step (u, v_even/odd, y_*, z, feat)
    interm = tile_b * 4 * (4 * (H_IN // 4) * KSZ * LB + 2 * 17 * KSZ * LB
                           + 2 * 16 * LB + 2 * OH2 * LB + OH2 * LB)
    est = 2 * block + 2 * weight + 2 * interm + (8 << 20)     # ~20 MB at tile_b=8
    return max(est, 32 << 20)                                 # headroom; < 64 MiB (v7x)


def _critic_pallas(prepared, x_ph, act, tile_b):
    b_pad = x_ph.shape[0]
    n_blk = b_pad // tile_b

    def batch_spec(shape):
        nd = len(shape)
        return pl.BlockSpec((tile_b,) + tuple(shape[1:]),
                            lambda i, nd=nd: (i,) + (0,) * (nd - 1))

    def const_spec(shape):
        nd = len(shape)
        return pl.BlockSpec(tuple(shape), lambda i, nd=nd: (0,) * nd)

    weights = [prepared[k] for k in _WEIGHT_ORDER]
    in_specs = [batch_spec(x_ph.shape), batch_spec(act.shape)]
    in_specs += [const_spec(w.shape) for w in weights]

    return pl.pallas_call(
        _critic_kernel,
        out_shape=jax.ShapeDtypeStruct((b_pad, 1), jnp.float32),
        grid=(n_blk,),
        in_specs=in_specs,
        out_specs=batch_spec((b_pad, 1)),
        compiler_params=pltpu.CompilerParams(
            dimension_semantics=("parallel",),
            vmem_limit_bytes=_vmem_budget_bytes(tile_b, weights)),
    )(x_ph, act, *weights)


# ----------------------------------------------------------------------------
# Critic forward (matches the PyTorch module)
# ----------------------------------------------------------------------------
def critic_forward(prepared, state, action, *, tile_b=TILE_B):
    """state: (B, 4, 64, 64) f32 NCHW, action: (B, 2).  Returns (B, 1) f32."""
    assert state.ndim == 4 and state.shape[1:] == (C_IN, H_IN, W_IN)
    assert action.ndim == 2 and action.shape[1] == 2
    B = state.shape[0]

    # Single XLA layout op on the raw input: NCHW -> 4 row phases, with (W, C)
    # flattened into a lane-dense 256-wide last dim:
    #   x_ph[b, p, i, w*4 + c] = state[b, c, 4*i + p, w]
    # TODO(synk): fold this relayout + f32->bf16 cast into the kernel via
    # strided in-kernel reads if the producer cannot emit this layout directly.
    x = jnp.transpose(state, (0, 2, 3, 1))                    # NHWC
    x = x.reshape(B, H_IN // 4, 4, W_IN * C_IN)
    x_ph = jnp.transpose(x, (0, 2, 1, 3)).astype(COMPUTE_DTYPE)
    act = action.astype(jnp.float32)

    b_pad = ((B + tile_b - 1) // tile_b) * tile_b
    if b_pad != B:
        x_ph = jnp.pad(x_ph, ((0, b_pad - B), (0, 0), (0, 0), (0, 0)))
        act = jnp.pad(act, ((0, b_pad - B), (0, 0)))

    out = _critic_pallas(prepared, x_ph, act, tile_b)
    return out[:B]


# ----------------------------------------------------------------------------
# Deterministic parameter init (PyTorch-style uniform(-1/sqrt(fan_in), +..))
# ----------------------------------------------------------------------------
def init_params(key):
    def linear(k, fan_in, fan_out):
        k1, k2 = jax.random.split(k)
        bound = 1.0 / float(fan_in) ** 0.5
        w = jax.random.uniform(k1, (fan_in, fan_out), jnp.float32, -bound, bound)
        b = jax.random.uniform(k2, (fan_out,), jnp.float32, -bound, bound)
        return w, b

    def conv(k, cin, cout, ksz):
        k1, k2 = jax.random.split(k)
        fan_in = cin * ksz * ksz
        bound = 1.0 / float(fan_in) ** 0.5
        w = jax.random.uniform(k1, (cout, cin, ksz, ksz), jnp.float32, -bound, bound)
        b = jax.random.uniform(k2, (cout,), jnp.float32, -bound, bound)
        return w, b

    ks = jax.random.split(key, 9)
    return {
        "act_fc1": linear(ks[0], 2, 16),
        "act_fc2": linear(ks[1], 16, 16),
        "conv1": conv(ks[2], 4, 4, 5),
        "conv2": conv(ks[3], 4, 8, 5),
        "fc_1": linear(ks[4], 1800, 256),
        "fc_2": linear(ks[5], 256, 32),
        "out_fc1": linear(ks[6], 48, 128),
        "out_fc2": linear(ks[7], 128, 128),
        "out_fc3": linear(ks[8], 128, 1),
    }


# ----------------------------------------------------------------------------
# One-time conversion: PyTorch-layout params -> kernel-ready (banded) layout
# ----------------------------------------------------------------------------
def prepare_params(params):
    f32 = np.float32

    def np_(a):
        return np.asarray(a, dtype=f32)

    c1w, c1b = (np_(a) for a in params["conv1"])      # (4,4,5,5), (4,)
    c2w, c2b = (np_(a) for a in params["conv2"])      # (8,4,5,5), (8,)

    # conv1 width-direction banded matrix:
    #   rows : iw*4 + c_in  (iw in [0,64))   cols : kh*128 + ow*4 + c_out
    band1 = np.zeros((W_IN * C_IN, KSZ * LB), f32)
    for kh in range(KSZ):
        for ow in range(OW1):
            for kw in range(KSZ):
                iw = 2 * ow + kw
                band1[iw * C_IN:(iw + 1) * C_IN,
                      kh * LB + ow * C1:kh * LB + (ow + 1) * C1] = \
                    c1w[:, :, kh, kw].T
    b1_row = np.zeros((1, LB), f32)
    b1_row[0, :OW1 * C1] = np.tile(c1b, OW1)

    # conv2 width-direction banded matrix (padding=2 along W folded in):
    #   rows : iw*4 + c_in  (iw in [0,30), rows >= 120 stay zero)
    #   cols : kh*128 + ow*8 + c_out
    band2 = np.zeros((LB, KSZ * LB), f32)
    for kh in range(KSZ):
        for ow in range(OW2):
            for kw in range(KSZ):
                iw = 2 * ow + kw - 2
                if 0 <= iw < OW1:
                    band2[iw * C1:(iw + 1) * C1,
                          kh * LB + ow * C2:kh * LB + (ow + 1) * C2] = \
                        c2w[:, :, kh, kw].T
    b2_row = np.zeros((1, LB), f32)
    b2_row[0, :OW2 * C2] = np.tile(c2b, OW2)

    # fc_1: permute rows from PyTorch's (C,H,W) flatten order to our
    # (H, then 128-lane (W,C) block) order, padding K from 1800 to 1920.
    fc1_w, fc1_b = (np_(a) for a in params["fc_1"])   # (1800, 256), (256,)
    fc1_pad = np.zeros((OH2 * LB, 256), f32)
    p_idx, q_idx, c_idx = np.meshgrid(np.arange(OH2), np.arange(OW2),
                                      np.arange(C2), indexing="ij")
    new_rows = (p_idx * LB + q_idx * C2 + c_idx).reshape(-1)
    old_rows = (c_idx * (OH2 * OW2) + p_idx * OW2 + q_idx).reshape(-1)
    fc1_pad[new_rows] = fc1_w[old_rows]

    def lin(name):
        w, b = params[name]
        return jnp.asarray(np_(w)), jnp.asarray(np_(b).reshape(1, -1))

    o1_w, o1_b = (np_(a) for a in params["out_fc1"])  # (48, 128), (128,)
    n_act = 16                                        # action-embed width

    cd = COMPUTE_DTYPE
    prepared = {
        "c1_w": jnp.asarray(band1, cd), "c1_b": jnp.asarray(b1_row),
        "c2_w": jnp.asarray(band2, cd), "c2_b": jnp.asarray(b2_row),
        "fc1_w": jnp.asarray(fc1_pad, cd),
        "fc1_b": jnp.asarray(np_(fc1_b).reshape(1, -1)),
    }
    prepared["fc2_w"], prepared["fc2_b"] = lin("fc_2")
    prepared["a1_w"], prepared["a1_b"] = lin("act_fc1")
    prepared["a2_w"], prepared["a2_b"] = lin("act_fc2")
    prepared["o1_wa"] = jnp.asarray(o1_w[:n_act])
    prepared["o1_ws"] = jnp.asarray(o1_w[n_act:])
    prepared["o1_b"] = jnp.asarray(o1_b.reshape(1, -1))
    prepared["o2_w"], prepared["o2_b"] = lin("out_fc2")
    ow3, ob3 = params["out_fc3"]
    prepared["o3_w"] = jnp.asarray(np_(ow3).reshape(1, -1))   # (1, 128)
    prepared["o3_b"] = jnp.asarray(np_(ob3).reshape(1, -1))   # (1, 1)
    return prepared


# ----------------------------------------------------------------------------
# Pure-JAX reference (f32) for a correctness check of the fused kernel
# ----------------------------------------------------------------------------
def critic_forward_reference(params, state, action):
    def linear(x, p):
        w, b = p
        return x @ w + b

    c1w, c1b = params["conv1"]
    c2w, c2b = params["conv2"]
    dn = ("NCHW", "OIHW", "NCHW")
    y = lax.conv_general_dilated(state, c1w, (2, 2), "VALID",
                                 dimension_numbers=dn)
    y = jax.nn.relu(y + c1b.reshape(1, -1, 1, 1))
    y = lax.conv_general_dilated(y, c2w, (2, 2), ((2, 2), (2, 2)),
                                 dimension_numbers=dn)
    y = jax.nn.relu(y + c2b.reshape(1, -1, 1, 1))
    s = y.reshape(y.shape[0], -1)                      # (B, 1800), (C,H,W) order
    s = jax.nn.relu(linear(s, params["fc_1"]))
    s = jnp.tanh(linear(s, params["fc_2"]))
    a = jax.nn.relu(linear(action, params["act_fc1"]))
    a = jax.nn.relu(linear(a, params["act_fc2"]))
    o = jax.nn.relu(linear(jnp.concatenate([a, s], axis=-1), params["out_fc1"]))
    o = jax.nn.relu(linear(o, params["out_fc2"]))
    return linear(o, params["out_fc3"])


if __name__ == "__main__":
    key = jax.random.PRNGKey(0)
    k_params, k_state, k_action = jax.random.split(key, 3)

    params = init_params(k_params)
    prepared = prepare_params(params)        # one-time, outside the hot path

    batch = 2
    state = jax.random.normal(k_state, (batch, C_IN, H_IN, W_IN), jnp.float32)
    action = jax.random.normal(k_action, (batch, 2), jnp.float32)

    out = jax.jit(critic_forward)(prepared, state, action)
    out = jax.block_until_ready(out)
    assert out.shape == (batch, 1), out.shape

    # correctness check vs. pure-JAX f32 reference (tolerance reflects the
    # bf16 MXU operands on the conv / fc_1 path)
    ref = critic_forward_reference(params, state, action)
    np.testing.assert_allclose(np.asarray(out), np.asarray(ref),
                               rtol=5e-2, atol=5e-2)
    print("KERNEL_OK")
</pallas_src>

<mosaic_0001>
module attributes {stable_mosaic.version = 11 : i64} {
  func.func @_critic_kernel(%arg0: i32, %arg1: memref<8x4x16x256xbf16, #tpu.memory_space<vmem>>, %arg2: memref<8x2xf32, #tpu.memory_space<vmem>>, %arg3: memref<256x640xbf16, #tpu.memory_space<vmem>>, %arg4: memref<1x128xf32, #tpu.memory_space<vmem>>, %arg5: memref<128x640xbf16, #tpu.memory_space<vmem>>, %arg6: memref<1x128xf32, #tpu.memory_space<vmem>>, %arg7: memref<1920x256xbf16, #tpu.memory_space<vmem>>, %arg8: memref<1x256xf32, #tpu.memory_space<vmem>>, %arg9: memref<256x32xf32, #tpu.memory_space<vmem>>, %arg10: memref<1x32xf32, #tpu.memory_space<vmem>>, %arg11: memref<2x16xf32, #tpu.memory_space<vmem>>, %arg12: memref<1x16xf32, #tpu.memory_space<vmem>>, %arg13: memref<16x16xf32, #tpu.memory_space<vmem>>, %arg14: memref<1x16xf32, #tpu.memory_space<vmem>>, %arg15: memref<16x128xf32, #tpu.memory_space<vmem>>, %arg16: memref<32x128xf32, #tpu.memory_space<vmem>>, %arg17: memref<1x128xf32, #tpu.memory_space<vmem>>, %arg18: memref<128x128xf32, #tpu.memory_space<vmem>>, %arg19: memref<1x128xf32, #tpu.memory_space<vmem>>, %arg20: memref<1x128xf32, #tpu.memory_space<vmem>>, %arg21: memref<1x1xf32, #tpu.memory_space<vmem>>, %arg22: memref<8x1xf32, #tpu.memory_space<vmem>>) attributes {dimension_semantics = [#tpu.dimension_semantics<parallel>], iteration_bounds = array<i64: 1>, scalar_prefetch = 0 : i64, scratch_operands = 0 : i64, tpu.core_type = #tpu.core_type<tc>, window_params = [{transform_indices = @transform_0, window_bounds = array<i64: 8, 4, 16, 256>}, {transform_indices = @transform_1, window_bounds = array<i64: 8, 2>}, {pipeline_mode = #tpu.pipeline_mode<synchronous>, transform_indices = @transform_2, window_bounds = array<i64: 256, 640>}, {pipeline_mode = #tpu.pipeline_mode<synchronous>, transform_indices = @transform_3, window_bounds = array<i64: 1, 128>}, {pipeline_mode = #tpu.pipeline_mode<synchronous>, transform_indices = @transform_4, window_bounds = array<i64: 128, 640>}, {pipeline_mode = #tpu.pipeline_mode<synchronous>, transform_indices = @transform_5, window_bounds = array<i64: 1, 128>}, {pipeline_mode = #tpu.pipeline_mode<synchronous>, transform_indices = @transform_6, window_bounds = array<i64: 1920, 256>}, {pipeline_mode = #tpu.pipeline_mode<synchronous>, transform_indices = @transform_7, window_bounds = array<i64: 1, 256>}, {pipeline_mode = #tpu.pipeline_mode<synchronous>, transform_indices = @transform_8, window_bounds = array<i64: 256, 32>}, {pipeline_mode = #tpu.pipeline_mode<synchronous>, transform_indices = @transform_9, window_bounds = array<i64: 1, 32>}, {pipeline_mode = #tpu.pipeline_mode<synchronous>, transform_indices = @transform_10, window_bounds = array<i64: 2, 16>}, {pipeline_mode = #tpu.pipeline_mode<synchronous>, transform_indices = @transform_11, window_bounds = array<i64: 1, 16>}, {pipeline_mode = #tpu.pipeline_mode<synchronous>, transform_indices = @transform_12, window_bounds = array<i64: 16, 16>}, {pipeline_mode = #tpu.pipeline_mode<synchronous>, transform_indices = @transform_13, window_bounds = array<i64: 1, 16>}, {pipeline_mode = #tpu.pipeline_mode<synchronous>, transform_indices = @transform_14, window_bounds = array<i64: 16, 128>}, {pipeline_mode = #tpu.pipeline_mode<synchronous>, transform_indices = @transform_15, window_bounds = array<i64: 32, 128>}, {pipeline_mode = #tpu.pipeline_mode<synchronous>, transform_indices = @transform_16, window_bounds = array<i64: 1, 128>}, {pipeline_mode = #tpu.pipeline_mode<synchronous>, transform_indices = @transform_17, window_bounds = array<i64: 128, 128>}, {pipeline_mode = #tpu.pipeline_mode<synchronous>, transform_indices = @transform_18, window_bounds = array<i64: 1, 128>}, {pipeline_mode = #tpu.pipeline_mode<synchronous>, transform_indices = @transform_19, window_bounds = array<i64: 1, 128>}, {pipeline_mode = #tpu.pipeline_mode<synchronous>, transform_indices = @transform_20, window_bounds = array<i64: 1, 1>}, {transform_indices = @transform_21, window_bounds = array<i64: 8, 1>}]} {
    %c0 = arith.constant 0 : index
    %c0_0 = arith.constant 0 : index
    %c0_1 = arith.constant 0 : index
    %c0_2 = arith.constant 0 : index
    %0 = vector.load %arg1[%c0, %c0_0, %c0_1, %c0_2] : memref<8x4x16x256xbf16, #tpu.memory_space<vmem>>, vector<8x4x16x256xbf16>
    %1 = vector.shape_cast %0 : vector<8x4x16x256xbf16> to vector<512x256xbf16>
    %c0_3 = arith.constant 0 : index
    %c0_4 = arith.constant 0 : index
    %2 = vector.load %arg3[%c0_3, %c0_4] : memref<256x640xbf16, #tpu.memory_space<vmem>>, vector<256x640xbf16>
    %cst = arith.constant dense<0.000000e+00> : vector<512x640xf32>
    %3 = tpu.matmul %1, %2, %cst {dimension_numbers = #tpu.dot_dimension_numbers<[1], [0], [0], [1], [0, 0, 1, 1], [], []>} : vector<512x256xbf16>, vector<256x640xbf16>, vector<512x640xf32> -> vector<512x640xf32>
    %4 = vector.shape_cast %3 : vector<512x640xf32> to vector<8x4x16x640xf32>
    %c0_5 = arith.constant 0 : index
    %c0_6 = arith.constant 0 : index
    %5 = vector.load %arg4[%c0_5, %c0_6] : memref<1x128xf32, #tpu.memory_space<vmem>>, vector<1x128xf32>
    %6 = vector.shape_cast %5 : vector<1x128xf32> to vector<1x1x128xf32>
    %7 = vector.extract_strided_slice %4 {offsets = [0, 0, 0, 0], sizes = [8, 1, 15, 128], strides = [1, 1, 1, 1]} : vector<8x4x16x640xf32> to vector<8x1x15x128xf32>
    %8 = vector.shape_cast %7 : vector<8x1x15x128xf32> to vector<8x15x128xf32>
    %9 = vector.extract_strided_slice %4 {offsets = [0, 1, 0, 128], sizes = [8, 1, 15, 128], strides = [1, 1, 1, 1]} : vector<8x4x16x640xf32> to vector<8x1x15x128xf32>
    %10 = vector.shape_cast %9 : vector<8x1x15x128xf32> to vector<8x15x128xf32>
    %11 = arith.addf %8, %10 : vector<8x15x128xf32>
    %12 = vector.extract_strided_slice %4 {offsets = [0, 2, 0, 256], sizes = [8, 1, 15, 128], strides = [1, 1, 1, 1]} : vector<8x4x16x640xf32> to vector<8x1x15x128xf32>
    %13 = vector.shape_cast %12 : vector<8x1x15x128xf32> to vector<8x15x128xf32>
    %14 = arith.addf %11, %13 : vector<8x15x128xf32>
    %15 = vector.extract_strided_slice %4 {offsets = [0, 3, 0, 384], sizes = [8, 1, 15, 128], strides = [1, 1, 1, 1]} : vector<8x4x16x640xf32> to vector<8x1x15x128xf32>
    %16 = vector.shape_cast %15 : vector<8x1x15x128xf32> to vector<8x15x128xf32>
    %17 = arith.addf %14, %16 : vector<8x15x128xf32>
    %18 = vector.extract_strided_slice %4 {offsets = [0, 0, 1, 512], sizes = [8, 1, 15, 128], strides = [1, 1, 1, 1]} : vector<8x4x16x640xf32> to vector<8x1x15x128xf32>
    %19 = vector.shape_cast %18 : vector<8x1x15x128xf32> to vector<8x15x128xf32>
    %20 = arith.addf %17, %19 : vector<8x15x128xf32>
    %21 = vector.broadcast %6 : vector<1x1x128xf32> to vector<8x15x128xf32>
    %22 = arith.addf %20, %21 : vector<8x15x128xf32>
    %cst_7 = arith.constant 0.000000e+00 : f32
    %23 = vector.broadcast %cst_7 : f32 to vector<8x15x128xf32>
    %24 = arith.maximumf %22, %23 : vector<8x15x128xf32>
    %25 = vector.extract_strided_slice %4 {offsets = [0, 2, 0, 0], sizes = [8, 1, 15, 128], strides = [1, 1, 1, 1]} : vector<8x4x16x640xf32> to vector<8x1x15x128xf32>
    %26 = vector.shape_cast %25 : vector<8x1x15x128xf32> to vector<8x15x128xf32>
    %27 = vector.extract_strided_slice %4 {offsets = [0, 3, 0, 128], sizes = [8, 1, 15, 128], strides = [1, 1, 1, 1]} : vector<8x4x16x640xf32> to vector<8x1x15x128xf32>
    %28 = vector.shape_cast %27 : vector<8x1x15x128xf32> to vector<8x15x128xf32>
    %29 = arith.addf %26, %28 : vector<8x15x128xf32>
    %30 = vector.extract_strided_slice %4 {offsets = [0, 0, 1, 256], sizes = [8, 1, 15, 128], strides = [1, 1, 1, 1]} : vector<8x4x16x640xf32> to vector<8x1x15x128xf32>
    %31 = vector.shape_cast %30 : vector<8x1x15x128xf32> to vector<8x15x128xf32>
    %32 = arith.addf %29, %31 : vector<8x15x128xf32>
    %33 = vector.extract_strided_slice %4 {offsets = [0, 1, 1, 384], sizes = [8, 1, 15, 128], strides = [1, 1, 1, 1]} : vector<8x4x16x640xf32> to vector<8x1x15x128xf32>
    %34 = vector.shape_cast %33 : vector<8x1x15x128xf32> to vector<8x15x128xf32>
    %35 = arith.addf %32, %34 : vector<8x15x128xf32>
    %36 = vector.extract_strided_slice %4 {offsets = [0, 2, 1, 512], sizes = [8, 1, 15, 128], strides = [1, 1, 1, 1]} : vector<8x4x16x640xf32> to vector<8x1x15x128xf32>
    %37 = vector.shape_cast %36 : vector<8x1x15x128xf32> to vector<8x15x128xf32>
    %38 = arith.addf %35, %37 : vector<8x15x128xf32>
    %39 = vector.broadcast %6 : vector<1x1x128xf32> to vector<8x15x128xf32>
    %40 = arith.addf %38, %39 : vector<8x15x128xf32>
    %cst_8 = arith.constant 0.000000e+00 : f32
    %41 = vector.broadcast %cst_8 : f32 to vector<8x15x128xf32>
    %42 = arith.maximumf %40, %41 : vector<8x15x128xf32>
    %cst_9 = arith.constant 0.000000e+00 : f32
    %43 = vector.broadcast %cst_9 : f32 to vector<8x1x128xf32>
    %44 = tpu.concatenate %24, %43 in 1 : vector<8x15x128xf32>, vector<8x1x128xf32> -> vector<8x16x128xf32>
    %45 = arith.truncf %44 : vector<8x16x128xf32> to vector<8x16x128xbf16>
    %46 = vector.shape_cast %45 : vector<8x16x128xbf16> to vector<128x128xbf16>
    %c0_10 = arith.constant 0 : index
    %c0_11 = arith.constant 0 : index
    %47 = vector.load %arg5[%c0_10, %c0_11] : memref<128x640xbf16, #tpu.memory_space<vmem>>, vector<128x640xbf16>
    %cst_12 = arith.constant dense<0.000000e+00> : vector<128x640xf32>
    %48 = tpu.matmul %46, %47, %cst_12 {dimension_numbers = #tpu.dot_dimension_numbers<[1], [0], [0], [1], [0, 0, 1, 1], [], []>} : vector<128x128xbf16>, vector<128x640xbf16>, vector<128x640xf32> -> vector<128x640xf32>
    %49 = vector.shape_cast %48 : vector<128x640xf32> to vector<8x16x640xf32>
    %cst_13 = arith.constant 0.000000e+00 : f32
    %50 = vector.broadcast %cst_13 : f32 to vector<8x1x640xf32>
    %51 = tpu.concatenate %50, %49 in 1 : vector<8x1x640xf32>, vector<8x16x640xf32> -> vector<8x17x640xf32>
    %cst_14 = arith.constant 0.000000e+00 : f32
    %52 = vector.broadcast %cst_14 : f32 to vector<8x1x128xf32>
    %53 = tpu.concatenate %42, %52 in 1 : vector<8x15x128xf32>, vector<8x1x128xf32> -> vector<8x16x128xf32>
    %54 = arith.truncf %53 : vector<8x16x128xf32> to vector<8x16x128xbf16>
    %55 = vector.shape_cast %54 : vector<8x16x128xbf16> to vector<128x128xbf16>
    %c0_15 = arith.constant 0 : index
    %c0_16 = arith.constant 0 : index
    %56 = vector.load %arg5[%c0_15, %c0_16] : memref<128x640xbf16, #tpu.memory_space<vmem>>, vector<128x640xbf16>
    %cst_17 = arith.constant dense<0.000000e+00> : vector<128x640xf32>
    %57 = tpu.matmul %55, %56, %cst_17 {dimension_numbers = #tpu.dot_dimension_numbers<[1], [0], [0], [1], [0, 0, 1, 1], [], []>} : vector<128x128xbf16>, vector<128x640xbf16>, vector<128x640xf32> -> vector<128x640xf32>
    %58 = vector.shape_cast %57 : vector<128x640xf32> to vector<8x16x640xf32>
    %cst_18 = arith.constant 0.000000e+00 : f32
    %59 = vector.broadcast %cst_18 : f32 to vector<8x1x640xf32>
    %60 = tpu.concatenate %59, %58 in 1 : vector<8x1x640xf32>, vector<8x16x640xf32> -> vector<8x17x640xf32>
    %c0_19 = arith.constant 0 : index
    %c0_20 = arith.constant 0 : index
    %61 = vector.load %arg6[%c0_19, %c0_20] : memref<1x128xf32, #tpu.memory_space<vmem>>, vector<1x128xf32>
    %62 = vector.shape_cast %61 : vector<1x128xf32> to vector<1x1x128xf32>
    %63 = vector.extract_strided_slice %51 {offsets = [0, 0, 0], sizes = [8, 15, 128], strides = [1, 1, 1]} : vector<8x17x640xf32> to vector<8x15x128xf32>
    %64 = vector.extract_strided_slice %60 {offsets = [0, 0, 128], sizes = [8, 15, 128], strides = [1, 1, 1]} : vector<8x17x640xf32> to vector<8x15x128xf32>
    %65 = arith.addf %63, %64 : vector<8x15x128xf32>
    %66 = vector.extract_strided_slice %51 {offsets = [0, 1, 256], sizes = [8, 15, 128], strides = [1, 1, 1]} : vector<8x17x640xf32> to vector<8x15x128xf32>
    %67 = arith.addf %65, %66 : vector<8x15x128xf32>
    %68 = vector.extract_strided_slice %60 {offsets = [0, 1, 384], sizes = [8, 15, 128], strides = [1, 1, 1]} : vector<8x17x640xf32> to vector<8x15x128xf32>
    %69 = arith.addf %67, %68 : vector<8x15x128xf32>
    %70 = vector.extract_strided_slice %51 {offsets = [0, 2, 512], sizes = [8, 15, 128], strides = [1, 1, 1]} : vector<8x17x640xf32> to vector<8x15x128xf32>
    %71 = arith.addf %69, %70 : vector<8x15x128xf32>
    %72 = vector.broadcast %62 : vector<1x1x128xf32> to vector<8x15x128xf32>
    %73 = arith.addf %71, %72 : vector<8x15x128xf32>
    %cst_21 = arith.constant 0.000000e+00 : f32
    %74 = vector.broadcast %cst_21 : f32 to vector<8x15x128xf32>
    %75 = arith.maximumf %73, %74 : vector<8x15x128xf32>
    %76 = vector.extract_strided_slice %75 {offsets = [0, 0, 0], sizes = [8, 1, 128], strides = [1, 1, 1]} : vector<8x15x128xf32> to vector<8x1x128xf32>
    %77 = vector.shape_cast %76 : vector<8x1x128xf32> to vector<8x128xf32>
    %78 = vector.extract_strided_slice %75 {offsets = [0, 1, 0], sizes = [8, 1, 128], strides = [1, 1, 1]} : vector<8x15x128xf32> to vector<8x1x128xf32>
    %79 = vector.shape_cast %78 : vector<8x1x128xf32> to vector<8x128xf32>
    %80 = vector.extract_strided_slice %75 {offsets = [0, 2, 0], sizes = [8, 1, 128], strides = [1, 1, 1]} : vector<8x15x128xf32> to vector<8x1x128xf32>
    %81 = vector.shape_cast %80 : vector<8x1x128xf32> to vector<8x128xf32>
    %82 = vector.extract_strided_slice %75 {offsets = [0, 3, 0], sizes = [8, 1, 128], strides = [1, 1, 1]} : vector<8x15x128xf32> to vector<8x1x128xf32>
    %83 = vector.shape_cast %82 : vector<8x1x128xf32> to vector<8x128xf32>
    %84 = vector.extract_strided_slice %75 {offsets = [0, 4, 0], sizes = [8, 1, 128], strides = [1, 1, 1]} : vector<8x15x128xf32> to vector<8x1x128xf32>
    %85 = vector.shape_cast %84 : vector<8x1x128xf32> to vector<8x128xf32>
    %86 = vector.extract_strided_slice %75 {offsets = [0, 5, 0], sizes = [8, 1, 128], strides = [1, 1, 1]} : vector<8x15x128xf32> to vector<8x1x128xf32>
    %87 = vector.shape_cast %86 : vector<8x1x128xf32> to vector<8x128xf32>
    %88 = vector.extract_strided_slice %75 {offsets = [0, 6, 0], sizes = [8, 1, 128], strides = [1, 1, 1]} : vector<8x15x128xf32> to vector<8x1x128xf32>
    %89 = vector.shape_cast %88 : vector<8x1x128xf32> to vector<8x128xf32>
    %90 = vector.extract_strided_slice %75 {offsets = [0, 7, 0], sizes = [8, 1, 128], strides = [1, 1, 1]} : vector<8x15x128xf32> to vector<8x1x128xf32>
    %91 = vector.shape_cast %90 : vector<8x1x128xf32> to vector<8x128xf32>
    %92 = vector.extract_strided_slice %75 {offsets = [0, 8, 0], sizes = [8, 1, 128], strides = [1, 1, 1]} : vector<8x15x128xf32> to vector<8x1x128xf32>
    %93 = vector.shape_cast %92 : vector<8x1x128xf32> to vector<8x128xf32>
    %94 = vector.extract_strided_slice %75 {offsets = [0, 9, 0], sizes = [8, 1, 128], strides = [1, 1, 1]} : vector<8x15x128xf32> to vector<8x1x128xf32>
    %95 = vector.shape_cast %94 : vector<8x1x128xf32> to vector<8x128xf32>
    %96 = vector.extract_strided_slice %75 {offsets = [0, 10, 0], sizes = [8, 1, 128], strides = [1, 1, 1]} : vector<8x15x128xf32> to vector<8x1x128xf32>
    %97 = vector.shape_cast %96 : vector<8x1x128xf32> to vector<8x128xf32>
    %98 = vector.extract_strided_slice %75 {offsets = [0, 11, 0], sizes = [8, 1, 128], strides = [1, 1, 1]} : vector<8x15x128xf32> to vector<8x1x128xf32>
    %99 = vector.shape_cast %98 : vector<8x1x128xf32> to vector<8x128xf32>
    %100 = vector.extract_strided_slice %75 {offsets = [0, 12, 0], sizes = [8, 1, 128], strides = [1, 1, 1]} : vector<8x15x128xf32> to vector<8x1x128xf32>
    %101 = vector.shape_cast %100 : vector<8x1x128xf32> to vector<8x128xf32>
    %102 = vector.extract_strided_slice %75 {offsets = [0, 13, 0], sizes = [8, 1, 128], strides = [1, 1, 1]} : vector<8x15x128xf32> to vector<8x1x128xf32>
    %103 = vector.shape_cast %102 : vector<8x1x128xf32> to vector<8x128xf32>
    %104 = vector.extract_strided_slice %75 {offsets = [0, 14, 0], sizes = [8, 1, 128], strides = [1, 1, 1]} : vector<8x15x128xf32> to vector<8x1x128xf32>
    %105 = vector.shape_cast %104 : vector<8x1x128xf32> to vector<8x128xf32>
    %106 = tpu.concatenate %77, %79, %81, %83, %85, %87, %89, %91, %93, %95, %97, %99, %101, %103, %105 in 1 : vector<8x128xf32>, vector<8x128xf32>, vector<8x128xf32>, vector<8x128xf32>, vector<8x128xf32>, vector<8x128xf32>, vector<8x128xf32>, vector<8x128xf32>, vector<8x128xf32>, vector<8x128xf32>, vector<8x128xf32>, vector<8x128xf32>, vector<8x128xf32>, vector<8x128xf32>, vector<8x128xf32> -> vector<8x1920xf32>
    %107 = arith.truncf %106 : vector<8x1920xf32> to vector<8x1920xbf16>
    %c0_22 = arith.constant 0 : index
    %c0_23 = arith.constant 0 : index
    %108 = vector.load %arg7[%c0_22, %c0_23] : memref<1920x256xbf16, #tpu.memory_space<vmem>>, vector<1920x256xbf16>
    %cst_24 = arith.constant dense<0.000000e+00> : vector<8x256xf32>
    %109 = tpu.matmul %107, %108, %cst_24 {dimension_numbers = #tpu.dot_dimension_numbers<[1], [0], [0], [1], [0, 0, 1, 1], [], []>} : vector<8x1920xbf16>, vector<1920x256xbf16>, vector<8x256xf32> -> vector<8x256xf32>
    %c0_25 = arith.constant 0 : index
    %c0_26 = arith.constant 0 : index
    %110 = vector.load %arg8[%c0_25, %c0_26] : memref<1x256xf32, #tpu.memory_space<vmem>>, vector<1x256xf32>
    %111 = vector.broadcast %110 : vector<1x256xf32> to vector<8x256xf32>
    %112 = arith.addf %109, %111 : vector<8x256xf32>
    %cst_27 = arith.constant 0.000000e+00 : f32
    %113 = vector.broadcast %cst_27 : f32 to vector<8x256xf32>
    %114 = arith.maximumf %112, %113 : vector<8x256xf32>
    %c0_28 = arith.constant 0 : index
    %c0_29 = arith.constant 0 : index
    %115 = vector.load %arg9[%c0_28, %c0_29] : memref<256x32xf32, #tpu.memory_space<vmem>>, vector<256x32xf32>
    %cst_30 = arith.constant dense<0.000000e+00> : vector<8x32xf32>
    %116 = tpu.matmul %114, %115, %cst_30 {dimension_numbers = #tpu.dot_dimension_numbers<[1], [0], [0], [1], [0, 0, 1, 1], [], []>} : vector<8x256xf32>, vector<256x32xf32>, vector<8x32xf32> -> vector<8x32xf32>
    %c0_31 = arith.constant 0 : index
    %c0_32 = arith.constant 0 : index
    %117 = vector.load %arg10[%c0_31, %c0_32] : memref<1x32xf32, #tpu.memory_space<vmem>>, vector<1x32xf32>
    %118 = vector.broadcast %117 : vector<1x32xf32> to vector<8x32xf32>
    %119 = arith.addf %116, %118 : vector<8x32xf32>
    %120 = math.tanh %119 : vector<8x32xf32>
    %c0_33 = arith.constant 0 : index
    %c0_34 = arith.constant 0 : index
    %121 = vector.load %arg2[%c0_33, %c0_34] : memref<8x2xf32, #tpu.memory_space<vmem>>, vector<8x2xf32>
    %c0_35 = arith.constant 0 : index
    %c0_36 = arith.constant 0 : index
    %122 = vector.load %arg11[%c0_35, %c0_36] : memref<2x16xf32, #tpu.memory_space<vmem>>, vector<2x16xf32>
    %123 = vector.extract_strided_slice %121 {offsets = [0, 0], sizes = [8, 1], strides = [1, 1]} : vector<8x2xf32> to vector<8x1xf32>
    %124 = vector.extract_strided_slice %122 {offsets = [0, 0], sizes = [1, 16], strides = [1, 1]} : vector<2x16xf32> to vector<1x16xf32>
    %125 = vector.broadcast %123 : vector<8x1xf32> to vector<8x16xf32>
    %126 = vector.broadcast %124 : vector<1x16xf32> to vector<8x16xf32>
    %127 = arith.mulf %125, %126 : vector<8x16xf32>
    %128 = vector.extract_strided_slice %121 {offsets = [0, 1], sizes = [8, 1], strides = [1, 1]} : vector<8x2xf32> to vector<8x1xf32>
    %129 = vector.extract_strided_slice %122 {offsets = [1, 0], sizes = [1, 16], strides = [1, 1]} : vector<2x16xf32> to vector<1x16xf32>
    %130 = vector.broadcast %128 : vector<8x1xf32> to vector<8x16xf32>
    %131 = vector.broadcast %129 : vector<1x16xf32> to vector<8x16xf32>
    %132 = arith.mulf %130, %131 : vector<8x16xf32>
    %133 = arith.addf %127, %132 : vector<8x16xf32>
    %c0_37 = arith.constant 0 : index
    %c0_38 = arith.constant 0 : index
    %134 = vector.load %arg12[%c0_37, %c0_38] : memref<1x16xf32, #tpu.memory_space<vmem>>, vector<1x16xf32>
    %135 = vector.broadcast %134 : vector<1x16xf32> to vector<8x16xf32>
    %136 = arith.addf %133, %135 : vector<8x16xf32>
    %cst_39 = arith.constant 0.000000e+00 : f32
    %137 = vector.broadcast %cst_39 : f32 to vector<8x16xf32>
    %138 = arith.maximumf %136, %137 : vector<8x16xf32>
    %c0_40 = arith.constant 0 : index
    %c0_41 = arith.constant 0 : index
    %139 = vector.load %arg13[%c0_40, %c0_41] : memref<16x16xf32, #tpu.memory_space<vmem>>, vector<16x16xf32>
    %cst_42 = arith.constant dense<0.000000e+00> : vector<8x16xf32>
    %140 = tpu.matmul %138, %139, %cst_42 {dimension_numbers = #tpu.dot_dimension_numbers<[1], [0], [0], [1], [0, 0, 1, 1], [], []>} : vector<8x16xf32>, vector<16x16xf32>, vector<8x16xf32> -> vector<8x16xf32>
    %c0_43 = arith.constant 0 : index
    %c0_44 = arith.constant 0 : index
    %141 = vector.load %arg14[%c0_43, %c0_44] : memref<1x16xf32, #tpu.memory_space<vmem>>, vector<1x16xf32>
    %142 = vector.broadcast %141 : vector<1x16xf32> to vector<8x16xf32>
    %143 = arith.addf %140, %142 : vector<8x16xf32>
    %cst_45 = arith.constant 0.000000e+00 : f32
    %144 = vector.broadcast %cst_45 : f32 to vector<8x16xf32>
    %145 = arith.maximumf %143, %144 : vector<8x16xf32>
    %c0_46 = arith.constant 0 : index
    %c0_47 = arith.constant 0 : index
    %146 = vector.load %arg15[%c0_46, %c0_47] : memref<16x128xf32, #tpu.memory_space<vmem>>, vector<16x128xf32>
    %cst_48 = arith.constant dense<0.000000e+00> : vector<8x128xf32>
    %147 = tpu.matmul %145, %146, %cst_48 {dimension_numbers = #tpu.dot_dimension_numbers<[1], [0], [0], [1], [0, 0, 1, 1], [], []>} : vector<8x16xf32>, vector<16x128xf32>, vector<8x128xf32> -> vector<8x128xf32>
    %c0_49 = arith.constant 0 : index
    %c0_50 = arith.constant 0 : index
    %148 = vector.load %arg16[%c0_49, %c0_50] : memref<32x128xf32, #tpu.memory_space<vmem>>, vector<32x128xf32>
    %cst_51 = arith.constant dense<0.000000e+00> : vector<8x128xf32>
    %149 = tpu.matmul %120, %148, %cst_51 {dimension_numbers = #tpu.dot_dimension_numbers<[1], [0], [0], [1], [0, 0, 1, 1], [], []>} : vector<8x32xf32>, vector<32x128xf32>, vector<8x128xf32> -> vector<8x128xf32>
    %150 = arith.addf %147, %149 : vector<8x128xf32>
    %c0_52 = arith.constant 0 : index
    %c0_53 = arith.constant 0 : index
    %151 = vector.load %arg17[%c0_52, %c0_53] : memref<1x128xf32, #tpu.memory_space<vmem>>, vector<1x128xf32>
    %152 = vector.broadcast %151 : vector<1x128xf32> to vector<8x128xf32>
    %153 = arith.addf %150, %152 : vector<8x128xf32>
    %cst_54 = arith.constant 0.000000e+00 : f32
    %154 = vector.broadcast %cst_54 : f32 to vector<8x128xf32>
    %155 = arith.maximumf %153, %154 : vector<8x128xf32>
    %c0_55 = arith.constant 0 : index
    %c0_56 = arith.constant 0 : index
    %156 = vector.load %arg18[%c0_55, %c0_56] : memref<128x128xf32, #tpu.memory_space<vmem>>, vector<128x128xf32>
    %cst_57 = arith.constant dense<0.000000e+00> : vector<8x128xf32>
    %157 = tpu.matmul %155, %156, %cst_57 {dimension_numbers = #tpu.dot_dimension_numbers<[1], [0], [0], [1], [0, 0, 1, 1], [], []>} : vector<8x128xf32>, vector<128x128xf32>, vector<8x128xf32> -> vector<8x128xf32>
    %c0_58 = arith.constant 0 : index
    %c0_59 = arith.constant 0 : index
    %158 = vector.load %arg19[%c0_58, %c0_59] : memref<1x128xf32, #tpu.memory_space<vmem>>, vector<1x128xf32>
    %159 = vector.broadcast %158 : vector<1x128xf32> to vector<8x128xf32>
    %160 = arith.addf %157, %159 : vector<8x128xf32>
    %cst_60 = arith.constant 0.000000e+00 : f32
    %161 = vector.broadcast %cst_60 : f32 to vector<8x128xf32>
    %162 = arith.maximumf %160, %161 : vector<8x128xf32>
    %c0_61 = arith.constant 0 : index
    %c0_62 = arith.constant 0 : index
    %163 = vector.load %arg20[%c0_61, %c0_62] : memref<1x128xf32, #tpu.memory_space<vmem>>, vector<1x128xf32>
    %164 = vector.broadcast %163 : vector<1x128xf32> to vector<8x128xf32>
    %165 = arith.mulf %162, %164 : vector<8x128xf32>
    %cst_63 = arith.constant dense<0.000000e+00> : vector<8xf32>
    %166 = vector.multi_reduction <add>, %165, %cst_63 [1] : vector<8x128xf32> to vector<8xf32>
    %167 = vector.shape_cast %166 : vector<8xf32> to vector<8x1xf32>
    %c0_64 = arith.constant 0 : index
    %c0_65 = arith.constant 0 : index
    %168 = vector.load %arg21[%c0_64, %c0_65] : memref<1x1xf32, #tpu.memory_space<vmem>>, vector<1x1xf32>
    %169 = vector.broadcast %168 : vector<1x1xf32> to vector<8x1xf32>
    %170 = arith.addf %167, %169 : vector<8x1xf32>
    %c0_66 = arith.constant 0 : index
    %c0_67 = arith.constant 0 : index
    %171 = vector.load %arg22[%c0_66, %c0_67] : memref<8x1xf32, #tpu.memory_space<vmem>>, vector<8x1xf32>
    tpu.vector_store %arg22[%c0_66, %c0_67], %170 {strides = array<i32>} : memref<8x1xf32, #tpu.memory_space<vmem>>, vector<8x1xf32>,
    return
  }
  func.func @transform_0(%arg0: i32) -> (i32, i32, i32, i32) {
    %c0_i32 = arith.constant 0 : i32
    %c0_i32_0 = arith.constant 0 : i32
    %c0_i32_1 = arith.constant 0 : i32
    %c0_i32_2 = arith.constant 0 : i32
    return %arg0, %c0_i32, %c0_i32_0, %c0_i32_1 : i32, i32, i32, i32
  }
  func.func @transform_1(%arg0: i32) -> (i32, i32) {
    %c0_i32 = arith.constant 0 : i32
    %c0_i32_0 = arith.constant 0 : i32
    return %arg0, %c0_i32 : i32, i32
  }
  func.func @transform_2(%arg0: i32) -> (i32, i32) {
    %c0_i32 = arith.constant 0 : i32
    %c0_i32_0 = arith.constant 0 : i32
    %c0_i32_1 = arith.constant 0 : i32
    return %c0_i32, %c0_i32_0 : i32, i32
  }
  func.func @transform_3(%arg0: i32) -> (i32, i32) {
    %c0_i32 = arith.constant 0 : i32
    %c0_i32_0 = arith.constant 0 : i32
    %c0_i32_1 = arith.constant 0 : i32
    return %c0_i32, %c0_i32_0 : i32, i32
  }
  func.func @transform_4(%arg0: i32) -> (i32, i32) {
    %c0_i32 = arith.constant 0 : i32
    %c0_i32_0 = arith.constant 0 : i32
    %c0_i32_1 = arith.constant 0 : i32
    return %c0_i32, %c0_i32_0 : i32, i32
  }
  func.func @transform_5(%arg0: i32) -> (i32, i32) {
    %c0_i32 = arith.constant 0 : i32
    %c0_i32_0 = arith.constant 0 : i32
    %c0_i32_1 = arith.constant 0 : i32
    return %c0_i32, %c0_i32_0 : i32, i32
  }
  func.func @transform_6(%arg0: i32) -> (i32, i32) {
    %c0_i32 = arith.constant 0 : i32
    %c0_i32_0 = arith.constant 0 : i32
    %c0_i32_1 = arith.constant 0 : i32
    return %c0_i32, %c0_i32_0 : i32, i32
  }
  func.func @transform_7(%arg0: i32) -> (i32, i32) {
    %c0_i32 = arith.constant 0 : i32
    %c0_i32_0 = arith.constant 0 : i32
    %c0_i32_1 = arith.constant 0 : i32
    return %c0_i32, %c0_i32_0 : i32, i32
  }
  func.func @transform_8(%arg0: i32) -> (i32, i32) {
    %c0_i32 = arith.constant 0 : i32
    %c0_i32_0 = arith.constant 0 : i32
    %c0_i32_1 = arith.constant 0 : i32
    return %c0_i32, %c0_i32_0 : i32, i32
  }
  func.func @transform_9(%arg0: i32) -> (i32, i32) {
    %c0_i32 = arith.constant 0 : i32
    %c0_i32_0 = arith.constant 0 : i32
    %c0_i32_1 = arith.constant 0 : i32
    return %c0_i32, %c0_i32_0 : i32, i32
  }
  func.func @transform_10(%arg0: i32) -> (i32, i32) {
    %c0_i32 = arith.constant 0 : i32
    %c0_i32_0 = arith.constant 0 : i32
    %c0_i32_1 = arith.constant 0 : i32
    return %c0_i32, %c0_i32_0 : i32, i32
  }
  func.func @transform_11(%arg0: i32) -> (i32, i32) {
    %c0_i32 = arith.constant 0 : i32
    %c0_i32_0 = arith.constant 0 : i32
    %c0_i32_1 = arith.constant 0 : i32
    return %c0_i32, %c0_i32_0 : i32, i32
  }
  func.func @transform_12(%arg0: i32) -> (i32, i32) {
    %c0_i32 = arith.constant 0 : i32
    %c0_i32_0 = arith.constant 0 : i32
    %c0_i32_1 = arith.constant 0 : i32
    return %c0_i32, %c0_i32_0 : i32, i32
  }
  func.func @transform_13(%arg0: i32) -> (i32, i32) {
    %c0_i32 = arith.constant 0 : i32
    %c0_i32_0 = arith.constant 0 : i32
    %c0_i32_1 = arith.constant 0 : i32
    return %c0_i32, %c0_i32_0 : i32, i32
  }
  func.func @transform_14(%arg0: i32) -> (i32, i32) {
    %c0_i32 = arith.constant 0 : i32
    %c0_i32_0 = arith.constant 0 : i32
    %c0_i32_1 = arith.constant 0 : i32
    return %c0_i32, %c0_i32_0 : i32, i32
  }
  func.func @transform_15(%arg0: i32) -> (i32, i32) {
    %c0_i32 = arith.constant 0 : i32
    %c0_i32_0 = arith.constant 0 : i32
    %c0_i32_1 = arith.constant 0 : i32
    return %c0_i32, %c0_i32_0 : i32, i32
  }
  func.func @transform_16(%arg0: i32) -> (i32, i32) {
    %c0_i32 = arith.constant 0 : i32
    %c0_i32_0 = arith.constant 0 : i32
    %c0_i32_1 = arith.constant 0 : i32
    return %c0_i32, %c0_i32_0 : i32, i32
  }
  func.func @transform_17(%arg0: i32) -> (i32, i32) {
    %c0_i32 = arith.constant 0 : i32
    %c0_i32_0 = arith.constant 0 : i32
    %c0_i32_1 = arith.constant 0 : i32
    return %c0_i32, %c0_i32_0 : i32, i32
  }
  func.func @transform_18(%arg0: i32) -> (i32, i32) {
    %c0_i32 = arith.constant 0 : i32
    %c0_i32_0 = arith.constant 0 : i32
    %c0_i32_1 = arith.constant 0 : i32
    return %c0_i32, %c0_i32_0 : i32, i32
  }
  func.func @transform_19(%arg0: i32) -> (i32, i32) {
    %c0_i32 = arith.constant 0 : i32
    %c0_i32_0 = arith.constant 0 : i32
    %c0_i32_1 = arith.constant 0 : i32
    return %c0_i32, %c0_i32_0 : i32, i32
  }
  func.func @transform_20(%arg0: i32) -> (i32, i32) {
    %c0_i32 = arith.constant 0 : i32
    %c0_i32_0 = arith.constant 0 : i32
    %c0_i32_1 = arith.constant 0 : i32
    return %c0_i32, %c0_i32_0 : i32, i32
  }
  func.func @transform_21(%arg0: i32) -> (i32, i32) {
    %c0_i32 = arith.constant 0 : i32
    %c0_i32_0 = arith.constant 0 : i32
    return %arg0, %c0_i32 : i32, i32
  }
}

</mosaic_0001>

<bundles_post_ra>
// kernel: critic_forward.1
= control target key start
LH: loop header
LB: loop body
LE: loop exit
PB: predicated region body
PF: predicated region fallthrough
CT: control target
= control target key end

     0   :  { %v10664_v1 = vmov 0   ;;  %vm1867_vm0 = vcmask 1046528   ;;  %vm7530_vm1 = vmmov 1   ;;  %vm2837_vm3 = vcmask 1040384   ;;  %s10637_s2 = inlined_call_operand.vmem [shape: bf16[256,640], index: 2, kind: input, shape index: {}]   ;;  %s10638_s0 = inlined_call_operand.vmem [shape: bf16[8,4,16,256], index: 0, kind: input, shape index: {}]   ;;  %s10639_s4 = inlined_call_operand.vmem [shape: bf16[128,640], index: 4, kind: input, shape index: {}]   ;;  %s10640_s3 = inlined_call_operand.vmem [shape: f32[1,128], index: 3, kind: input, shape index: {}]   ;;  %s10641_s6 = inlined_call_operand.vmem [shape: bf16[1920,256], index: 6, kind: input, shape index: {}]   ;;  %s10642_s5 = inlined_call_operand.vmem [shape: f32[1,128], index: 5, kind: input, shape index: {}]   ;;  %s10643_s1 = inlined_call_operand.vmem [shape: f32[8,2], index: 1, kind: input, shape index: {}]   ;;  %s10644_s7 = inlined_call_operand.vmem [shape: f32[1,256], index: 7, kind: input, shape index: {}]   ;;  %s10645_s8 = inlined_call_operand.vmem [shape: f32[256,32], index: 8, kind: input, shape index: {}]   ;;  %s10646_s10 = inlined_call_operand.vmem [shape: f32[2,16], index: 10, kind: input, shape index: {}]   ;;  %s10647_s11 = inlined_call_operand.vmem [shape: f32[1,16], index: 11, kind: input, shape index: {}]   ;;  %s10648_s12 = inlined_call_operand.vmem [shape: f32[16,16], index: 12, kind: input, shape index: {}]   ;;  %s10649_s14 = inlined_call_operand.vmem [shape: f32[16,128], index: 14, kind: input, shape index: {}]   ;;  %s10650_s15 = inlined_call_operand.vmem [shape: f32[32,128], index: 15, kind: input, shape index: {}]   ;;  %s10651_s9 = inlined_call_operand.vmem [shape: f32[1,32], index: 9, kind: input, shape index: {}]   ;;  %s10652_s13 = inlined_call_operand.vmem [shape: f32[1,16], index: 13, kind: input, shape index: {}]   ;;  %s10653_s17 = inlined_call_operand.vmem [shape: f32[128,128], index: 17, kind: input, shape index: {}]   ;;  %s10654_s16 = inlined_call_operand.vmem [shape: f32[1,128], index: 16, kind: input, shape index: {}]   ;;  %s10655_s20 = inlined_call_operand.<no memory space> [shape: f32[1,1], index: 20, kind: input, shape index: {}]   ;;  %s10656_s18 = inlined_call_operand.vmem [shape: f32[1,128], index: 18, kind: input, shape index: {}]   ;;  %s10657_s19 = inlined_call_operand.vmem [shape: f32[1,128], index: 19, kind: input, shape index: {}]   ;;  %s10658_s21 = inlined_call_operand.vmem [shape: f32[8,1], index: 21, kind: output, shape index: {}]  }
   0x1   :  { %10685 = sst [smem:[#allocation4_spill]] %s10637_s2  ;;  %6842 = vset.pattern.permute.xlu0 %v10664_v1  ;;  %vm8527_vm2 = vmpackc.low %vm1867_vm0, %vm7530_vm1  ;;  %vm3449_vm4 = vcmask 1045504   ;;  %vm3569_vm5 = vcmask 1041409   ;;  %vm3572_vm6 = vcmask 1042434   ;;  %vm3575_vm7 = vcmask 1043459  }
   0x2   :  { %10686 = sst [smem:[#allocation5_spill]] %s10638_s0  ;;  %vm3578_vm8 = vcmask 1044484   ;;  %vm3581_vm9 = vcmask 1045509   ;;  %vm3584_vm10 = vcmask 1046534   ;;  %vm3587_vm11 = vcmask 1047559  }
   0x3   :  { %10687 = sst [smem:[#allocation6_spill]] %s10639_s4  ;;  %vm7533_vm12 = vmmov 0   ;;  %vm5755_vm13 = vcmask 130048   ;;  %vm5836_vm14 = vcmask 261120   ;;  %vm6104_vm15 = vcmask 7168  }
   0x4   :  { %10688 = sst [smem:[#allocation7_spill]] %s10640_s3 }
   0x5   :  { %10689 = sst [smem:[#allocation8_spill]] %s10641_s6 }
   0x6   :  { %10690 = sst [smem:[#allocation9_spill]] %s10642_s5 }
   0x7   :  { %s10691_s26 = sld [smem:[#allocation4_spill]] }
   0x8   :  { %s10692_s4 = sld [smem:[#allocation5_spill]] }
   0x9   :  { %s10694_s2 = sld [smem:[#allocation6_spill]] }
   0xa   :  { %s10696_s25 = sld [smem:[#allocation7_spill]] }
   0xb   :  { %s10720_s3 = sld [smem:[#allocation9_spill]] }
   0xd   :  { %v6844_v0 = vld [vmem:[%s10691_s26 + $0x11c] ss:$20 sps:$4 sm:$0xff]   ;;  %v6846_v2 = vld [vmem:[%s10691_s26 + $0x124] ss:$20 sps:$4 sm:$0xff]   ;;  %v6849_v4 = vld [vmem:[%s10691_s26 + $0x120] ss:$20 sps:$4 sm:$0xff]  }
   0xe   :  { %967 = vmatprep.subr.bf16.mxu0 %v6844_v0  ;;  %v6848_v3 = vld [vmem:[%s10691_s26 + $0x118] ss:$20 sps:$4 sm:$0xff]   ;;  %1256 = vmatprep.subr.bf16.mxu1 %v6846_v2  ;;  %v6850_v5 = vld [vmem:[%s10691_s26 + $0xf4] ss:$20 sps:$4 sm:$0xff]   ;;  %v6852_v6 = vld [vmem:[%s10691_s26 + $0xfc] ss:$20 sps:$4 sm:$0xff]  }
   0xf   :  { %968 = vmatpush1.bf16.msra.mxu0 %v6848_v3  ;;  %1257 = vmatpush1.bf16.msra.mxu1 %v6849_v4  ;;  %v6854_v7 = vld [vmem:[%s10691_s26 + $0xf0] ss:$20 sps:$4 sm:$0xff]   ;;  %v6855_v8 = vld [vmem:[%s10691_s26 + $0xf8] ss:$20 sps:$4 sm:$0xff]   ;;  %v6858_v10 = vld [vmem:[%s10691_s26 + $0xd4] ss:$20 sps:$4 sm:$0xff]  }
  0x10   :  { %969 = vmatprep.subr.bf16.mxu0 %v6850_v5  ;;  %1258 = vmatprep.subr.bf16.mxu1 %v6852_v6  ;;  %v6856_v9 = vld [vmem:[%s10691_s26 + $0xcc] ss:$20 sps:$4 sm:$0xff]   ;;  %v6860_v11 = vld [vmem:[%s10691_s26 + $0xc8] ss:$20 sps:$4 sm:$0xff]   ;;  %v6861_v12 = vld [vmem:[%s10691_s26 + $0xd0] ss:$20 sps:$4 sm:$0xff]  }
  0x11   :  { %v6862_v13 = vld [vmem:[%s10691_s26 + $0xa4] ss:$20 sps:$4 sm:$0xff]   ;;  %v6864_v14 = vld [vmem:[%s10691_s26 + $0xac] ss:$20 sps:$4 sm:$0xff]   ;;  %v6867_v16 = vld [vmem:[%s10691_s26 + $0xa8] ss:$20 sps:$4 sm:$0xff]  }
  0x12   :  { %v6866_v15 = vld [vmem:[%s10691_s26 + $0xa0] ss:$20 sps:$4 sm:$0xff]   ;;  %v6868_v17 = vld [vmem:[%s10691_s26 + $0x7c] ss:$20 sps:$4 sm:$0xff]   ;;  %v6870_v18 = vld [vmem:[%s10691_s26 + $0x84] ss:$20 sps:$4 sm:$0xff]  }
  0x13   :  { %970 = vmatpush1.bf16.msra.mxu0 %v6854_v7  ;;  %1259 = vmatpush1.bf16.msra.mxu1 %v6855_v8  ;;  %v6872_v19 = vld [vmem:[%s10691_s26 + $0x78] ss:$20 sps:$4 sm:$0xff]   ;;  %v6873_v20 = vld [vmem:[%s10691_s26 + $0x80] ss:$20 sps:$4 sm:$0xff]   ;;  %v6876_v22 = vld [vmem:[%s10691_s26 + $0x5c] ss:$20 sps:$4 sm:$0xff]  }
  0x14   :  { %971 = vmatprep.subr.bf16.mxu0 %v6856_v9  ;;  %1260 = vmatprep.subr.bf16.mxu1 %v6858_v10  ;;  %v6874_v21 = vld [vmem:[%s10691_s26 + $0x54] ss:$20 sps:$4 sm:$0xff]   ;;  %v6878_v23 = vld [vmem:[%s10691_s26 + $0x50] ss:$20 sps:$4 sm:$0xff]   ;;  %v6879_v24 = vld [vmem:[%s10691_s26 + $0x58] ss:$20 sps:$4 sm:$0xff]  }
  0x15   :  { %v6880_v25 = vld [vmem:[%s10691_s26 + $0x2c] ss:$20 sps:$4 sm:$0xff]   ;;  %v6882_v26 = vld [vmem:[%s10691_s26 + $0x34] ss:$20 sps:$4 sm:$0xff]   ;;  %v6885_v28 = vld [vmem:[%s10691_s26 + $0x30] ss:$20 sps:$4 sm:$0xff]  }
  0x16   :  { %v6884_v27 = vld [vmem:[%s10691_s26 + $0x28] ss:$20 sps:$4 sm:$0xff]   ;;  %v6886_v29 = vld [vmem:[%s10691_s26 + $0x4] ss:$20 sps:$4 sm:$0xff]   ;;  %v6888_v30 = vld [vmem:[%s10691_s26 + $0xc] ss:$20 sps:$4 sm:$0xff]  }
  0x17   :  { %972 = vmatpush1.bf16.msra.mxu0 %v6860_v11  ;;  %1261 = vmatpush1.bf16.msra.mxu1 %v6861_v12  ;;  %v6890_v31 = vld [vmem:[%s10691_s26] ss:$20 sps:$4 sm:$0xff]   ;;  %v6891_v32 = vld [vmem:[%s10691_s26 + $0x8] ss:$20 sps:$4 sm:$0xff]   ;;  %v6894_v34 = vld [vmem:[%s10691_s26 + $0x264] ss:$20 sps:$4 sm:$0xff]  }
  0x18   :  { %973 = vmatprep.subr.bf16.mxu0 %v6862_v13  ;;  %1262 = vmatprep.subr.bf16.mxu1 %v6864_v14  ;;  %v6892_v33 = vld [vmem:[%s10691_s26 + $0x25c] ss:$20 sps:$4 sm:$0xff]   ;;  %v6896_v35 = vld [vmem:[%s10691_s26 + $0x258] ss:$20 sps:$4 sm:$0xff]   ;;  %v6897_v36 = vld [vmem:[%s10691_s26 + $0x260] ss:$20 sps:$4 sm:$0xff]  }
  0x19   :  { %v6898_v37 = vld [vmem:[%s10691_s26 + $0x234] ss:$20 sps:$4 sm:$0xff]   ;;  %v6900_v38 = vld [vmem:[%s10691_s26 + $0x23c] ss:$20 sps:$4 sm:$0xff]   ;;  %v6903_v40 = vld [vmem:[%s10691_s26 + $0x238] ss:$20 sps:$4 sm:$0xff]  }
  0x1a   :  { %v6902_v39 = vld [vmem:[%s10691_s26 + $0x230] ss:$20 sps:$4 sm:$0xff]   ;;  %v6904_v41 = vld [vmem:[%s10691_s26 + $0x20c] ss:$20 sps:$4 sm:$0xff]   ;;  %v6906_v42 = vld [vmem:[%s10691_s26 + $0x214] ss:$20 sps:$4 sm:$0xff]  }
  0x1b   :  { %974 = vmatpush1.bf16.msra.mxu0 %v6866_v15  ;;  %1263 = vmatpush1.bf16.msra.mxu1 %v6867_v16  ;;  %v6908_v43 = vld [vmem:[%s10691_s26 + $0x208] ss:$20 sps:$4 sm:$0xff]   ;;  %v6909_v44 = vld [vmem:[%s10691_s26 + $0x210] ss:$20 sps:$4 sm:$0xff]   ;;  %v6912_v46 = vld [vmem:[%s10691_s26 + $0x1ec] ss:$20 sps:$4 sm:$0xff]  }
  0x1c   :  { %975 = vmatprep.subr.bf16.mxu0 %v6868_v17  ;;  %1264 = vmatprep.subr.bf16.mxu1 %v6870_v18  ;;  %v6910_v45 = vld [vmem:[%s10691_s26 + $0x1e4] ss:$20 sps:$4 sm:$0xff]   ;;  %v6914_v47 = vld [vmem:[%s10691_s26 + $0x1e0] ss:$20 sps:$4 sm:$0xff]   ;;  %v6915_v48 = vld [vmem:[%s10691_s26 + $0x1e8] ss:$20 sps:$4 sm:$0xff]  }
  0x1d   :  { %v7792_v49 = vld [vmem:[%s10692_s4 + $0x4] ss:$8 sps:$4 sm:$0xff]   ;;  %v6916_v50 = vld [vmem:[%s10691_s26 + $0x1bc] ss:$20 sps:$4 sm:$0xff]   ;;  %v6921_v53 = vld [vmem:[%s10691_s26 + $0x1c0] ss:$20 sps:$4 sm:$0xff]  }
  0x1e   :  { %v6918_v51 = vld [vmem:[%s10691_s26 + $0x1c4] ss:$20 sps:$4 sm:$0xff]   ;;  %999 = vmatprep.mubr.bf16.mxu0 %v7792_v49  ;;  %1288 = vmatprep.mubr.bf16.mxu1 %v7792_v49  ;;  %v6922_v54 = vld [vmem:[%s10691_s26 + $0x194] ss:$20 sps:$4 sm:$0xff]   ;;  %v6924_v55 = vld [vmem:[%s10691_s26 + $0x19c] ss:$20 sps:$4 sm:$0xff]  }
  0x1f   :  { %976 = vmatpush1.bf16.msra.mxu0 %v6872_v19  ;;  %1265 = vmatpush1.bf16.msra.mxu1 %v6873_v20  ;;  %v6920_v52 = vld [vmem:[%s10691_s26 + $0x1b8] ss:$20 sps:$4 sm:$0xff]   ;;  %v6926_v56 = vld [vmem:[%s10691_s26 + $0x190] ss:$20 sps:$4 sm:$0xff]   ;;  %v6930_v59 = vld [vmem:[%s10691_s26 + $0x174] ss:$20 sps:$4 sm:$0xff]  }
  0x20   :  { %977 = vmatprep.subr.bf16.mxu0 %v6874_v21  ;;  %1266 = vmatprep.subr.bf16.mxu1 %v6876_v22  ;;  %v6927_v57 = vld [vmem:[%s10691_s26 + $0x198] ss:$20 sps:$4 sm:$0xff]   ;;  %v6932_v60 = vld [vmem:[%s10691_s26 + $0x168] ss:$20 sps:$4 sm:$0xff]   ;;  %v6933_v61 = vld [vmem:[%s10691_s26 + $0x170] ss:$20 sps:$4 sm:$0xff]  }
  0x21   :  { %v6928_v58 = vld [vmem:[%s10691_s26 + $0x16c] ss:$20 sps:$4 sm:$0xff]   ;;  %v6934_v62 = vld [vmem:[%s10691_s26 + $0x144] ss:$20 sps:$4 sm:$0xff]   ;;  %v6939_v2 = vld [vmem:[%s10691_s26 + $0x148] ss:$20 sps:$4 sm:$0xff]  }
  0x22   :  { %v6936_v63 = vld [vmem:[%s10691_s26 + $0x14c] ss:$20 sps:$4 sm:$0xff]   ;;  %v6943_v4 = vld [vmem:[%s10691_s26 + $0x128] ss:$20 sps:$4 sm:$0xff]   ;;  %v7869_v7 = vld [vmem:[%s10692_s4 + $0x10] ss:$8 sps:$4 sm:$0xff]  }
  0x23   :  { %978 = vmatpush1.bf16.msra.mxu0 %v6878_v23  ;;  %1267 = vmatpush1.bf16.msra.mxu1 %v6879_v24  ;;  %v6938_v0 = vld [vmem:[%s10691_s26 + $0x140] ss:$20 sps:$4 sm:$0xff]   ;;  %v7874_v8 = vld [vmem:[%s10692_s4 + $0x24] ss:$8 sps:$4 sm:$0xff]   ;;  %v6971_v13 = vld [vmem:[%s10691_s26 + $0x88] ss:$20 sps:$4 sm:$0xff]  }
  0x24   :  { %979 = vmatprep.subr.bf16.mxu0 %v6880_v25  ;;  %1268 = vmatprep.subr.bf16.mxu1 %v6882_v26  ;;  %v7847_v3 = vld [vmem:[%s10692_s4] ss:$8 sps:$4 sm:$0xff]   ;;  %v7855_v5 = vld [vmem:[%s10692_s4 + $0x14] ss:$8 sps:$4 sm:$0xff]   ;;  %v6957_v9 = vld [vmem:[%s10691_s26 + $0xd8] ss:$20 sps:$4 sm:$0xff]  }
  0x25   :  { %v6950_v6 = vld [vmem:[%s10691_s26 + $0x100] ss:$20 sps:$4 sm:$0xff]   ;;  %v6964_v10 = vld [vmem:[%s10691_s26 + $0xb0] ss:$20 sps:$4 sm:$0xff]   ;;  %v6985_v17 = vld [vmem:[%s10691_s26 + $0x38] ss:$20 sps:$4 sm:$0xff]  }
  0x26   :  { %v7890_v11 = vld [vmem:[%s10692_s4 + $0x20] ss:$8 sps:$4 sm:$0xff]   ;;  %v7895_v12 = vld [vmem:[%s10692_s4 + $0x34] ss:$8 sps:$4 sm:$0xff]   ;;  %v7912_v15 = vld [vmem:[%s10692_s4 + $0x30] ss:$8 sps:$4 sm:$0xff]  }
  0x27   :  { %980 = vmatpush1.bf16.msra.mxu0 %v6884_v27  ;;  %1269 = vmatpush1.bf16.msra.mxu1 %v6885_v28  ;;  %v6978_v14 = vld [vmem:[%s10691_s26 + $0x60] ss:$20 sps:$4 sm:$0xff]   ;;  %v7917_v16 = vld [vmem:[%s10692_s4 + $0x44] ss:$8 sps:$4 sm:$0xff]   ;;  %v6999_v21 = vld [vmem:[%s10691_s26 + $0x268] ss:$20 sps:$4 sm:$0xff]  }
  0x28   :  { %981 = vmatprep.subr.bf16.mxu0 %v6886_v29  ;;  %1270 = vmatprep.subr.bf16.mxu1 %v6888_v30  ;;  %v6992_v18 = vld [vmem:[%s10691_s26 + $0x10] ss:$20 sps:$4 sm:$0xff]   ;;  %v7935_v19 = vld [vmem:[%s10692_s4 + $0x40] ss:$8 sps:$4 sm:$0xff]   ;;  %v7940_v20 = vld [vmem:[%s10692_s4 + $0x54] ss:$8 sps:$4 sm:$0xff]  }
  0x29   :  { %v7006_v22 = vld [vmem:[%s10691_s26 + $0x240] ss:$20 sps:$4 sm:$0xff]   ;;  %v7957_v23 = vld [vmem:[%s10692_s4 + $0x50] ss:$8 sps:$4 sm:$0xff]   ;;  %v7962_v24 = vld [vmem:[%s10692_s4 + $0x64] ss:$8 sps:$4 sm:$0xff]  }
  0x2a   :  { %v7013_v25 = vld [vmem:[%s10691_s26 + $0x218] ss:$20 sps:$4 sm:$0xff]   ;;  %v7976_v26 = vld [vmem:[%s10692_s4 + $0x60] ss:$8 sps:$4 sm:$0xff]   ;;  %v7981_v27 = vld [vmem:[%s10692_s4 + $0x74] ss:$8 sps:$4 sm:$0xff]  }
  0x2b   :  { %982 = vmatpush1.bf16.msra.mxu0 %v6890_v31  ;;  %1271 = vmatpush1.bf16.msra.mxu1 %v6891_v32  ;;  %v7020_v28 = vld [vmem:[%s10691_s26 + $0x1f0] ss:$20 sps:$4 sm:$0xff]   ;;  %v8008_v31 = vld [vmem:[%s10692_s4 + $0x80] ss:$8 sps:$4 sm:$0xff]   ;;  %v8013_v32 = vld [vmem:[%s10692_s4 + $0x94] ss:$8 sps:$4 sm:$0xff]  }
  0x2c   :  { %983 = vmatprep.subr.bf16.mxu0 %v6892_v33  ;;  %1272 = vmatprep.subr.bf16.mxu1 %v6894_v34  ;;  %v7994_v29 = vld [vmem:[%s10692_s4 + $0x70] ss:$8 sps:$4 sm:$0xff]   ;;  %v7999_v30 = vld [vmem:[%s10692_s4 + $0x84] ss:$8 sps:$4 sm:$0xff]   ;;  %v7027_v33 = vld [vmem:[%s10691_s26 + $0x1c8] ss:$20 sps:$4 sm:$0xff]  }
  0x2d   :  { %v8025_v34 = vld [vmem:[%s10692_s4 + $0x90] ss:$8 sps:$4 sm:$0xff]  }
  0x2f   :  { %984 = vmatpush2.bf16.msra.mxu0 %v6896_v35  ;;  %1273 = vmatpush2.bf16.msra.mxu1 %v6897_v36  ;;  %v8031_v35 = vld [vmem:[%s10692_s4 + $0xa4] ss:$8 sps:$4 sm:$0xff]   ;;  %v8040_v36 = vld [vmem:[%s10692_s4 + $0xa0] ss:$8 sps:$4 sm:$0xff]  }
  0x30   :  { %985 = vmatprep.subr.bf16.mxu0 %v6898_v37  ;;  %1274 = vmatprep.subr.bf16.mxu1 %v6900_v38  ;;  %v8045_v37 = vld [vmem:[%s10692_s4 + $0xb4] ss:$8 sps:$4 sm:$0xff]  }
  0x31   :  { %v7034_v38 = vld [vmem:[%s10691_s26 + $0x1a0] ss:$20 sps:$4 sm:$0xff]  }
  0x33   :  { %986 = vmatpush2.bf16.msra.mxu0 %v6902_v39  ;;  %1275 = vmatpush2.bf16.msra.mxu1 %v6903_v40  ;;  %v8057_v39 = vld [vmem:[%s10692_s4 + $0xb0] ss:$8 sps:$4 sm:$0xff]   ;;  %v8063_v40 = vld [vmem:[%s10692_s4 + $0xc4] ss:$8 sps:$4 sm:$0xff]  }
  0x34   :  { %987 = vmatprep.subr.bf16.mxu0 %v6904_v41  ;;  %1276 = vmatprep.subr.bf16.mxu1 %v6906_v42  ;;  %v8072_v41 = vld [vmem:[%s10692_s4 + $0xc0] ss:$8 sps:$4 sm:$0xff]   ;;  %v8077_v42 = vld [vmem:[%s10692_s4 + $0xd4] ss:$8 sps:$4 sm:$0xff]  }
  0x37   :  { %988 = vmatpush2.bf16.msra.mxu0 %v6908_v43  ;;  %1277 = vmatpush2.bf16.msra.mxu1 %v6909_v44  ;;  %v7041_v43 = vld [vmem:[%s10691_s26 + $0x178] ss:$20 sps:$4 sm:$0xff]  }
  0x38   :  { %989 = vmatprep.subr.bf16.mxu0 %v6910_v45  ;;  %1278 = vmatprep.subr.bf16.mxu1 %v6912_v46  ;;  %v8089_v44 = vld [vmem:[%s10692_s4 + $0xd0] ss:$8 sps:$4 sm:$0xff]   ;;  %v8095_v45 = vld [vmem:[%s10692_s4 + $0xe4] ss:$8 sps:$4 sm:$0xff]   ;;  %v8104_v46 = vld [vmem:[%s10692_s4 + $0xe0] ss:$8 sps:$4 sm:$0xff]  }
  0x3b   :  { %990 = vmatpush2.bf16.msra.mxu0 %v6914_v47  ;;  %1279 = vmatpush2.bf16.msra.mxu1 %v6915_v48  ;;  %v8109_v47 = vld [vmem:[%s10692_s4 + $0xf4] ss:$8 sps:$4 sm:$0xff]   ;;  %v7048_v48 = vld [vmem:[%s10691_s26 + $0x150] ss:$20 sps:$4 sm:$0xff]   ;;  %s10704_s26 = sld [smem:[#allocation8_spill]] }
  0x3c   :  { %991 = vmatprep.subr.bf16.mxu0 %v6916_v50  ;;  %1280 = vmatprep.subr.bf16.mxu1 %v6918_v51  ;;  %v8121_v50 = vld [vmem:[%s10692_s4 + $0xf0] ss:$8 sps:$4 sm:$0xff]   ;;  %v8126_v51 = vld [vmem:[%s10692_s4 + $0x104] ss:$8 sps:$4 sm:$0xff]  }
  0x3f   :  { %992 = vmatpush2.bf16.msra.mxu0 %v6920_v52  ;;  %1281 = vmatpush2.bf16.msra.mxu1 %v6921_v53  ;;  %v8135_v52 = vld [vmem:[%s10692_s4 + $0x100] ss:$8 sps:$4 sm:$0xff]   ;;  %v8140_v53 = vld [vmem:[%s10692_s4 + $0x114] ss:$8 sps:$4 sm:$0xff]  }
  0x40   :  { %993 = vmatprep.subr.bf16.mxu0 %v6922_v54  ;;  %1282 = vmatprep.subr.bf16.mxu1 %v6924_v55  ;;  %v8149_v54 = vld [vmem:[%s10692_s4 + $0x110] ss:$8 sps:$4 sm:$0xff]   ;;  %v8154_v55 = vld [vmem:[%s10692_s4 + $0x124] ss:$8 sps:$4 sm:$0xff]  }
  0x43   :  { %994 = vmatpush2.bf16.msra.mxu0 %v6926_v56  ;;  %1283 = vmatpush2.bf16.msra.mxu1 %v6927_v57  ;;  %v7005_v56 = vld [vmem:[%s10692_s4 + $0x120] ss:$8 sps:$4 sm:$0xff]   ;;  %v7007_v57 = vld [vmem:[%s10692_s4 + $0x134] ss:$8 sps:$4 sm:$0xff]  }
  0x44   :  { %995 = vmatprep.subr.bf16.mxu0 %v6928_v58  ;;  %1284 = vmatprep.subr.bf16.mxu1 %v6930_v59  ;;  %v7009_v58 = vld [vmem:[%s10692_s4 + $0x130] ss:$8 sps:$4 sm:$0xff]   ;;  %v7010_v59 = vld [vmem:[%s10692_s4 + $0x144] ss:$8 sps:$4 sm:$0xff]  }
  0x47   :  { %996 = vmatpush2.bf16.msra.mxu0 %v6932_v60  ;;  %1285 = vmatpush2.bf16.msra.mxu1 %v6933_v61  ;;  %v7012_v60 = vld [vmem:[%s10692_s4 + $0x140] ss:$8 sps:$4 sm:$0xff]   ;;  %v7014_v61 = vld [vmem:[%s10692_s4 + $0x154] ss:$8 sps:$4 sm:$0xff]  }
  0x48   :  { %997 = vmatprep.subr.bf16.mxu0 %v6934_v62  ;;  %1286 = vmatprep.subr.bf16.mxu1 %v6936_v63  ;;  %v7016_v62 = vld [vmem:[%s10692_s4 + $0x150] ss:$8 sps:$4 sm:$0xff]   ;;  %v7017_v63 = vld [vmem:[%s10692_s4 + $0x164] ss:$8 sps:$4 sm:$0xff]  }
  0x4b   :  { %998 = vmatpush2.bf16.msra.mxu0 %v6938_v0  ;;  %1287 = vmatpush2.bf16.msra.mxu1 %v6939_v2  ;;  %v7019_v0 = vld [vmem:[%s10692_s4 + $0x160] ss:$8 sps:$4 sm:$0xff]   ;;  %v7021_v2 = vld [vmem:[%s10692_s4 + $0x174] ss:$8 sps:$4 sm:$0xff]  }
  0x4c   :  { %1545 = vmatprep.subr.bf16.mxu0 %v10664_v1 }
  0x4e   :  { %1000 = vmatmul.mubr.bf16.vlgmr.msra.gmra.mxu0 %v7847_v3  ;;  %1289 = vmatmul.mubr.bf16.vlgmr.msra.gmra.mxu1 %v7847_v3 }
  0x4f   :  { %1546 = vmatpush1.bf16.msra.mxu0 %v6943_v4  ;;  %1007 = vmatprep.mubr.bf16.mxu0 %v7855_v5  ;;  %v7023_v4 = vld [vmem:[%s10692_s4 + $0x170] ss:$8 sps:$4 sm:$0xff]  }
  0x50   :  { %1296 = vmatprep.mubr.bf16.mxu1 %v7855_v5  ;;  %1547 = vmatprep.subr.bf16.mxu0 %v10664_v1 }
  0x53   :  { %1548 = vmatpush1.bf16.msra.mxu0 %v6950_v6  ;;  %v7024_v6 = vld [vmem:[%s10692_s4 + $0x184] ss:$8 sps:$4 sm:$0xff]  }
  0x54   :  { %1549 = vmatprep.subr.bf16.mxu0 %v10664_v1 }
  0x56   :  { %1008 = vmatmul.mubr.bf16.gmra.mxu0 %v7869_v7  ;;  %1297 = vmatmul.mubr.bf16.gmra.mxu1 %v7869_v7 }
  0x57   :  { %1015 = vmatprep.mubr.bf16.mxu0 %v7874_v8  ;;  %1304 = vmatprep.mubr.bf16.mxu1 %v7874_v8 }
  0x58   :  { %1550 = vmatpush1.bf16.msra.mxu0 %v6957_v9  ;;  %v7026_v9 = vld [vmem:[%s10692_s4 + $0x180] ss:$8 sps:$4 sm:$0xff]  }
  0x59   :  { %1551 = vmatprep.subr.bf16.mxu0 %v10664_v1 }
  0x5c   :  { %1552 = vmatpush1.bf16.msra.mxu0 %v6964_v10  ;;  %v7028_v10 = vld [vmem:[%s10692_s4 + $0x194] ss:$8 sps:$4 sm:$0xff]  }
  0x5d   :  { %1553 = vmatprep.subr.bf16.mxu0 %v10664_v1 }
  0x5e   :  { %1016 = vmatmul.mubr.bf16.gmra.mxu0 %v7890_v11  ;;  %1305 = vmatmul.mubr.bf16.gmra.mxu1 %v7890_v11 }
  0x5f   :  { %1023 = vmatprep.mubr.bf16.mxu0 %v7895_v12  ;;  %1312 = vmatprep.mubr.bf16.mxu1 %v7895_v12 }
  0x60   :  { %1554 = vmatpush1.bf16.msra.mxu0 %v6971_v13 }
  0x61   :  { %1555 = vmatprep.subr.bf16.mxu0 %v10664_v1 }
  0x64   :  { %1556 = vmatpush1.bf16.msra.mxu0 %v6978_v14 }
  0x65   :  { %1557 = vmatprep.subr.bf16.mxu0 %v10664_v1 }
  0x66   :  { %1024 = vmatmul.mubr.bf16.gmra.mxu0 %v7912_v15  ;;  %1313 = vmatmul.mubr.bf16.gmra.mxu1 %v7912_v15 }
  0x67   :  { %1031 = vmatprep.mubr.bf16.mxu0 %v7917_v16  ;;  %1320 = vmatprep.mubr.bf16.mxu1 %v7917_v16 }
  0x68   :  { %1558 = vmatpush1.bf16.msra.mxu0 %v6985_v17 }
  0x69   :  { %1559 = vmatprep.subr.bf16.mxu0 %v10664_v1 }
  0x6c   :  { %1560 = vmatpush1.bf16.msra.mxu0 %v6992_v18 }
  0x6d   :  { %1561 = vmatprep.subr.bf16.mxu0 %v10664_v1 }
  0x6e   :  { %1032 = vmatmul.mubr.bf16.gmra.mxu0 %v7935_v19  ;;  %1321 = vmatmul.mubr.bf16.gmra.mxu1 %v7935_v19 }
  0x6f   :  { %1039 = vmatprep.mubr.bf16.mxu0 %v7940_v20  ;;  %1328 = vmatprep.mubr.bf16.mxu1 %v7940_v20 }
  0x70   :  { %1562 = vmatpush2.bf16.msra.mxu0 %v6999_v21 }
  0x71   :  { %1563 = vmatprep.subr.bf16.mxu0 %v10664_v1 }
  0x74   :  { %1564 = vmatpush2.bf16.msra.mxu0 %v7006_v22 }
  0x75   :  { %1565 = vmatprep.subr.bf16.mxu0 %v10664_v1 }
  0x76   :  { %1040 = vmatmul.mubr.bf16.gmra.mxu0 %v7957_v23  ;;  %1329 = vmatmul.mubr.bf16.gmra.mxu1 %v7957_v23 }
  0x77   :  { %1047 = vmatprep.mubr.bf16.mxu0 %v7962_v24  ;;  %1336 = vmatprep.mubr.bf16.mxu1 %v7962_v24 }
  0x78   :  { %1566 = vmatpush2.bf16.msra.mxu0 %v7013_v25 }
  0x79   :  { %1567 = vmatprep.subr.bf16.mxu0 %v10664_v1 }
  0x7c   :  { %1568 = vmatpush2.bf16.msra.mxu0 %v7020_v28  ;;  %v7030_v28 = vld [vmem:[%s10692_s4 + $0x190] ss:$8 sps:$4 sm:$0xff]  }
  0x7d   :  { %1569 = vmatprep.subr.bf16.mxu0 %v10664_v1 }
  0x7e   :  { %1048 = vmatmul.mubr.bf16.gmra.mxu0 %v7976_v26  ;;  %1337 = vmatmul.mubr.bf16.gmra.mxu1 %v7976_v26 }
  0x7f   :  { %1055 = vmatprep.mubr.bf16.mxu0 %v7981_v27  ;;  %1344 = vmatprep.mubr.bf16.mxu1 %v7981_v27 }
  0x80   :  { %1570 = vmatpush2.bf16.msra.mxu0 %v7027_v33 }
  0x81   :  { %1571 = vmatprep.subr.bf16.mxu0 %v10664_v1 }
  0x84   :  { %1572 = vmatpush2.bf16.msra.mxu0 %v7034_v38  ;;  %v7031_v38 = vld [vmem:[%s10692_s4 + $0x1a4] ss:$8 sps:$4 sm:$0xff]  }
  0x85   :  { %1573 = vmatprep.subr.bf16.mxu0 %v10664_v1 }
  0x86   :  { %1056 = vmatmul.mubr.bf16.gmra.mxu0 %v7994_v29  ;;  %1345 = vmatmul.mubr.bf16.gmra.mxu1 %v7994_v29 }
  0x87   :  { %1063 = vmatprep.mubr.bf16.mxu0 %v7999_v30  ;;  %1352 = vmatprep.mubr.bf16.mxu1 %v7999_v30 }
  0x88   :  { %1574 = vmatpush2.bf16.msra.mxu0 %v7041_v43 }
  0x89   :  { %1575 = vmatprep.subr.bf16.mxu0 %v10664_v1 }
  0x8c   :  { %1576 = vmatpush2.bf16.msra.mxu0 %v7048_v48 }
  0x8e   :  { %1064 = vmatmul.mubr.bf16.gmra.mxu0 %v8008_v31  ;;  %1353 = vmatmul.mubr.bf16.gmra.mxu1 %v8008_v31 }
  0x8f   :  { %1071 = vmatprep.mubr.bf16.mxu0 %v8013_v32  ;;  %1360 = vmatprep.mubr.bf16.mxu1 %v8013_v32 }
  0x96   :  { %1072 = vmatmul.mubr.bf16.gmra.mxu0 %v8025_v34  ;;  %1361 = vmatmul.mubr.bf16.gmra.mxu1 %v8025_v34 }
  0x97   :  { %1079 = vmatprep.mubr.bf16.mxu0 %v8031_v35  ;;  %1368 = vmatprep.mubr.bf16.mxu1 %v8031_v35 }
  0x9e   :  { %1080 = vmatmul.mubr.bf16.gmra.mxu0 %v8040_v36  ;;  %1369 = vmatmul.mubr.bf16.gmra.mxu1 %v8040_v36 }
  0x9f   :  { %1087 = vmatprep.mubr.bf16.mxu0 %v8045_v37  ;;  %1376 = vmatprep.mubr.bf16.mxu1 %v8045_v37 }
  0xa6   :  { %1088 = vmatmul.mubr.bf16.gmra.mxu0 %v8057_v39  ;;  %1377 = vmatmul.mubr.bf16.gmra.mxu1 %v8057_v39 }
  0xa7   :  { %1095 = vmatprep.mubr.bf16.mxu0 %v8063_v40  ;;  %1384 = vmatprep.mubr.bf16.mxu1 %v8063_v40 }
  0xae   :  { %1096 = vmatmul.mubr.bf16.gmra.mxu0 %v8072_v41  ;;  %1385 = vmatmul.mubr.bf16.gmra.mxu1 %v8072_v41 }
  0xaf   :  { %1103 = vmatprep.mubr.bf16.mxu0 %v8077_v42  ;;  %1392 = vmatprep.mubr.bf16.mxu1 %v8077_v42 }
  0xb6   :  { %1104 = vmatmul.mubr.bf16.gmra.mxu0 %v8089_v44  ;;  %1393 = vmatmul.mubr.bf16.gmra.mxu1 %v8089_v44 }
  0xb7   :  { %1111 = vmatprep.mubr.bf16.mxu0 %v8095_v45  ;;  %1400 = vmatprep.mubr.bf16.mxu1 %v8095_v45 }
  0xbe   :  { %1112 = vmatmul.mubr.bf16.gmra.mxu0 %v8104_v46  ;;  %1401 = vmatmul.mubr.bf16.gmra.mxu1 %v8104_v46 }
  0xbf   :  { %1119 = vmatprep.mubr.bf16.mxu0 %v8109_v47  ;;  %1408 = vmatprep.mubr.bf16.mxu1 %v8109_v47 }
  0xc6   :  { %1120 = vmatmul.mubr.bf16.gmra.mxu0 %v8121_v50  ;;  %1409 = vmatmul.mubr.bf16.gmra.mxu1 %v8121_v50 }
  0xc7   :  { %1127 = vmatprep.mubr.bf16.mxu0 %v8126_v51  ;;  %1416 = vmatprep.mubr.bf16.mxu1 %v8126_v51 }
  0xce   :  { %1128 = vmatmul.mubr.bf16.gmra.mxu0 %v8135_v52  ;;  %1417 = vmatmul.mubr.bf16.gmra.mxu1 %v8135_v52 }
  0xcf   :  { %1135 = vmatprep.mubr.bf16.mxu0 %v8140_v53  ;;  %1424 = vmatprep.mubr.bf16.mxu1 %v8140_v53 }
  0xd6   :  { %1136 = vmatmul.mubr.bf16.gmra.mxu0 %v8149_v54  ;;  %1425 = vmatmul.mubr.bf16.gmra.mxu1 %v8149_v54 }
  0xd7   :  { %1143 = vmatprep.mubr.bf16.mxu0 %v8154_v55  ;;  %1432 = vmatprep.mubr.bf16.mxu1 %v8154_v55 }
  0xde   :  { %1144 = vmatmul.mubr.bf16.gmra.mxu0 %v7005_v56  ;;  %1433 = vmatmul.mubr.bf16.gmra.mxu1 %v7005_v56 }
  0xdf   :  { %1151 = vmatprep.mubr.bf16.mxu0 %v7007_v57  ;;  %1440 = vmatprep.mubr.bf16.mxu1 %v7007_v57 }
  0xe6   :  { %1152 = vmatmul.mubr.bf16.gmra.mxu0 %v7009_v58  ;;  %1441 = vmatmul.mubr.bf16.gmra.mxu1 %v7009_v58 }
  0xe7   :  { %1159 = vmatprep.mubr.bf16.mxu0 %v7010_v59  ;;  %1448 = vmatprep.mubr.bf16.mxu1 %v7010_v59 }
  0xee   :  { %1160 = vmatmul.mubr.bf16.gmra.mxu0 %v7012_v60  ;;  %1449 = vmatmul.mubr.bf16.gmra.mxu1 %v7012_v60 }
  0xef   :  { %1167 = vmatprep.mubr.bf16.mxu0 %v7014_v61  ;;  %1456 = vmatprep.mubr.bf16.mxu1 %v7014_v61 }
  0xf6   :  { %1168 = vmatmul.mubr.bf16.gmra.mxu0 %v7016_v62  ;;  %1457 = vmatmul.mubr.bf16.gmra.mxu1 %v7016_v62 }
  0xf7   :  { %1175 = vmatprep.mubr.bf16.mxu0 %v7017_v63  ;;  %1464 = vmatprep.mubr.bf16.mxu1 %v7017_v63 }
  0xfe   :  { %1176 = vmatmul.mubr.bf16.gmra.mxu0 %v7019_v0  ;;  %1465 = vmatmul.mubr.bf16.gmra.mxu1 %v7019_v0  ;;  %v7033_v0 = vld [vmem:[%s10692_s4 + $0x1a0] ss:$8 sps:$4 sm:$0xff]  }
  0xff   :  { %1183 = vmatprep.mubr.bf16.mxu0 %v7021_v2  ;;  %1472 = vmatprep.mubr.bf16.mxu1 %v7021_v2 }
 0x106   :  { %1184 = vmatmul.mubr.bf16.gmra.mxu0 %v7023_v4  ;;  %1473 = vmatmul.mubr.bf16.gmra.mxu1 %v7023_v4  ;;  %v7035_v4 = vld [vmem:[%s10692_s4 + $0x1b4] ss:$8 sps:$4 sm:$0xff]  }
 0x107   :  { %1191 = vmatprep.mubr.bf16.mxu0 %v7024_v6  ;;  %1480 = vmatprep.mubr.bf16.mxu1 %v7024_v6 }
 0x10e   :  { %v1001_v13 = vpop.f32.mrf.mxu0  ;;  %1192 = vmatmul.mubr.bf16.gmra.mxu0 %v7026_v9  ;;  %v1290_v14 = vpop.f32.mrf.mxu1  ;;  %1481 = vmatmul.mubr.bf16.gmra.mxu1 %v7026_v9 }
 0x10f   :  { %1199 = vmatprep.mubr.bf16.mxu0 %v7028_v10  ;;  %1488 = vmatprep.mubr.bf16.mxu1 %v7028_v10  ;;  %v1994_v21 = vrot.slane %v1290_v14, 1 }
 0x110   :  { %v1003_v17 = vpop.f32.mrf.mxu0  ;;  %v1292_v18 = vpop.f32.mrf.mxu1 }
 0x112   :  { %v1004_v22 = vpop.f32.mrf.mxu0  ;;  %v8202_v25 = vpop.f32.mrf.mxu1 }
 0x113   :  { %v1995_v33 = vrot.slane %v8202_v25, 1  ;;  %v7047_v25 = vld [vmem:[%s10692_s4 + $0x1e4] ss:$8 sps:$4 sm:$0xff]  }
 0x114   :  { %v1006_v43 = vpop.f32.mrf.mxu0  ;;  %v1295_v48 = vpop.f32.mrf.mxu1 }
 0x115   :  { %v1996_v56 = vsel %vm1867_vm0, %v1994_v21, %v1995_v33 }
 0x116   :  { %v1009_v57 = vpop.f32.mrf.mxu0  ;;  %1200 = vmatmul.mubr.bf16.gmra.mxu0 %v7030_v28  ;;  %v1298_v58 = vpop.f32.mrf.mxu1  ;;  %1489 = vmatmul.mubr.bf16.gmra.mxu1 %v7030_v28 }
 0x117   :  { %1207 = vmatprep.mubr.bf16.mxu0 %v7031_v38  ;;  %1496 = vmatprep.mubr.bf16.mxu1 %v7031_v38  ;;  %v7037_v57 = vld [vmem:[%s10692_s4 + $0x1b0] ss:$8 sps:$4 sm:$0xff]  }
 0x118   :  { %v1010_v59 = vpop.f32.mrf.mxu0  ;;  %v1299_v60 = vpop.f32.mrf.mxu1 }
 0x119   :  { %v1803_v61 = vadd.f32 %v1010_v59, %v1001_v13  ;;  %v2066_v2 = vrot.slane %v1299_v60, 1 }
 0x11a   :  { %v1012_v62 = vpop.f32.mrf.mxu0  ;;  %v1301_v63 = vpop.f32.mrf.mxu1 }
 0x11c   :  { %v1013_v6 = vpop.f32.mrf.mxu0  ;;  %v1302_v9 = vpop.f32.mrf.mxu1 }
 0x11d   :  { %v1804_v10 = vadd.f32 %v1013_v6, %v1004_v22  ;;  %v2067_v14 = vrot.slane %v1302_v9, 1  ;;  %v7040_v22 = vld [vmem:[%s10692_s4 + $0x1c4] ss:$8 sps:$4 sm:$0xff]  }
 0x11e   :  { %v1017_v17 = vpop.f32.mrf.mxu0  ;;  %1208 = vmatmul.mubr.bf16.gmra.mxu0 %v7033_v0  ;;  %v1306_v18 = vpop.f32.mrf.mxu1  ;;  %1497 = vmatmul.mubr.bf16.gmra.mxu1 %v7033_v0 }
 0x11f   :  { %v1819_v13 = vadd.f32 %v1803_v61, %v1306_v18  ;;  %1215 = vmatprep.mubr.bf16.mxu0 %v7035_v4  ;;  %1504 = vmatprep.mubr.bf16.mxu1 %v7035_v4  ;;  %v2068_v21 = vsel %vm1867_vm0, %v2066_v2, %v2067_v14 }
 0x120   :  { %v1019_v28 = vpop.f32.mrf.mxu0  ;;  %v1308_v38 = vpop.f32.mrf.mxu1 }
 0x121   :  { %v7044_v28 = vld [vmem:[%s10692_s4 + $0x1d4] ss:$8 sps:$4 sm:$0xff]  }
 0x122   :  { %v1020_v43 = vpop.f32.mrf.mxu0  ;;  %v1309_v48 = vpop.f32.mrf.mxu1 }
 0x123   :  { %v1820_v58 = vadd.f32 %v1804_v10, %v1309_v48  ;;  %v7038_v10 = vld [vmem:[%s10692_s4 + $0x1c0] ss:$8 sps:$4 sm:$0xff]  }
 0x124   :  { %v1022_v59 = vpop.f32.mrf.mxu0  ;;  %v1311_v60 = vpop.f32.mrf.mxu1 }
 0x126   :  { %v1025_v61 = vpop.f32.mrf.mxu0  ;;  %1216 = vmatmul.mubr.bf16.gmra.mxu0 %v7037_v57  ;;  %v1314_v62 = vpop.f32.mrf.mxu1  ;;  %1505 = vmatmul.mubr.bf16.gmra.mxu1 %v7037_v57 }
 0x127   :  { %1223 = vmatprep.mubr.bf16.mxu0 %v7040_v22  ;;  %1512 = vmatprep.mubr.bf16.mxu1 %v7040_v22 }
 0x128   :  { %v1026_v63 = vpop.f32.mrf.mxu0  ;;  %v1315_v0 = vpop.f32.mrf.mxu1 }
 0x129   :  { %v1962_v2 = vadd.f32 %v1026_v63, %v1017_v17  ;;  %v8227_v4 = vadd.f32 %v1819_v13, %v1315_v0 }
 0x12a   :  { %v1028_v6 = vpop.f32.mrf.mxu0  ;;  %v1317_v9 = vpop.f32.mrf.mxu1 }
 0x12b   :  { %v2034_v18 = vadd.f32 %v1996_v56, %v1962_v2 }
 0x12c   :  { %v1029_v38 = vpop.f32.mrf.mxu0  ;;  %v1318_v48 = vpop.f32.mrf.mxu1 }
 0x12d   :  { %v8235_v57 = vadd.f32 %v2068_v21, %v2034_v18  ;;  %v1963_v22 = vadd.f32 %v1029_v38, %v1020_v43  ;;  %v8237_v59 = vadd.f32 %v1820_v58, %v1318_v48  ;;  %v7042_v43 = vld [vmem:[%s10692_s4 + $0x1d0] ss:$8 sps:$4 sm:$0xff]  }
 0x12e   :  { %v1033_v17 = vpop.f32.mrf.mxu0  ;;  %1224 = vmatmul.mubr.bf16.gmra.mxu0 %v7038_v10  ;;  %v1322_v13 = vpop.f32.mrf.mxu1  ;;  %1513 = vmatmul.mubr.bf16.gmra.mxu1 %v7038_v10 }
 0x12f   :  { %v2035_v60 = vadd.f32 %v1995_v33, %v1963_v22  ;;  %1231 = vmatprep.mubr.bf16.mxu0 %v7044_v28  ;;  %1520 = vmatprep.mubr.bf16.mxu1 %v7044_v28  ;;  %v1997_v62 = vrot.slane %v1322_v13, 1  ;;  %v7045_v22 = vld [vmem:[%s10692_s4 + $0x1e0] ss:$8 sps:$4 sm:$0xff]   ;;  %v7051_v13 = vld [vmem:[%s10692_s4 + $0x1f4] ss:$8 sps:$4 sm:$0xff]  }
 0x130   :  { %v1035_v56 = vpop.f32.mrf.mxu0  ;;  %v1324_v61 = vpop.f32.mrf.mxu1 }
 0x131   :  { %v8241_v63 = vadd.f32 %v2067_v14, %v2035_v60 }
 0x132   :  { %v1036_v0 = vpop.f32.mrf.mxu0  ;;  %v8243_v21 = vpop.f32.mrf.mxu1 }
 0x133   :  { %v10663_v58 = vrot.slane %v8243_v21, 1 }
 0x134   :  { %v1038_v33 = vpop.f32.mrf.mxu0  ;;  %v1327_v2 = vpop.f32.mrf.mxu1 }
 0x135   :  { %v1999_v14 = vsel %vm1867_vm0, %v1997_v62, %v10663_v58 }
 0x136   :  { %v1041_v6 = vpop.f32.mrf.mxu0  ;;  %1232 = vmatmul.mubr.bf16.gmra.mxu0 %v7042_v43  ;;  %v1330_v9 = vpop.f32.mrf.mxu1  ;;  %1521 = vmatmul.mubr.bf16.gmra.mxu1 %v7042_v43 }
 0x137   :  { %1239 = vmatprep.mubr.bf16.mxu0 %v7047_v25  ;;  %1528 = vmatprep.mubr.bf16.mxu1 %v7047_v25  ;;  %v7049_v9 = vld [vmem:[%s10692_s4 + $0x1f0] ss:$8 sps:$4 sm:$0xff]  }
 0x138   :  { %v1042_v10 = vpop.f32.mrf.mxu0  ;;  %v1331_v18 = vpop.f32.mrf.mxu1 }
 0x139   :  { %v1805_v28 = vadd.f32 %v1042_v10, %v1033_v17 }
 0x13a   :  { %v1044_v38 = vpop.f32.mrf.mxu0  ;;  %v1333_v48 = vpop.f32.mrf.mxu1 }
 0x13c   :  { %v1045_v60 = vpop.f32.mrf.mxu0  ;;  %v8261_v56 = vpop.f32.mrf.mxu1 }
 0x13d   :  { %v1806_v61 = vadd.f32 %v1045_v60, %v1036_v0  ;;  %v2069_v0 = vrot.slane %v1331_v18, 1  ;;  %v2070_v60 = vrot.slane %v8261_v56, 1  ;;  %v7054_v18 = vld [vmem:[%s10694_s2 + $0x11c] ss:$20 sps:$4 sm:$0xff]  }
 0x13e   :  { %v1049_v62 = vpop.f32.mrf.mxu0  ;;  %1240 = vmatmul.mubr.bf16.gmra.mxu0 %v7045_v22  ;;  %v1338_v43 = vpop.f32.mrf.mxu1  ;;  %1529 = vmatmul.mubr.bf16.gmra.mxu1 %v7045_v22  ;;  %v7052_v22 = vld [vmem:[%s10694_s2 + $0x118] ss:$20 sps:$4 sm:$0xff]  }
 0x13f   :  { %v1821_v25 = vadd.f32 %v1805_v28, %v1338_v43  ;;  %1247 = vmatprep.mubr.bf16.mxu0 %v7051_v13  ;;  %1536 = vmatprep.mubr.bf16.mxu1 %v7051_v13 }
 0x140   :  { %v1051_v17 = vpop.f32.mrf.mxu0  ;;  %v1340_v33 = vpop.f32.mrf.mxu1  ;;  %2498 = vmatprep.subr.bf16.mxu1 %v7054_v18 }
 0x141   :  { %2499 = vmatpush1.bf16.msra.mxu1 %v7052_v22 }
 0x142   :  { %v1052_v2 = vpop.f32.mrf.mxu0  ;;  %v1341_v6 = vpop.f32.mrf.mxu1 }
 0x143   :  { %v8266_v10 = vadd.f32 %v1806_v61, %v1341_v6 }
 0x144   :  { %v1054_v38 = vpop.f32.mrf.mxu0  ;;  %v1343_v48 = vpop.f32.mrf.mxu1 }
 0x145   :  { %10693 = vst [vmem:[#allocation3_spill] sm:$0xff] %v8266_v10 }
 0x146   :  { %v1057_v58 = vpop.f32.mrf.mxu0  ;;  %1248 = vmatmul.mubr.bf16.gmra.mxu0 %v7049_v9  ;;  %v1346_v28 = vpop.f32.mrf.mxu1  ;;  %1537 = vmatmul.mubr.bf16.gmra.mxu1 %v7049_v9 }
 0x147   :  { %1577 = vmatprep.mubr.bf16.mxu0 %v7792_v49  ;;  %2530 = vmatprep.mubr.bf16.mxu1 %v10664_v1  ;;  %v2071_v58 = vsel %vm1867_vm0, %v2069_v0, %v2070_v60 }
 0x148   :  { %v1058_v13 = vpop.f32.mrf.mxu0  ;;  %v1347_v61 = vpop.f32.mrf.mxu1 }
 0x149   :  { %v1964_v43 = vadd.f32 %v1058_v13, %v1049_v62  ;;  %v8277_v17 = vadd.f32 %v1821_v25, %v1347_v61  ;;  %v10695_v62 = vrot.slane %v8243_v21, 1 }
 0x14a   :  { %v1060_v49 = vpop.f32.mrf.mxu0  ;;  %v1349_v33 = vpop.f32.mrf.mxu1 }
 0x14b   :  { %v2036_v6 = vadd.f32 %v1999_v14, %v1964_v43 }
 0x14c   :  { %v1061_v9 = vpop.f32.mrf.mxu0  ;;  %v8282_v38 = vpop.f32.mrf.mxu1 }
 0x14d   :  { %v8284_v48 = vadd.f32 %v2071_v58, %v2036_v6  ;;  %v1965_v28 = vadd.f32 %v1061_v9, %v1052_v2 }
 0x14e   :  { %v1065_v1 = vpop.f32.mrf.mxu0  ;;  %v1354_v10 = vpop.f32.mrf.mxu1  ;;  %1578 = vmatmul.mubr.bf16.vlgmr.msra.gmra.mxu0 %v7847_v3 }
 0x14f   :  { %v8289_v25 = vadd.f32 %v10695_v62, %v1965_v28  ;;  %1585 = vmatprep.mubr.bf16.mxu0 %v7855_v5  ;;  %v2000_v14 = vrot.slane %v1354_v10, 1 }
 0x150   :  { %v1067_v0 = vpop.f32.mrf.mxu0  ;;  %v1356_v13 = vpop.f32.mrf.mxu1 }
 0x152   :  { %v1068_v22 = vpop.f32.mrf.mxu0  ;;  %v1357_v61 = vpop.f32.mrf.mxu1 }
 0x153   :  { %v2001_v18 = vrot.slane %v1357_v61, 1 }
 0x154   :  { %v1070_v43 = vpop.f32.mrf.mxu0  ;;  %v1359_v58 = vpop.f32.mrf.mxu1 }
 0x155   :  { %v2002_v2 = vsel %vm1867_vm0, %v2000_v14, %v2001_v18 }
 0x156   :  { %v1073_v49 = vpop.f32.mrf.mxu0  ;;  %v1362_v33 = vpop.f32.mrf.mxu1  ;;  %1586 = vmatmul.mubr.bf16.gmra.mxu0 %v7869_v7 }
 0x157   :  { %1591 = vmatprep.mubr.bf16.mxu0 %v7874_v8 }
 0x158   :  { %v1074_v3 = vpop.f32.mrf.mxu0  ;;  %v1363_v21 = vpop.f32.mrf.mxu1 }
 0x159   :  { %v1807_v6 = vadd.f32 %v1074_v3, %v1065_v1  ;;  %v2072_v33 = vrot.slane %v1363_v21, 1 }
 0x15a   :  { %v1076_v5 = vpop.f32.mrf.mxu0  ;;  %v1365_v9 = vpop.f32.mrf.mxu1 }
 0x15c   :  { %v1077_v28 = vpop.f32.mrf.mxu0  ;;  %v8295_v10 = vpop.f32.mrf.mxu1 }
 0x15d   :  { %v1808_v62 = vadd.f32 %v1077_v28, %v1068_v22  ;;  %v2073_v3 = vrot.slane %v8295_v10, 1 }
 0x15e   :  { %v1081_v0 = vpop.f32.mrf.mxu0  ;;  %v1370_v13 = vpop.f32.mrf.mxu1  ;;  %1592 = vmatmul.mubr.bf16.gmra.mxu0 %v7890_v11  ;;  %v7055_v11 = vld [vmem:[%s10694_s2 + $0xf0] ss:$20 sps:$4 sm:$0xff]  }
 0x15f   :  { %v1823_v14 = vadd.f32 %v1807_v6, %v1370_v13  ;;  %1599 = vmatprep.mubr.bf16.mxu0 %v7895_v12  ;;  %v7057_v12 = vld [vmem:[%s10694_s2 + $0xf4] ss:$20 sps:$4 sm:$0xff]  }
 0x160   :  { %v1083_v61 = vpop.f32.mrf.mxu0  ;;  %v1372_v7 = vpop.f32.mrf.mxu1  ;;  %2500 = vmatprep.subr.bf16.mxu1 %v7057_v12 }
 0x161   :  { %2501 = vmatpush1.bf16.msra.mxu1 %v7055_v11 }
 0x162   :  { %v1084_v43 = vpop.f32.mrf.mxu0  ;;  %v1373_v8 = vpop.f32.mrf.mxu1 }
 0x163   :  { %v8299_v58 = vadd.f32 %v1808_v62, %v1373_v8 }
 0x164   :  { %v1086_v1 = vpop.f32.mrf.mxu0  ;;  %v1375_v49 = vpop.f32.mrf.mxu1 }
 0x166   :  { %v1089_v5 = vpop.f32.mrf.mxu0  ;;  %v1378_v22 = vpop.f32.mrf.mxu1  ;;  %1600 = vmatmul.mubr.bf16.gmra.mxu0 %v7912_v15  ;;  %v2074_v15 = vsel %vm1867_vm0, %v2072_v33, %v2073_v3 }
 0x167   :  { %1605 = vmatprep.mubr.bf16.mxu0 %v7917_v16 }
 0x168   :  { %v1090_v6 = vpop.f32.mrf.mxu0  ;;  %v1379_v9 = vpop.f32.mrf.mxu1 }
 0x169   :  { %v1966_v21 = vadd.f32 %v1090_v6, %v1081_v0  ;;  %v8310_v28 = vadd.f32 %v1823_v14, %v1379_v9 }
 0x16a   :  { %v1092_v62 = vpop.f32.mrf.mxu0  ;;  %v1381_v13 = vpop.f32.mrf.mxu1 }
 0x16b   :  { %v2038_v61 = vadd.f32 %v2002_v2, %v1966_v21 }
 0x16c   :  { %v1093_v7 = vpop.f32.mrf.mxu0  ;;  %v8315_v8 = vpop.f32.mrf.mxu1 }
 0x16d   :  { %v8317_v1 = vadd.f32 %v2074_v15, %v2038_v61  ;;  %v1967_v16 = vadd.f32 %v1093_v7, %v1084_v43 }
 0x16e   :  { %v1097_v49 = vpop.f32.mrf.mxu0  ;;  %v1386_v5 = vpop.f32.mrf.mxu1  ;;  %1606 = vmatmul.mubr.bf16.gmra.mxu0 %v7935_v19 }
 0x16f   :  { %v8320_v0 = vadd.f32 %v2001_v18, %v1967_v16  ;;  %1613 = vmatprep.mubr.bf16.mxu0 %v7940_v20  ;;  %v2003_v33 = vrot.slane %v1386_v5, 1 }
 0x170   :  { %v1099_v14 = vpop.f32.mrf.mxu0  ;;  %v1388_v22 = vpop.f32.mrf.mxu1 }
 0x172   :  { %v1100_v11 = vpop.f32.mrf.mxu0  ;;  %v1389_v12 = vpop.f32.mrf.mxu1 }
 0x173   :  { %v2004_v2 = vrot.slane %v1389_v12, 1 }
 0x174   :  { %v1102_v6 = vpop.f32.mrf.mxu0  ;;  %v1391_v9 = vpop.f32.mrf.mxu1 }
 0x175   :  { %v2005_v21 = vsel %vm1867_vm0, %v2003_v33, %v2004_v2 }
 0x176   :  { %v1105_v15 = vpop.f32.mrf.mxu0  ;;  %v1394_v43 = vpop.f32.mrf.mxu1  ;;  %1614 = vmatmul.mubr.bf16.gmra.mxu0 %v7957_v23 }
 0x177   :  { %1619 = vmatprep.mubr.bf16.mxu0 %v7962_v24  ;;  %v7060_v15 = vld [vmem:[%s10694_s2 + $0xcc] ss:$20 sps:$4 sm:$0xff]  }
 0x178   :  { %v1106_v19 = vpop.f32.mrf.mxu0  ;;  %v1395_v18 = vpop.f32.mrf.mxu1  ;;  %2502 = vmatprep.subr.bf16.mxu1 %v7060_v15 }
 0x179   :  { %v1809_v62 = vadd.f32 %v1106_v19, %v1097_v49 }
 0x17a   :  { %v1108_v20 = vpop.f32.mrf.mxu0  ;;  %v1397_v13 = vpop.f32.mrf.mxu1 }
 0x17b   :  { %v7063_v13 = vld [vmem:[%s10694_s2 + $0xa4] ss:$20 sps:$4 sm:$0xff]  }
 0x17c   :  { %v1109_v61 = vpop.f32.mrf.mxu0  ;;  %v8326_v7 = vpop.f32.mrf.mxu1 }
 0x17d   :  { %v1810_v16 = vadd.f32 %v1109_v61, %v1100_v11  ;;  %v7058_v11 = vld [vmem:[%s10694_s2 + $0xc8] ss:$20 sps:$4 sm:$0xff]   ;;  %v2076_v43 = vrot.slane %v8326_v7, 1 }
 0x17e   :  { %v1113_v5 = vpop.f32.mrf.mxu0  ;;  %v1402_v14 = vpop.f32.mrf.mxu1  ;;  %1620 = vmatmul.mubr.bf16.gmra.mxu0 %v7976_v26  ;;  %v2075_v26 = vrot.slane %v1395_v18, 1  ;;  %2503 = vmatpush1.bf16.msra.mxu1 %v7058_v11  ;;  %v7061_v18 = vld [vmem:[%s10694_s2 + $0xa0] ss:$20 sps:$4 sm:$0xff]  }
 0x17f   :  { %v1825_v22 = vadd.f32 %v1809_v62, %v1402_v14  ;;  %1627 = vmatprep.mubr.bf16.mxu0 %v7981_v27  ;;  %2504 = vmatprep.subr.bf16.mxu1 %v7063_v13 }
 0x180   :  { %v1115_v33 = vpop.f32.mrf.mxu0  ;;  %v1404_v23 = vpop.f32.mrf.mxu1 }
 0x182   :  { %v1116_v12 = vpop.f32.mrf.mxu0  ;;  %v1405_v24 = vpop.f32.mrf.mxu1  ;;  %2505 = vmatpush1.bf16.msra.mxu1 %v7061_v18 }
 0x183   :  { %v8330_v6 = vadd.f32 %v1810_v16, %v1405_v24 }
 0x184   :  { %v1118_v49 = vpop.f32.mrf.mxu0  ;;  %v1407_v9 = vpop.f32.mrf.mxu1 }
 0x185   :  { %v7064_v9 = vld [vmem:[%s10694_s2 + $0x78] ss:$20 sps:$4 sm:$0xff]  }
 0x186   :  { %v1121_v27 = vpop.f32.mrf.mxu0  ;;  %v1410_v19 = vpop.f32.mrf.mxu1  ;;  %1628 = vmatmul.mubr.bf16.gmra.mxu0 %v7994_v29  ;;  %v2077_v29 = vsel %vm1867_vm0, %v2075_v26, %v2076_v43 }
 0x187   :  { %1633 = vmatprep.mubr.bf16.mxu0 %v7999_v30 }
 0x188   :  { %v1122_v62 = vpop.f32.mrf.mxu0  ;;  %v1411_v20 = vpop.f32.mrf.mxu1 }
 0x189   :  { %v1968_v61 = vadd.f32 %v1122_v62, %v1113_v5  ;;  %v8344_v16 = vadd.f32 %v1825_v22, %v1411_v20  ;;  %v7066_v5 = vld [vmem:[%s10694_s2 + $0x7c] ss:$20 sps:$4 sm:$0xff]  }
 0x18a   :  { %v1124_v14 = vpop.f32.mrf.mxu0  ;;  %v1413_v30 = vpop.f32.mrf.mxu1  ;;  %2506 = vmatprep.subr.bf16.mxu1 %v7066_v5  ;;  %v7067_v62 = vld [vmem:[%s10694_s2 + $0x50] ss:$20 sps:$4 sm:$0xff]  }
 0x18b   :  { %v2040_v33 = vadd.f32 %v2005_v21, %v1968_v61  ;;  %2507 = vmatpush1.bf16.msra.mxu1 %v7064_v9  ;;  %v7075_v5 = vld [vmem:[%s10694_s2 + $0x4] ss:$20 sps:$4 sm:$0xff]   ;;  %v7073_v9 = vld [vmem:[%s10694_s2] ss:$20 sps:$4 sm:$0xff]  }
 0x18c   :  { %v1125_v23 = vpop.f32.mrf.mxu0  ;;  %v8352_v24 = vpop.f32.mrf.mxu1 }
 0x18d   :  { %v8357_v22 = vadd.f32 %v2077_v29, %v2040_v33  ;;  %v1969_v49 = vadd.f32 %v1125_v23, %v1116_v12  ;;  %v7069_v12 = vld [vmem:[%s10694_s2 + $0x54] ss:$20 sps:$4 sm:$0xff]  }
 0x18e   :  { %v1129_v15 = vpop.f32.mrf.mxu0  ;;  %v1418_v11 = vpop.f32.mrf.mxu1  ;;  %1634 = vmatmul.mubr.bf16.gmra.mxu0 %v8008_v31  ;;  %2508 = vmatprep.subr.bf16.mxu1 %v7069_v12  ;;  %v7070_v29 = vld [vmem:[%s10694_s2 + $0x28] ss:$20 sps:$4 sm:$0xff]  }
 0x18f   :  { %v8363_v21 = vadd.f32 %v2004_v2, %v1969_v49  ;;  %1641 = vmatprep.mubr.bf16.mxu0 %v8013_v32  ;;  %v2006_v19 = vrot.slane %v1418_v11, 1  ;;  %2509 = vmatpush1.bf16.msra.mxu1 %v7067_v62  ;;  %v7072_v32 = vld [vmem:[%s10694_s2 + $0x2c] ss:$20 sps:$4 sm:$0xff]  }
 0x190   :  { %v1131_v26 = vpop.f32.mrf.mxu0  ;;  %v1420_v27 = vpop.f32.mrf.mxu1  ;;  %2510 = vmatprep.subr.bf16.mxu1 %v7072_v32 }
 0x192   :  { %v1132_v20 = vpop.f32.mrf.mxu0  ;;  %v1421_v13 = vpop.f32.mrf.mxu1 }
 0x193   :  { %v2007_v31 = vrot.slane %v1421_v13, 1  ;;  %2511 = vmatpush1.bf16.msra.mxu1 %v7070_v29 }
 0x194   :  { %v1134_v2 = vpop.f32.mrf.mxu0  ;;  %v1423_v61 = vpop.f32.mrf.mxu1  ;;  %2512 = vmatprep.subr.bf16.mxu1 %v7075_v5 }
 0x195   :  { %v2008_v18 = vsel %vm1867_vm0, %v2006_v19, %v2007_v31 }
 0x196   :  { %v1137_v14 = vpop.f32.mrf.mxu0  ;;  %v1426_v30 = vpop.f32.mrf.mxu1  ;;  %1642 = vmatmul.mubr.bf16.gmra.mxu0 %v8025_v34 }
 0x197   :  { %1647 = vmatprep.mubr.bf16.mxu0 %v8031_v35  ;;  %2513 = vmatpush1.bf16.msra.mxu1 %v7073_v9 }
 0x198   :  { %v1138_v33 = vpop.f32.mrf.mxu0  ;;  %v1427_v23 = vpop.f32.mrf.mxu1 }
 0x199   :  { %v1811_v49 = vadd.f32 %v1138_v33, %v1129_v15  ;;  %v2078_v30 = vrot.slane %v1427_v23, 1 }
 0x19a   :  { %v1140_v11 = vpop.f32.mrf.mxu0  ;;  %v1429_v26 = vpop.f32.mrf.mxu1 }
 0x19c   :  { %v1141_v34 = vpop.f32.mrf.mxu0  ;;  %v8387_v27 = vpop.f32.mrf.mxu1 }
 0x19d   :  { %v1812_v35 = vadd.f32 %v1141_v34, %v1132_v20  ;;  %v10668_v33 = vrot.slane %v8387_v27, 1 }
 0x19e   :  { %v1145_v12 = vpop.f32.mrf.mxu0  ;;  %v1434_v19 = vpop.f32.mrf.mxu1  ;;  %1648 = vmatmul.mubr.bf16.gmra.mxu0 %v8040_v36 }
 0x19f   :  { %v1827_v62 = vadd.f32 %v1811_v49, %v1434_v19  ;;  %1655 = vmatprep.mubr.bf16.mxu0 %v8045_v37  ;;  %v2080_v11 = vsel %vm1867_vm0, %v2078_v30, %v10668_v33 }
 0x1a0   :  { %v1147_v15 = vpop.f32.mrf.mxu0  ;;  %v1436_v13 = vpop.f32.mrf.mxu1 }
 0x1a2   :  { %v1148_v2 = vpop.f32.mrf.mxu0  ;;  %v1437_v61 = vpop.f32.mrf.mxu1 }
 0x1a3   :  { %v8391_v32 = vadd.f32 %v1812_v35, %v1437_v61 }
 0x1a4   :  { %v1150_v29 = vpop.f32.mrf.mxu0  ;;  %v1439_v14 = vpop.f32.mrf.mxu1 }
 0x1a6   :  { %v1153_v5 = vpop.f32.mrf.mxu0  ;;  %v1442_v20 = vpop.f32.mrf.mxu1  ;;  %1656 = vmatmul.mubr.bf16.gmra.mxu0 %v8057_v39 }
 0x1a7   :  { %1661 = vmatprep.mubr.bf16.mxu0 %v8063_v40 }
 0x1a8   :  { %v1154_v36 = vpop.f32.mrf.mxu0  ;;  %v1443_v49 = vpop.f32.mrf.mxu1 }
 0x1a9   :  { %v1970_v37 = vadd.f32 %v1154_v36, %v1145_v12  ;;  %v8396_v9 = vadd.f32 %v1827_v62, %v1443_v49 }
 0x1aa   :  { %v1156_v26 = vpop.f32.mrf.mxu0  ;;  %v1445_v34 = vpop.f32.mrf.mxu1 }
 0x1ab   :  { %v2042_v23 = vadd.f32 %v2008_v18, %v1970_v37 }
 0x1ac   :  { %v1157_v35 = vpop.f32.mrf.mxu0  ;;  %v8401_v19 = vpop.f32.mrf.mxu1 }
 0x1ad   :  { %v8403_v15 = vadd.f32 %v2080_v11, %v2042_v23  ;;  %v1971_v39 = vadd.f32 %v1157_v35, %v1148_v2 }
 0x1ae   :  { %v1161_v13 = vpop.f32.mrf.mxu0  ;;  %v1450_v40 = vpop.f32.mrf.mxu1  ;;  %1662 = vmatmul.mubr.bf16.gmra.mxu0 %v8072_v41 }
 0x1af   :  { %v8406_v12 = vadd.f32 %v2007_v31, %v1971_v39  ;;  %1669 = vmatprep.mubr.bf16.mxu0 %v8077_v42  ;;  %v2009_v29 = vrot.slane %v1450_v40, 1 }
 0x1b0   :  { %v1163_v62 = vpop.f32.mrf.mxu0  ;;  %v1452_v61 = vpop.f32.mrf.mxu1 }
 0x1b2   :  { %v1164_v14 = vpop.f32.mrf.mxu0  ;;  %v1453_v30 = vpop.f32.mrf.mxu1 }
 0x1b3   :  { %v2010_v18 = vrot.slane %v1453_v30, 1 }
 0x1b4   :  { %v1166_v5 = vpop.f32.mrf.mxu0  ;;  %v1455_v20 = vpop.f32.mrf.mxu1 }
 0x1b5   :  { %v2011_v36 = vsel %vm1867_vm0, %v2009_v29, %v2010_v18 }
 0x1b6   :  { %v1169_v49 = vpop.f32.mrf.mxu0  ;;  %v1458_v2 = vpop.f32.mrf.mxu1  ;;  %1670 = vmatmul.mubr.bf16.gmra.mxu0 %v8089_v44 }
 0x1b7   :  { %1675 = vmatprep.mubr.bf16.mxu0 %v8095_v45 }
 0x1b8   :  { %v1170_v41 = vpop.f32.mrf.mxu0  ;;  %v1459_v31 = vpop.f32.mrf.mxu1 }
 0x1b9   :  { %v1813_v37 = vadd.f32 %v1170_v41, %v1161_v13  ;;  %v2081_v5 = vrot.slane %v1459_v31, 1 }
 0x1ba   :  { %v1172_v42 = vpop.f32.mrf.mxu0  ;;  %v1461_v11 = vpop.f32.mrf.mxu1 }
 0x1bc   :  { %v1173_v26 = vpop.f32.mrf.mxu0  ;;  %v8412_v34 = vpop.f32.mrf.mxu1 }
 0x1bd   :  { %v1814_v23 = vadd.f32 %v1173_v26, %v1164_v14  ;;  %v10667_v20 = vrot.slane %v8412_v34, 1 }
 0x1be   :  { %v1177_v35 = vpop.f32.mrf.mxu0  ;;  %v1466_v39 = vpop.f32.mrf.mxu1  ;;  %1676 = vmatmul.mubr.bf16.gmra.mxu0 %v8104_v46 }
 0x1bf   :  { %v1829_v40 = vadd.f32 %v1813_v37, %v1466_v39  ;;  %1683 = vmatprep.mubr.bf16.mxu0 %v8109_v47  ;;  %v2083_v37 = vsel %vm1867_vm0, %v2081_v5, %v10667_v20 }
 0x1c0   :  { %v1179_v62 = vpop.f32.mrf.mxu0  ;;  %v1468_v44 = vpop.f32.mrf.mxu1 }
 0x1c2   :  { %v1180_v61 = vpop.f32.mrf.mxu0  ;;  %v1469_v45 = vpop.f32.mrf.mxu1 }
 0x1c3   :  { %v8416_v29 = vadd.f32 %v1814_v23, %v1469_v45 }
 0x1c4   :  { %v1182_v13 = vpop.f32.mrf.mxu0  ;;  %v1471_v30 = vpop.f32.mrf.mxu1 }
 0x1c6   :  { %v1185_v49 = vpop.f32.mrf.mxu0  ;;  %v1474_v14 = vpop.f32.mrf.mxu1  ;;  %1684 = vmatmul.mubr.bf16.gmra.mxu0 %v8121_v50 }
 0x1c7   :  { %1689 = vmatprep.mubr.bf16.mxu0 %v8126_v51 }
 0x1c8   :  { %v1186_v46 = vpop.f32.mrf.mxu0  ;;  %v1475_v2 = vpop.f32.mrf.mxu1 }
 0x1c9   :  { %v1972_v47 = vadd.f32 %v1186_v46, %v1177_v35  ;;  %v8421_v41 = vadd.f32 %v1829_v40, %v1475_v2 }
 0x1ca   :  { %v1188_v42 = vpop.f32.mrf.mxu0  ;;  %v1477_v11 = vpop.f32.mrf.mxu1 }
 0x1cb   :  { %v2044_v31 = vadd.f32 %v2011_v36, %v1972_v47 }
 0x1cc   :  { %v1189_v26 = vpop.f32.mrf.mxu0  ;;  %v8426_v23 = vpop.f32.mrf.mxu1 }
 0x1cd   :  { %v8428_v39 = vadd.f32 %v2083_v37, %v2044_v31  ;;  %v1973_v50 = vadd.f32 %v1189_v26, %v1180_v61 }
 0x1ce   :  { %v1193_v62 = vpop.f32.mrf.mxu0  ;;  %v1482_v51 = vpop.f32.mrf.mxu1  ;;  %1690 = vmatmul.mubr.bf16.gmra.mxu0 %v8135_v52 }
 0x1cf   :  { %v8431_v35 = vadd.f32 %v2010_v18, %v1973_v50  ;;  %1697 = vmatprep.mubr.bf16.mxu0 %v8140_v53  ;;  %v2012_v45 = vrot.slane %v1482_v51, 1  ;;  %v7470_v50 = vld [vmem:[%s10692_s4 + $0x120] ss:$8 sps:$4 sm:$0xff]  }
 0x1d0   :  { %v1195_v40 = vpop.f32.mrf.mxu0  ;;  %v1484_v44 = vpop.f32.mrf.mxu1 }
 0x1d2   :  { %v1196_v13 = vpop.f32.mrf.mxu0  ;;  %v1485_v30 = vpop.f32.mrf.mxu1 }
 0x1d3   :  { %v2013_v36 = vrot.slane %v1485_v30, 1 }
 0x1d4   :  { %v1198_v5 = vpop.f32.mrf.mxu0  ;;  %v1487_v49 = vpop.f32.mrf.mxu1 }
 0x1d5   :  { %v2014_v14 = vsel %vm1867_vm0, %v2012_v45, %v2013_v36 }
 0x1d6   :  { %v1201_v46 = vpop.f32.mrf.mxu0  ;;  %v1490_v61 = vpop.f32.mrf.mxu1  ;;  %1698 = vmatmul.mubr.bf16.gmra.mxu0 %v8149_v54  ;;  %v7471_v54 = vld [vmem:[%s10692_s4 + $0x134] ss:$8 sps:$4 sm:$0xff]  }
 0x1d7   :  { %1703 = vmatprep.mubr.bf16.mxu0 %v8154_v55 }
 0x1d8   :  { %v1202_v52 = vpop.f32.mrf.mxu0  ;;  %v1491_v18 = vpop.f32.mrf.mxu1 }
 0x1d9   :  { %v1815_v2 = vadd.f32 %v1202_v52, %v1193_v62  ;;  %v2084_v5 = vrot.slane %v1491_v18, 1  ;;  %v7472_v52 = vld [vmem:[%s10692_s4 + $0x130] ss:$8 sps:$4 sm:$0xff]  }
 0x1da   :  { %v1204_v53 = vpop.f32.mrf.mxu0  ;;  %v1493_v47 = vpop.f32.mrf.mxu1 }
 0x1dc   :  { %v1205_v37 = vpop.f32.mrf.mxu0  ;;  %v8437_v42 = vpop.f32.mrf.mxu1 }
 0x1dd   :  { %v1816_v11 = vadd.f32 %v1205_v37, %v1196_v13  ;;  %v10666_v49 = vrot.slane %v8437_v42, 1 }
 0x1de   :  { %v1209_v31 = vpop.f32.mrf.mxu0  ;;  %v1498_v26 = vpop.f32.mrf.mxu1  ;;  %1704 = vmatmul.mubr.bf16.gmra.mxu0 %v7470_v50 }
 0x1df   :  { %v1831_v51 = vadd.f32 %v1815_v2, %v1498_v26  ;;  %1711 = vmatprep.mubr.bf16.mxu0 %v7471_v54  ;;  %v7473_v2 = vld [vmem:[%s10692_s4 + $0x144] ss:$8 sps:$4 sm:$0xff]   ;;  %v2086_v18 = vsel %vm1867_vm0, %v2084_v5, %v10666_v49  ;;  %v7475_v5 = vld [vmem:[%s10692_s4 + $0x154] ss:$8 sps:$4 sm:$0xff]  }
 0x1e0   :  { %v1211_v55 = vpop.f32.mrf.mxu0  ;;  %v1500_v62 = vpop.f32.mrf.mxu1 }
 0x1e2   :  { %v1212_v40 = vpop.f32.mrf.mxu0  ;;  %v1501_v44 = vpop.f32.mrf.mxu1 }
 0x1e3   :  { %v8445_v45 = vadd.f32 %v1816_v11, %v1501_v44 }
 0x1e4   :  { %v1214_v13 = vpop.f32.mrf.mxu0  ;;  %v1503_v30 = vpop.f32.mrf.mxu1 }
 0x1e6   :  { %v1217_v46 = vpop.f32.mrf.mxu0  ;;  %v1506_v61 = vpop.f32.mrf.mxu1  ;;  %1712 = vmatmul.mubr.bf16.gmra.mxu0 %v7472_v52 }
 0x1e7   :  { %1717 = vmatprep.mubr.bf16.mxu0 %v7473_v2 }
 0x1e8   :  { %v1218_v53 = vpop.f32.mrf.mxu0  ;;  %v1507_v47 = vpop.f32.mrf.mxu1 }
 0x1e9   :  { %v1974_v37 = vadd.f32 %v1218_v53, %v1209_v31  ;;  %v8454_v11 = vadd.f32 %v1831_v51, %v1507_v47  ;;  %v7474_v31 = vld [vmem:[%s10692_s4 + $0x140] ss:$8 sps:$4 sm:$0xff]  }
 0x1ea   :  { %v1220_v26 = vpop.f32.mrf.mxu0  ;;  %v1509_v50 = vpop.f32.mrf.mxu1 }
 0x1eb   :  { %v2046_v54 = vadd.f32 %v2014_v14, %v1974_v37 }
 0x1ec   :  { %v1221_v55 = vpop.f32.mrf.mxu0  ;;  %v8459_v62 = vpop.f32.mrf.mxu1 }
 0x1ed   :  { %v8461_v44 = vadd.f32 %v2086_v18, %v2046_v54  ;;  %v1975_v13 = vadd.f32 %v1221_v55, %v1212_v40  ;;  %v7477_v54 = vld [vmem:[%s10692_s4 + $0x164] ss:$8 sps:$4 sm:$0xff]  }
 0x1ee   :  { %v1225_v30 = vpop.f32.mrf.mxu0  ;;  %v1514_v46 = vpop.f32.mrf.mxu1  ;;  %1718 = vmatmul.mubr.bf16.gmra.mxu0 %v7474_v31 }
 0x1ef   :  { %v8466_v51 = vadd.f32 %v2013_v36, %v1975_v13  ;;  %1725 = vmatprep.mubr.bf16.mxu0 %v7475_v5  ;;  %v2015_v52 = vrot.slane %v1514_v46, 1  ;;  %v7476_v36 = vld [vmem:[%s10692_s4 + $0x150] ss:$8 sps:$4 sm:$0xff]  }
 0x1f0   :  { %v1227_v14 = vpop.f32.mrf.mxu0  ;;  %v1516_v61 = vpop.f32.mrf.mxu1 }
 0x1f2   :  { %v1228_v2 = vpop.f32.mrf.mxu0  ;;  %v1517_v53 = vpop.f32.mrf.mxu1 }
 0x1f3   :  { %v2016_v40 = vrot.slane %v1517_v53, 1 }
 0x1f4   :  { %v1230_v47 = vpop.f32.mrf.mxu0  ;;  %v1519_v37 = vpop.f32.mrf.mxu1 }
 0x1f5   :  { %v2017_v18 = vsel %vm1867_vm0, %v2015_v52, %v2016_v40  ;;  %v7478_v37 = vld [vmem:[%s10692_s4 + $0x160] ss:$8 sps:$4 sm:$0xff]  }
 0x1f6   :  { %v1233_v26 = vpop.f32.mrf.mxu0  ;;  %v1522_v50 = vpop.f32.mrf.mxu1  ;;  %1726 = vmatmul.mubr.bf16.gmra.mxu0 %v7476_v36 }
 0x1f7   :  { %1731 = vmatprep.mubr.bf16.mxu0 %v7477_v54  ;;  %v7479_v50 = vld [vmem:[%s10692_s4 + $0x174] ss:$8 sps:$4 sm:$0xff]  }
 0x1f8   :  { %v1234_v55 = vpop.f32.mrf.mxu0  ;;  %v1523_v13 = vpop.f32.mrf.mxu1 }
 0x1f9   :  { %v1817_v46 = vadd.f32 %v1234_v55, %v1225_v30 }
 0x1fa   :  { %v1236_v31 = vpop.f32.mrf.mxu0  ;;  %v1525_v5 = vpop.f32.mrf.mxu1 }
 0x1fc   :  { %v1237_v14 = vpop.f32.mrf.mxu0  ;;  %v8478_v61 = vpop.f32.mrf.mxu1 }
 0x1fd   :  { %v1818_v52 = vadd.f32 %v1237_v14, %v1228_v2  ;;  %v2087_v14 = vrot.slane %v1523_v13, 1  ;;  %v2088_v49 = vrot.slane %v8478_v61, 1 }
 0x1fe   :  { %v1241_v53 = vpop.f32.mrf.mxu0  ;;  %v1530_v47 = vpop.f32.mrf.mxu1  ;;  %1732 = vmatmul.mubr.bf16.gmra.mxu0 %v7478_v37 }
 0x1ff   :  { %v1833_v26 = vadd.f32 %v1817_v46, %v1530_v47  ;;  %1739 = vmatprep.mubr.bf16.mxu0 %v7479_v50  ;;  %v7480_v46 = vld [vmem:[%s10692_s4 + $0x170] ss:$8 sps:$4 sm:$0xff]   ;;  %v7481_v47 = vld [vmem:[%s10692_s4 + $0x184] ss:$8 sps:$4 sm:$0xff]  }
 0x200   :  { %v1243_v30 = vpop.f32.mrf.mxu0  ;;  %v1532_v36 = vpop.f32.mrf.mxu1 }
 0x202   :  { %v1244_v54 = vpop.f32.mrf.mxu0  ;;  %v1533_v55 = vpop.f32.mrf.mxu1 }
 0x203   :  { %v8486_v31 = vadd.f32 %v1818_v52, %v1533_v55 }
 0x204   :  { %v1246_v2 = vpop.f32.mrf.mxu0  ;;  %v1535_v5 = vpop.f32.mrf.mxu1 }
 0x206   :  { %v1249_v20 = vpop.f32.mrf.mxu0  ;;  %v1538_v33 = vpop.f32.mrf.mxu1  ;;  %1740 = vmatmul.mubr.bf16.gmra.mxu0 %v7480_v46 }
 0x207   :  { %1745 = vmatprep.mubr.bf16.mxu0 %v7481_v47  ;;  %v2089_v20 = vsel %vm1867_vm0, %v2087_v14, %v2088_v49  ;;  %v7482_v47 = vld [vmem:[%s10692_s4 + $0x180] ss:$8 sps:$4 sm:$0xff]  }
 0x208   :  { %v1250_v37 = vpop.f32.mrf.mxu0  ;;  %v1539_v52 = vpop.f32.mrf.mxu1 }
 0x209   :  { %v1976_v50 = vadd.f32 %v1250_v37, %v1241_v53  ;;  %v8495_v30 = vadd.f32 %v1833_v26, %v1539_v52  ;;  %v7483_v26 = vld [vmem:[%s10692_s4 + $0x194] ss:$8 sps:$4 sm:$0xff]  }
 0x20a   :  { %v1252_v33 = vpop.f32.mrf.mxu0  ;;  %v1541_v13 = vpop.f32.mrf.mxu1 }
 0x20b   :  { %v2048_v36 = vadd.f32 %v2017_v18, %v1976_v50 }
 0x20c   :  { %v1253_v55 = vpop.f32.mrf.mxu0 }
 0x20d   :  { %v8500_v2 = vadd.f32 %v2089_v20, %v2048_v36  ;;  %v1977_v5 = vadd.f32 %v1253_v55, %v1244_v54  ;;  %v8513_v54 = vld [vmem:[%s10696_s25] ss:$0 sm:$0xff]  ;;  %v7484_v36 = vld [vmem:[%s10692_s4 + $0x190] ss:$8 sps:$4 sm:$0xff]  }
 0x20e   :  { %v1579_v46 = vpop.f32.mrf.mxu0  ;;  %1746 = vmatmul.mubr.bf16.gmra.mxu0 %v7482_v47 }
 0x20f   :  { %v8505_v53 = vadd.f32 %v2016_v40, %v1977_v5  ;;  %1753 = vmatprep.mubr.bf16.mxu0 %v7483_v26  ;;  %v1868_v18 = vrot.slane %v1579_v46, 1  ;;  %v7485_v5 = vld [vmem:[%s10692_s4 + $0x1a4] ss:$8 sps:$4 sm:$0xff]  }
 0x210   :  { %v1581_v14 = vpop.f32.mrf.mxu0 }
 0x212   :  { %v1582_v37 = vpop.f32.mrf.mxu0 }
 0x213   :  { %v1869_v52 = vrot.slane %v1582_v37, 1 }
 0x214   :  { %v1584_v50 = vpop.f32.mrf.mxu0 }
 0x215   :  { %v1870_v20 = vsel %vm1867_vm0, %v1868_v18, %v1869_v52  ;;  %v1909_v40 = vadd.f32 %v1869_v52, %v8237_v59  ;;  %v7486_v50 = vld [vmem:[%s10692_s4 + $0x1a0] ss:$8 sps:$4 sm:$0xff]  }
 0x216   :  { %v1908_v33 = vadd.f32 %v1870_v20, %v8227_v4  ;;  %v1587_v13 = vpop.f32.mrf.mxu0  ;;  %1754 = vmatmul.mubr.bf16.gmra.mxu0 %v7484_v36  ;;  %v7487_v20 = vld [vmem:[%s10692_s4 + $0x1b4] ss:$8 sps:$4 sm:$0xff]  }
 0x217   :  { %v1931_v55 = vadd.f32 %v8513_v54, %v1909_v40  ;;  %1759 = vmatprep.mubr.bf16.mxu0 %v7485_v5  ;;  %v10699_v40 = vmov 0  }
 0x218   :  { %v1930_v46 = vadd.f32 %v8513_v54, %v1908_v33  ;;  %v1588_v47 = vpop.f32.mrf.mxu0 }
 0x219   :  { %v1947_v26 = vmax.f32 %v1931_v55, 0.0 }
 0x21a   :  { %v1946_v59 = vmax.f32 %v1930_v46, 0.0  ;;  %v1589_v14 = vpop.f32.mrf.mxu0 }
 0x21b   :  { %v7488_v14 = vld [vmem:[%s10692_s4 + $0x1b0] ss:$8 sps:$4 sm:$0xff]  }
 0x21c   :  { %v8531_v37 = vpack.c.bf16 %v1947_v26, %v1946_v59  ;;  %v1590_v18 = vpop.f32.mrf.mxu0 }
 0x21e   :  { %v1593_v52 = vpop.f32.mrf.mxu0  ;;  %1760 = vmatmul.mubr.bf16.gmra.mxu0 %v7486_v50  ;;  %6297 = vmatmul.mubr.msk.bf16.vlgmr.msra.gmra.mxu1 %vm8527_vm2, %v8531_v37 }
 0x21f   :  { %1767 = vmatprep.mubr.bf16.mxu0 %v7487_v20  ;;  %2538 = vmatprep.mubr.bf16.mxu1 %v10699_v40  ;;  %v2138_v36 = vrot.slane %v1593_v52, 1  ;;  %v7489_v52 = vld [vmem:[%s10692_s4 + $0x1c4] ss:$8 sps:$4 sm:$0xff]  }
 0x220   :  { %v1595_v33 = vpop.f32.mrf.mxu0 }
 0x222   :  { %v1596_v13 = vpop.f32.mrf.mxu0 }
 0x223   :  { %v2139_v55 = vrot.slane %v1596_v13, 1 }
 0x224   :  { %v1598_v5 = vpop.f32.mrf.mxu0 }
 0x225   :  { %v2140_v46 = vsel %vm1867_vm0, %v2138_v36, %v2139_v55  ;;  %v2179_v47 = vadd.f32 %v2139_v55, %v8241_v63  ;;  %v7490_v5 = vld [vmem:[%s10692_s4 + $0x1c0] ss:$8 sps:$4 sm:$0xff]  }
 0x226   :  { %v2178_v26 = vadd.f32 %v2140_v46, %v8235_v57  ;;  %v1601_v59 = vpop.f32.mrf.mxu0  ;;  %1768 = vmatmul.mubr.bf16.gmra.mxu0 %v7488_v14  ;;  %v7491_v46 = vld [vmem:[%s10692_s4 + $0x1d4] ss:$8 sps:$4 sm:$0xff]  }
 0x227   :  { %v2195_v18 = vadd.f32 %v8513_v54, %v2179_v47  ;;  %1773 = vmatprep.mubr.bf16.mxu0 %v7489_v52  ;;  %v10700_v59 = vld [vmem:[#allocation3_spill] sm:$0xff] }
 0x228   :  { %v2194_v50 = vadd.f32 %v8513_v54, %v2178_v26  ;;  %v1602_v20 = vpop.f32.mrf.mxu0  ;;  %v1838_v14 = vadd.f32 %v10700_v59, %v8282_v38  ;;  %v7493_v38 = vld [vmem:[%s10692_s4 + $0x1e4] ss:$8 sps:$4 sm:$0xff]  }
 0x229   :  { %v2211_v33 = vmax.f32 %v2195_v18, 0.0 }
 0x22a   :  { %v2210_v63 = vmax.f32 %v2194_v50, 0.0  ;;  %v1603_v13 = vpop.f32.mrf.mxu0 }
 0x22c   :  { %v8554_v57 = vpack.c.bf16 %v2211_v33, %v2210_v63  ;;  %v1604_v36 = vpop.f32.mrf.mxu0 }
 0x22d   :  { %v7492_v36 = vld [vmem:[%s10692_s4 + $0x1d0] ss:$8 sps:$4 sm:$0xff]  }
 0x22e   :  { %v1607_v55 = vpop.f32.mrf.mxu0  ;;  %1774 = vmatmul.mubr.bf16.gmra.mxu0 %v7490_v5 }
 0x22f   :  { %1781 = vmatprep.mubr.bf16.mxu0 %v7491_v46  ;;  %v1871_v18 = vrot.slane %v1607_v55, 1 }
 0x230   :  { %v1609_v47 = vpop.f32.mrf.mxu0 }
 0x232   :  { %v1610_v26 = vpop.f32.mrf.mxu0 }
 0x233   :  { %v1872_v52 = vrot.slane %v1610_v26, 1 }
 0x234   :  { %v1612_v50 = vpop.f32.mrf.mxu0 }
 0x235   :  { %v1873_v20 = vsel %vm1867_vm0, %v1871_v18, %v1872_v52  ;;  %v1911_v33 = vadd.f32 %v1872_v52, %v1838_v14  ;;  %v7494_v52 = vld [vmem:[%s10692_s4 + $0x1e0] ss:$8 sps:$4 sm:$0xff]   ;;  %v7495_v50 = vld [vmem:[%s10692_s4 + $0x1f4] ss:$8 sps:$4 sm:$0xff]  }
 0x236   :  { %v1910_v63 = vadd.f32 %v1873_v20, %v8277_v17  ;;  %v1615_v13 = vpop.f32.mrf.mxu0  ;;  %1782 = vmatmul.mubr.bf16.gmra.mxu0 %v7492_v36 }
 0x237   :  { %v1933_v5 = vadd.f32 %v8513_v54, %v1911_v33  ;;  %1787 = vmatprep.mubr.bf16.mxu0 %v7493_v38  ;;  %v2109_v13 = vadd.f32 %v2070_v60, %v8289_v25 }
 0x238   :  { %v1932_v55 = vadd.f32 %v8513_v54, %v1910_v63  ;;  %v1616_v46 = vpop.f32.mrf.mxu0 }
 0x239   :  { %v1949_v47 = vmax.f32 %v1933_v5, 0.0 }
 0x23a   :  { %v1948_v26 = vmax.f32 %v1932_v55, 0.0  ;;  %v1617_v59 = vpop.f32.mrf.mxu0 }
 0x23c   :  { %v8574_v17 = vpack.c.bf16 %v1949_v47, %v1948_v26  ;;  %v1618_v14 = vpop.f32.mrf.mxu0  ;;  %v7496_v26 = vld [vmem:[%s10692_s4 + $0x1f0] ss:$8 sps:$4 sm:$0xff]  }
 0x23e   :  { %v1621_v18 = vpop.f32.mrf.mxu0  ;;  %1788 = vmatmul.mubr.bf16.gmra.mxu0 %v7494_v52  ;;  %6300 = vmatmul.mubr.msk.bf16.gmra.mxu1 %vm8527_vm2, %v8574_v17 }
 0x23f   :  { %2546 = vmatprep.mubr.bf16.mxu1 %v10699_v40  ;;  %1795 = vmatprep.mubr.bf16.mxu0 %v7495_v50  ;;  %v2141_v63 = vrot.slane %v1621_v18, 1 }
 0x240   :  { %v1623_v20 = vpop.f32.mrf.mxu0 }
 0x241   :  { %v7078_v20 = vld [vmem:[%s10694_s2 + $0x124] ss:$20 sps:$4 sm:$0xff]  }
 0x242   :  { %v1624_v33 = vpop.f32.mrf.mxu0  ;;  %2595 = vmatprep.subr.bf16.mxu1 %v7078_v20 }
 0x243   :  { %v2142_v36 = vrot.slane %v1624_v33, 1 }
 0x244   :  { %v1626_v5 = vpop.f32.mrf.mxu0 }
 0x245   :  { %v2143_v38 = vsel %vm1867_vm0, %v2141_v63, %v2142_v36  ;;  %v2181_v55 = vadd.f32 %v2142_v36, %v2109_v13  ;;  %v7079_v63 = vld [vmem:[%s10694_s2 + $0xf8] ss:$20 sps:$4 sm:$0xff]   ;;  %v7081_v13 = vld [vmem:[%s10694_s2 + $0xfc] ss:$20 sps:$4 sm:$0xff]  }
 0x246   :  { %v2180_v46 = vadd.f32 %v2143_v38, %v8284_v48  ;;  %v1629_v47 = vpop.f32.mrf.mxu0  ;;  %1796 = vmatmul.mubr.bf16.gmra.mxu0 %v7496_v26  ;;  %v7076_v48 = vld [vmem:[%s10694_s2 + $0x120] ss:$20 sps:$4 sm:$0xff]   ;;  %v1840_v38 = vadd.f32 %v8299_v58, %v8315_v8  ;;  %v7082_v8 = vld [vmem:[%s10694_s2 + $0xd0] ss:$20 sps:$4 sm:$0xff]  }
 0x247   :  { %v2197_v59 = vadd.f32 %v8513_v54, %v2181_v55  ;;  %2596 = vmatpush1.bf16.msra.mxu1 %v7076_v48 }
 0x248   :  { %v2196_v14 = vadd.f32 %v8513_v54, %v2180_v46  ;;  %v1630_v18 = vpop.f32.mrf.mxu0  ;;  %2597 = vmatprep.subr.bf16.mxu1 %v7081_v13 }
 0x249   :  { %v2213_v56 = vmax.f32 %v2197_v59, 0.0 }
 0x24a   :  { %v2212_v60 = vmax.f32 %v2196_v14, 0.0  ;;  %v1631_v25 = vpop.f32.mrf.mxu0 }
 0x24b   :  { %2598 = vmatpush1.bf16.msra.mxu1 %v7079_v63 }
 0x24c   :  { %v8596_v52 = vpack.c.bf16 %v2213_v56, %v2212_v60  ;;  %v1632_v50 = vpop.f32.mrf.mxu0 }
 0x24e   :  { %v1635_v33 = vpop.f32.mrf.mxu0 }
 0x24f   :  { %v1874_v55 = vrot.slane %v1635_v33, 1 }
 0x250   :  { %v1637_v36 = vpop.f32.mrf.mxu0 }
 0x251   :  { %v7085_v36 = vld [vmem:[%s10694_s2 + $0xa8] ss:$20 sps:$4 sm:$0xff]  }
 0x252   :  { %v1638_v5 = vpop.f32.mrf.mxu0 }
 0x253   :  { %v1875_v46 = vrot.slane %v1638_v5, 1  ;;  %v7087_v5 = vld [vmem:[%s10694_s2 + $0xac] ss:$20 sps:$4 sm:$0xff]  }
 0x254   :  { %v1640_v47 = vpop.f32.mrf.mxu0 }
 0x255   :  { %v1876_v26 = vsel %vm1867_vm0, %v1874_v55, %v1875_v46  ;;  %v1913_v59 = vadd.f32 %v1875_v46, %v1840_v38  ;;  %v2111_v46 = vadd.f32 %v2073_v3, %v8320_v0  ;;  %v7088_v0 = vld [vmem:[%s10694_s2 + $0x80] ss:$20 sps:$4 sm:$0xff]  }
 0x256   :  { %v1912_v14 = vadd.f32 %v1876_v26, %v8310_v28  ;;  %v1643_v18 = vpop.f32.mrf.mxu0  ;;  %v7084_v28 = vld [vmem:[%s10694_s2 + $0xd4] ss:$20 sps:$4 sm:$0xff]  }
 0x257   :  { %v1935_v56 = vadd.f32 %v8513_v54, %v1913_v59  ;;  %2599 = vmatprep.subr.bf16.mxu1 %v7084_v28  ;;  %v7091_v28 = vld [vmem:[%s10694_s2 + $0x58] ss:$20 sps:$4 sm:$0xff]  }
 0x258   :  { %v1934_v60 = vadd.f32 %v8513_v54, %v1912_v14  ;;  %v1644_v25 = vpop.f32.mrf.mxu0  ;;  %2600 = vmatpush1.bf16.msra.mxu1 %v7082_v8 }
 0x259   :  { %v1951_v50 = vmax.f32 %v1935_v56, 0.0  ;;  %2601 = vmatprep.subr.bf16.mxu1 %v7087_v5  ;;  %v1842_v5 = vadd.f32 %v8330_v6, %v8352_v24  ;;  %v7094_v24 = vld [vmem:[%s10694_s2 + $0x30] ss:$20 sps:$4 sm:$0xff]  }
 0x25a   :  { %v1950_v48 = vmax.f32 %v1934_v60, 0.0  ;;  %v1645_v20 = vpop.f32.mrf.mxu0 }
 0x25c   :  { %v8616_v13 = vpack.c.bf16 %v1951_v50, %v1950_v48  ;;  %v1646_v58 = vpop.f32.mrf.mxu0  ;;  %2602 = vmatpush1.bf16.msra.mxu1 %v7085_v36 }
 0x25e   :  { %v1649_v33 = vpop.f32.mrf.mxu0  ;;  %6303 = vmatmul.mubr.msk.bf16.gmra.mxu1 %vm8527_vm2, %v8616_v13 }
 0x25f   :  { %2554 = vmatprep.mubr.bf16.mxu1 %v10699_v40  ;;  %v2144_v55 = vrot.slane %v1649_v33, 1  ;;  %v7093_v33 = vld [vmem:[%s10694_s2 + $0x5c] ss:$20 sps:$4 sm:$0xff]  }
 0x260   :  { %v1651_v63 = vpop.f32.mrf.mxu0 }
 0x262   :  { %v1652_v38 = vpop.f32.mrf.mxu0 }
 0x263   :  { %v2145_v47 = vrot.slane %v1652_v38, 1 }
 0x264   :  { %v1654_v26 = vpop.f32.mrf.mxu0 }
 0x265   :  { %v2146_v59 = vsel %vm1867_vm0, %v2144_v55, %v2145_v47  ;;  %v2183_v14 = vadd.f32 %v2145_v47, %v2111_v46 }
 0x266   :  { %v2182_v18 = vadd.f32 %v2146_v59, %v8317_v1  ;;  %v1657_v56 = vpop.f32.mrf.mxu0  ;;  %v7090_v1 = vld [vmem:[%s10694_s2 + $0x84] ss:$20 sps:$4 sm:$0xff]  }
 0x267   :  { %v2199_v60 = vadd.f32 %v8513_v54, %v2183_v14  ;;  %2603 = vmatprep.subr.bf16.mxu1 %v7090_v1  ;;  %v7097_v1 = vld [vmem:[%s10694_s2 + $0x8] ss:$20 sps:$4 sm:$0xff]  }
 0x268   :  { %v2198_v25 = vadd.f32 %v8513_v54, %v2182_v18  ;;  %v1658_v50 = vpop.f32.mrf.mxu0  ;;  %2604 = vmatpush1.bf16.msra.mxu1 %v7088_v0  ;;  %v7099_v0 = vld [vmem:[%s10694_s2 + $0xc] ss:$20 sps:$4 sm:$0xff]  }
 0x269   :  { %v2215_v48 = vmax.f32 %v2199_v60, 0.0  ;;  %2605 = vmatprep.subr.bf16.mxu1 %v7093_v33  ;;  %v2113_v33 = vadd.f32 %v2076_v43, %v8363_v21  ;;  %v8691_v43 = vld [vmem:[%s10694_s2 + $0x128] ss:$20 sps:$4 sm:$0xff]  }
 0x26a   :  { %v2214_v20 = vmax.f32 %v2198_v25, 0.0  ;;  %v1659_v58 = vpop.f32.mrf.mxu0 }
 0x26c   :  { %v8641_v10 = vpack.c.bf16 %v2215_v48, %v2214_v20  ;;  %v1660_v3 = vpop.f32.mrf.mxu0  ;;  %2606 = vmatpush1.bf16.msra.mxu1 %v7091_v28 }
 0x26e   :  { %v1663_v8 = vpop.f32.mrf.mxu0 }
 0x26f   :  { %v1877_v38 = vrot.slane %v1663_v8, 1 }
 0x270   :  { %v1665_v63 = vpop.f32.mrf.mxu0 }
 0x272   :  { %v1666_v36 = vpop.f32.mrf.mxu0 }
 0x273   :  { %v1878_v55 = vrot.slane %v1666_v36, 1 }
 0x274   :  { %v1668_v46 = vpop.f32.mrf.mxu0 }
 0x275   :  { %v1879_v47 = vsel %vm1867_vm0, %v1877_v38, %v1878_v55  ;;  %v1915_v26 = vadd.f32 %v1878_v55, %v1842_v5 }
 0x276   :  { %v1914_v59 = vadd.f32 %v1879_v47, %v8344_v16  ;;  %v1671_v14 = vpop.f32.mrf.mxu0  ;;  %v7096_v16 = vld [vmem:[%s10694_s2 + $0x34] ss:$20 sps:$4 sm:$0xff]  }
 0x277   :  { %v1937_v18 = vadd.f32 %v8513_v54, %v1915_v26  ;;  %2607 = vmatprep.subr.bf16.mxu1 %v7096_v16 }
 0x278   :  { %v1936_v56 = vadd.f32 %v8513_v54, %v1914_v59  ;;  %v1672_v60 = vpop.f32.mrf.mxu0  ;;  %2608 = vmatpush1.bf16.msra.mxu1 %v7094_v24 }
 0x279   :  { %v1953_v25 = vmax.f32 %v1937_v18, 0.0  ;;  %2609 = vmatprep.subr.bf16.mxu1 %v7099_v0 }
 0x27a   :  { %v1952_v50 = vmax.f32 %v1936_v56, 0.0  ;;  %v1673_v48 = vpop.f32.mrf.mxu0 }
 0x27c   :  { %v8661_v20 = vpack.c.bf16 %v1953_v25, %v1952_v50  ;;  %v1674_v6 = vpop.f32.mrf.mxu0  ;;  %2610 = vmatpush1.bf16.msra.mxu1 %v7097_v1  ;;  %v1844_v50 = vadd.f32 %v8391_v32, %v8401_v19 }
 0x27d   :  { %6745 = vmatprep.subr.bf16.mxu1 %v8691_v43 }
 0x27e   :  { %v1677_v58 = vpop.f32.mrf.mxu0  ;;  %6306 = vmatmul.mubr.msk.bf16.gmra.mxu1 %vm8527_vm2, %v8661_v20 }
 0x27f   :  { %2562 = vmatprep.mubr.bf16.mxu1 %v10699_v40  ;;  %v2147_v28 = vrot.slane %v1677_v58, 1 }
 0x280   :  { %v1679_v3 = vpop.f32.mrf.mxu0 }
 0x282   :  { %v1680_v8 = vpop.f32.mrf.mxu0 }
 0x283   :  { %v2148_v63 = vrot.slane %v1680_v8, 1 }
 0x284   :  { %v1682_v36 = vpop.f32.mrf.mxu0 }
 0x285   :  { %v2149_v5 = vsel %vm1867_vm0, %v2147_v28, %v2148_v63  ;;  %v2185_v38 = vadd.f32 %v2148_v63, %v2113_v33 }
 0x286   :  { %v2184_v55 = vadd.f32 %v2149_v5, %v8357_v22  ;;  %v1685_v46 = vpop.f32.mrf.mxu0 }
 0x287   :  { %v2201_v47 = vadd.f32 %v8513_v54, %v2185_v38  ;;  %v10701_v46 = vrot.slane %v8387_v27, 1 }
 0x288   :  { %v2200_v26 = vadd.f32 %v8513_v54, %v2184_v55  ;;  %v1686_v59 = vpop.f32.mrf.mxu0 }
 0x289   :  { %v2217_v14 = vmax.f32 %v2201_v47, 0.0  ;;  %v2115_v47 = vadd.f32 %v10701_v46, %v8406_v12 }
 0x28a   :  { %v2216_v18 = vmax.f32 %v2200_v26, 0.0  ;;  %v1687_v56 = vpop.f32.mrf.mxu0 }
 0x28c   :  { %v8686_v60 = vpack.c.bf16 %v2217_v14, %v2216_v18  ;;  %v1688_v7 = vpop.f32.mrf.mxu0 }
 0x28e   :  { %v1691_v21 = vpop.f32.mrf.mxu0 }
 0x28f   :  { %v1880_v48 = vrot.slane %v1691_v21, 1 }
 0x290   :  { %v1693_v22 = vpop.f32.mrf.mxu0 }
 0x292   :  { %v1694_v25 = vpop.f32.mrf.mxu0 }
 0x293   :  { %v1881_v6 = vrot.slane %v1694_v25, 1 }
 0x294   :  { %v1696_v24 = vpop.f32.mrf.mxu0 }
 0x295   :  { %v1882_v16 = vsel %vm1867_vm0, %v1880_v48, %v1881_v6  ;;  %v1917_v58 = vadd.f32 %v1881_v6, %v1844_v50 }
 0x296   :  { %v1916_v3 = vadd.f32 %v1882_v16, %v8396_v9  ;;  %v1699_v0 = vpop.f32.mrf.mxu0 }
 0x297   :  { %v1939_v1 = vadd.f32 %v8513_v54, %v1917_v58 }
 0x298   :  { %v1938_v8 = vadd.f32 %v8513_v54, %v1916_v3  ;;  %v1700_v28 = vpop.f32.mrf.mxu0  ;;  %v1846_v3 = vadd.f32 %v8416_v29, %v8426_v23 }
 0x299   :  { %v1955_v33 = vmax.f32 %v1939_v1, 0.0 }
 0x29a   :  { %v1954_v63 = vmax.f32 %v1938_v8, 0.0  ;;  %v1701_v36 = vpop.f32.mrf.mxu0 }
 0x29c   :  { %v8700_v5 = vpack.c.bf16 %v1955_v33, %v1954_v63  ;;  %v1702_v32 = vpop.f32.mrf.mxu0 }
 0x29e   :  { %v1705_v19 = vpop.f32.mrf.mxu0  ;;  %6309 = vmatmul.mubr.msk.bf16.gmra.mxu1 %vm8527_vm2, %v8700_v5 }
 0x29f   :  { %2570 = vmatprep.mubr.bf16.mxu1 %v10699_v40  ;;  %v2150_v55 = vrot.slane %v1705_v19, 1 }
 0x2a0   :  { %v1707_v9 = vpop.f32.mrf.mxu0 }
 0x2a2   :  { %v1708_v38 = vpop.f32.mrf.mxu0 }
 0x2a3   :  { %v2151_v26 = vrot.slane %v1708_v38, 1 }
 0x2a4   :  { %v1710_v59 = vpop.f32.mrf.mxu0 }
 0x2a5   :  { %v2152_v14 = vsel %vm1867_vm0, %v2150_v55, %v2151_v26  ;;  %v2187_v18 = vadd.f32 %v2151_v26, %v2115_v47  ;;  %v10702_v59 = vrot.slane %v8412_v34, 1 }
 0x2a6   :  { %v2186_v56 = vadd.f32 %v2152_v14, %v8403_v15  ;;  %v1713_v7 = vpop.f32.mrf.mxu0 }
 0x2a7   :  { %v2203_v21 = vadd.f32 %v8513_v54, %v2187_v18  ;;  %v2117_v14 = vadd.f32 %v10702_v59, %v8431_v35 }
 0x2a8   :  { %v2202_v22 = vadd.f32 %v8513_v54, %v2186_v56  ;;  %v1714_v25 = vpop.f32.mrf.mxu0 }
 0x2a9   :  { %v2219_v50 = vmax.f32 %v2203_v21, 0.0 }
 0x2aa   :  { %v2218_v48 = vmax.f32 %v2202_v22, 0.0  ;;  %v1715_v6 = vpop.f32.mrf.mxu0 }
 0x2ac   :  { %v8713_v24 = vpack.c.bf16 %v2219_v50, %v2218_v48  ;;  %v1716_v27 = vpop.f32.mrf.mxu0 }
 0x2ae   :  { %v1719_v12 = vpop.f32.mrf.mxu0 }
 0x2af   :  { %v1883_v0 = vrot.slane %v1719_v12, 1 }
 0x2b0   :  { %v1721_v16 = vpop.f32.mrf.mxu0 }
 0x2b2   :  { %v1722_v58 = vpop.f32.mrf.mxu0 }
 0x2b3   :  { %v1884_v15 = vrot.slane %v1722_v58, 1 }
 0x2b4   :  { %v1724_v1 = vpop.f32.mrf.mxu0 }
 0x2b5   :  { %v1885_v8 = vsel %vm1867_vm0, %v1883_v0, %v1884_v15  ;;  %v1919_v28 = vadd.f32 %v1884_v15, %v1846_v3  ;;  %v1848_v15 = vadd.f32 %v8445_v45, %v8459_v62 }
 0x2b6   :  { %v1918_v33 = vadd.f32 %v1885_v8, %v8421_v41  ;;  %v1727_v63 = vpop.f32.mrf.mxu0 }
 0x2b7   :  { %v1941_v36 = vadd.f32 %v8513_v54, %v1919_v28 }
 0x2b8   :  { %v1940_v32 = vadd.f32 %v8513_v54, %v1918_v33  ;;  %v1728_v19 = vpop.f32.mrf.mxu0 }
 0x2b9   :  { %v1957_v9 = vmax.f32 %v1941_v36, 0.0 }
 0x2ba   :  { %v1956_v38 = vmax.f32 %v1940_v32, 0.0  ;;  %v1729_v55 = vpop.f32.mrf.mxu0 }
 0x2bc   :  { %v8721_v46 = vpack.c.bf16 %v1957_v9, %v1956_v38  ;;  %v1730_v29 = vpop.f32.mrf.mxu0 }
 0x2be   :  { %v1733_v23 = vpop.f32.mrf.mxu0  ;;  %6312 = vmatmul.mubr.msk.bf16.gmra.mxu1 %vm8527_vm2, %v8721_v46 }
 0x2bf   :  { %2578 = vmatprep.mubr.bf16.mxu1 %v10699_v40  ;;  %v2153_v26 = vrot.slane %v1733_v23, 1  ;;  %v1542_v23 = vpop.f32.mrf.mxu1 }
 0x2c0   :  { %v1735_v41 = vpop.f32.mrf.mxu0 }
 0x2c2   :  { %v1736_v47 = vpop.f32.mrf.mxu0 }
 0x2c3   :  { %v2154_v18 = vrot.slane %v1736_v47, 1 }
 0x2c4   :  { %v1738_v56 = vpop.f32.mrf.mxu0 }
 0x2c5   :  { %v2155_v7 = vsel %vm1867_vm0, %v2153_v26, %v2154_v18  ;;  %v2189_v21 = vadd.f32 %v2154_v18, %v2117_v14  ;;  %v10703_v14 = vrot.slane %v8437_v42, 1 }
 0x2c6   :  { %v2188_v22 = vadd.f32 %v2155_v7, %v8428_v39  ;;  %v1741_v25 = vpop.f32.mrf.mxu0 }
 0x2c7   :  { %v2205_v50 = vadd.f32 %v8513_v54, %v2189_v21  ;;  %v2119_v18 = vadd.f32 %v10703_v14, %v8466_v51 }
 0x2c8   :  { %v2204_v48 = vadd.f32 %v8513_v54, %v2188_v22  ;;  %v1742_v6 = vpop.f32.mrf.mxu0 }
 0x2c9   :  { %v2221_v27 = vmax.f32 %v2205_v50, 0.0 }
 0x2ca   :  { %v2220_v12 = vmax.f32 %v2204_v48, 0.0  ;;  %v1743_v16 = vpop.f32.mrf.mxu0 }
 0x2cc   :  { %v8734_v58 = vpack.c.bf16 %v2221_v27, %v2220_v12  ;;  %v1744_v34 = vpop.f32.mrf.mxu0 }
 0x2ce   :  { %v1747_v35 = vpop.f32.mrf.mxu0 }
 0x2cf   :  { %v1886_v1 = vrot.slane %v1747_v35, 1 }
 0x2d0   :  { %v1749_v3 = vpop.f32.mrf.mxu0 }
 0x2d2   :  { %v1750_v0 = vpop.f32.mrf.mxu0 }
 0x2d3   :  { %v1887_v39 = vrot.slane %v1750_v0, 1 }
 0x2d4   :  { %v1752_v8 = vpop.f32.mrf.mxu0 }
 0x2d5   :  { %v1888_v28 = vsel %vm1867_vm0, %v1886_v1, %v1887_v39  ;;  %v1921_v33 = vadd.f32 %v1887_v39, %v1848_v15 }
 0x2d6   :  { %v1920_v63 = vadd.f32 %v1888_v28, %v8454_v11  ;;  %v1755_v36 = vpop.f32.mrf.mxu0 }
 0x2d7   :  { %v1943_v32 = vadd.f32 %v8513_v54, %v1921_v33 }
 0x2d8   :  { %v1942_v19 = vadd.f32 %v8513_v54, %v1920_v63  ;;  %v1756_v9 = vpop.f32.mrf.mxu0  ;;  %v1850_v63 = vadd.f32 %v8486_v31, %v1542_v23 }
 0x2d9   :  { %v1959_v38 = vmax.f32 %v1943_v32, 0.0 }
 0x2da   :  { %v1958_v55 = vmax.f32 %v1942_v19, 0.0  ;;  %v1757_v29 = vpop.f32.mrf.mxu0 }
 0x2dc   :  { %v8742_v41 = vpack.c.bf16 %v1959_v38, %v1958_v55  ;;  %v1758_v45 = vpop.f32.mrf.mxu0 }
 0x2de   :  { %v1761_v62 = vpop.f32.mrf.mxu0  ;;  %v8744_v47 = vpop.f32.mrf.mxu1  ;;  %6315 = vmatmul.mubr.msk.bf16.gmra.mxu1 %vm8527_vm2, %v8742_v41 }
 0x2df   :  { %2586 = vmatprep.mubr.bf16.mxu1 %v10699_v40  ;;  %v2156_v7 = vrot.slane %v1761_v62, 1  ;;  %v2838_v21 = vrot.slane %v8744_v47, 7 }
 0x2e0   :  { %v1763_v11 = vpop.f32.mrf.mxu0  ;;  %v2534_v26 = vpop.f32.mrf.mxu1 }
 0x2e2   :  { %v1764_v59 = vpop.f32.mrf.mxu0  ;;  %v2535_v56 = vpop.f32.mrf.mxu1 }
 0x2e3   :  { %v2157_v22 = vrot.slane %v1764_v59, 1  ;;  %v2841_v25 = vrot.slane %v2535_v56, 7 }
 0x2e4   :  { %v1766_v50 = vpop.f32.mrf.mxu0  ;;  %v2537_v48 = vpop.f32.mrf.mxu1 }
 0x2e5   :  { %v2158_v6 = vsel %vm1867_vm0, %v2156_v7, %v2157_v22  ;;  %v2191_v27 = vadd.f32 %v2157_v22, %v2119_v18  ;;  %v8758_v12 = vsel %vm2837_vm3, %v2838_v21, %v2841_v25  ;;  %v2121_v48 = vadd.f32 %v2088_v49, %v8505_v53 }
 0x2e6   :  { %v2190_v42 = vadd.f32 %v2158_v6, %v8461_v44  ;;  %v1769_v51 = vpop.f32.mrf.mxu0 }
 0x2e7   :  { %v2207_v16 = vadd.f32 %v8513_v54, %v2191_v27  ;;  %v7101_v51 = vld [vmem:[%s10694_s2 + $0x100] ss:$20 sps:$4 sm:$0xff]  }
 0x2e8   :  { %v2206_v34 = vadd.f32 %v8513_v54, %v2190_v42  ;;  %v1770_v35 = vpop.f32.mrf.mxu0 }
 0x2e9   :  { %v2223_v3 = vmax.f32 %v2207_v16, 0.0 }
 0x2ea   :  { %v2222_v0 = vmax.f32 %v2206_v34, 0.0  ;;  %v1771_v15 = vpop.f32.mrf.mxu0 }
 0x2eb   :  { %v7102_v15 = vld [vmem:[%s10694_s2 + $0xd8] ss:$20 sps:$4 sm:$0xff]  }
 0x2ec   :  { %v8763_v1 = vpack.c.bf16 %v2223_v3, %v2222_v0  ;;  %v1772_v39 = vpop.f32.mrf.mxu0 }
 0x2ee   :  { %v1775_v8 = vpop.f32.mrf.mxu0 }
 0x2ef   :  { %v1889_v36 = vrot.slane %v1775_v8, 1 }
 0x2f0   :  { %v1777_v28 = vpop.f32.mrf.mxu0 }
 0x2f2   :  { %v1778_v33 = vpop.f32.mrf.mxu0 }
 0x2f3   :  { %v1890_v32 = vrot.slane %v1778_v33, 1 }
 0x2f4   :  { %v1780_v44 = vpop.f32.mrf.mxu0 }
 0x2f5   :  { %v1891_v19 = vsel %vm1867_vm0, %v1889_v36, %v1890_v32  ;;  %v1923_v9 = vadd.f32 %v1890_v32, %v1850_v63  ;;  %v7105_v36 = vld [vmem:[%s10694_s2 + $0x60] ss:$20 sps:$4 sm:$0xff]   ;;  %v7106_v32 = vld [vmem:[%s10694_s2 + $0x38] ss:$20 sps:$4 sm:$0xff]   ;;  %v7107_v44 = vld [vmem:[%s10694_s2 + $0x10] ss:$20 sps:$4 sm:$0xff]  }
 0x2f6   :  { %v1922_v38 = vadd.f32 %v1891_v19, %v8495_v30  ;;  %v1783_v55 = vpop.f32.mrf.mxu0 }
 0x2f7   :  { %v1945_v29 = vadd.f32 %v8513_v54, %v1923_v9 }
 0x2f8   :  { %v1944_v45 = vadd.f32 %v8513_v54, %v1922_v38  ;;  %v1784_v62 = vpop.f32.mrf.mxu0 }
 0x2f9   :  { %v1961_v11 = vmax.f32 %v1945_v29, 0.0  ;;  %v7497_v62 = vld [vmem:[%s10694_s2 + $0x11c] ss:$20 sps:$4 sm:$0xff]  }
 0x2fa   :  { %v1960_v26 = vmax.f32 %v1944_v45, 0.0  ;;  %v1785_v59 = vpop.f32.mrf.mxu0 }
 0x2fb   :  { %v7110_v59 = vld [vmem:[%s10704_s26 + $0x74] ss:$8 sps:$4 sm:$0xff]  }
 0x2fc   :  { %v8770_v14 = vpack.c.bf16 %v1961_v11, %v1960_v26  ;;  %v1786_v31 = vpop.f32.mrf.mxu0  ;;  %v7108_v26 = vld [vmem:[%s10704_s26 + $0x70] ss:$8 sps:$4 sm:$0xff]   ;;  %5275 = vmatprep.subr.bf16.mxu0 %v7110_v59  ;;  %v7522_v59 = vld [vmem:[%s10694_s2 + $0x80] ss:$20 sps:$4 sm:$0xff]  }
 0x2fd   :  { %5276 = vmatpush1.bf16.msra.mxu0 %v7108_v26  ;;  %v7521_v26 = vld [vmem:[%s10694_s2 + $0x84] ss:$20 sps:$4 sm:$0xff]  }
 0x2fe   :  { %v1789_v23 = vpop.f32.mrf.mxu0  ;;  %v8772_v18 = vpop.f32.mrf.mxu1  ;;  %6318 = vmatmul.mubr.msk.bf16.gmra.mxu1 %vm8527_vm2, %v8770_v14 }
 0x2ff   :  { %2627 = vmatprep.mubr.bf16.mxu1 %v10699_v40  ;;  %v2159_v7 = vrot.slane %v1789_v23, 1  ;;  %v10681_v50 = vrot.slane %v8772_v18, 7 }
 0x300   :  { %v1791_v30 = vpop.f32.mrf.mxu0  ;;  %v2542_v56 = vpop.f32.mrf.mxu1 }
 0x302   :  { %v1792_v22 = vpop.f32.mrf.mxu0  ;;  %v2543_v25 = vpop.f32.mrf.mxu1 }
 0x303   :  { %v2160_v6 = vrot.slane %v1792_v22, 1  ;;  %v2850_v27 = vrot.slane %v2543_v25, 7 }
 0x304   :  { %v2545_v42 = vpop.f32.mrf.mxu1  ;;  %v1794_v16 = vpop.f32.mrf.mxu0 }
 0x305   :  { %v2161_v34 = vsel %vm1867_vm0, %v2159_v7, %v2160_v6  ;;  %v2193_v35 = vadd.f32 %v2160_v6, %v2121_v48  ;;  %v8789_v3 = vsel %vm2837_vm3, %v10681_v50, %v2850_v27  ;;  %v7499_v48 = vld [vmem:[%s10694_s2 + $0xf4] ss:$20 sps:$4 sm:$0xff]   ;;  %v7501_v27 = vld [vmem:[%s10694_s2 + $0xcc] ss:$20 sps:$4 sm:$0xff]  }
 0x306   :  { %v2192_v0 = vadd.f32 %v2161_v34, %v8500_v2  ;;  %6321 = vmatmul.mubr.msk.bf16.vlgmr.msra.gmra.mxu1 %vm8527_vm2, %v8531_v37  ;;  %v1797_v49 = vpop.f32.mrf.mxu0  ;;  %v7111_v6 = vld [vmem:[%s10704_s26 + $0x60] ss:$8 sps:$4 sm:$0xff]  }
 0x307   :  { %v2209_v61 = vadd.f32 %v8513_v54, %v2193_v35  ;;  %6746 = vmatpush3.bf16.msra.mxu1 %v8691_v43  ;;  %2635 = vmatprep.mubr.bf16.mxu1 %v10699_v40  ;;  %v7103_v43 = vld [vmem:[%s10694_s2 + $0xb0] ss:$20 sps:$4 sm:$0xff]   ;;  %v7502_v42 = vld [vmem:[%s10694_s2 + $0xc8] ss:$20 sps:$4 sm:$0xff]   ;;  %v7504_v16 = vld [vmem:[%s10694_s2 + $0xa0] ss:$20 sps:$4 sm:$0xff]  }
 0x308   :  { %v2208_v53 = vadd.f32 %v8513_v54, %v2192_v0  ;;  %6747 = vmatprep.subr.bf16.mxu1 %v7101_v51  ;;  %v1798_v39 = vpop.f32.mrf.mxu0  ;;  %v7104_v54 = vld [vmem:[%s10694_s2 + $0x88] ss:$20 sps:$4 sm:$0xff]   ;;  %v7114_v35 = vld [vmem:[%s10704_s26 + $0x50] ss:$8 sps:$4 sm:$0xff]   ;;  %v7509_v0 = vld [vmem:[%s10694_s2 + $0x2c] ss:$20 sps:$4 sm:$0xff]  }
 0x309   :  { %v2225_v2 = vmax.f32 %v2209_v61, 0.0  ;;  %v7507_v34 = vld [vmem:[%s10694_s2 + $0x54] ss:$20 sps:$4 sm:$0xff]  }
 0x30a   :  { %v2224_v8 = vmax.f32 %v2208_v53, 0.0  ;;  %v1799_v28 = vpop.f32.mrf.mxu0  ;;  %v7510_v61 = vld [vmem:[%s10694_s2 + $0x28] ss:$20 sps:$4 sm:$0xff]  }
 0x30b   :  { %6748 = vmatpush3.bf16.msra.mxu1 %v7101_v51  ;;  %v7503_v51 = vld [vmem:[%s10694_s2 + $0xa4] ss:$20 sps:$4 sm:$0xff]  }
 0x30c   :  { %v8802_v33 = vpack.c.bf16 %v2225_v2, %v2224_v8  ;;  %6749 = vmatprep.subr.bf16.mxu1 %v7102_v15  ;;  %v1800_v63 = vpop.f32.mrf.mxu0 }
 0x30e   :  { %6324 = vmatmul.mubr.msk.bf16.gmra.mxu1 %vm8527_vm2, %v8574_v17 }
 0x30f   :  { %2643 = vmatprep.mubr.bf16.mxu1 %v10699_v40  ;;  %6750 = vmatpush3.bf16.msra.mxu1 %v7102_v15  ;;  %v7511_v15 = vld [vmem:[%s10694_s2 + $0x4] ss:$20 sps:$4 sm:$0xff]  }
 0x310   :  { %6751 = vmatprep.subr.bf16.mxu1 %v7103_v43 }
 0x313   :  { %6752 = vmatpush3.bf16.msra.mxu1 %v7103_v43  ;;  %v7513_v43 = vld [vmem:[%s10694_s2 + $0x124] ss:$20 sps:$4 sm:$0xff]  }
 0x314   :  { %6753 = vmatprep.subr.bf16.mxu1 %v7104_v54 }
 0x316   :  { %6327 = vmatmul.mubr.msk.bf16.gmra.mxu1 %vm8527_vm2, %v8616_v13 }
 0x317   :  { %2651 = vmatprep.mubr.bf16.mxu1 %v10699_v40  ;;  %6754 = vmatpush3.bf16.msra.mxu1 %v7104_v54  ;;  %v7514_v54 = vld [vmem:[%s10694_s2 + $0x120] ss:$20 sps:$4 sm:$0xff]  }
 0x318   :  { %6755 = vmatprep.subr.bf16.mxu1 %v7105_v36 }
 0x31b   :  { %6756 = vmatpush3.bf16.msra.mxu1 %v7105_v36  ;;  %v7515_v36 = vld [vmem:[%s10694_s2 + $0xfc] ss:$20 sps:$4 sm:$0xff]  }
 0x31c   :  { %6757 = vmatprep.subr.bf16.mxu1 %v7106_v32 }
 0x31e   :  { %v8827_v19 = vpop.f32.mrf.mxu1  ;;  %6330 = vmatmul.mubr.msk.bf16.gmra.mxu1 %vm8527_vm2, %v8661_v20 }
 0x31f   :  { %2659 = vmatprep.mubr.bf16.mxu1 %v10699_v40  ;;  %6758 = vmatpush3.bf16.msra.mxu1 %v7106_v32  ;;  %v10679_v55 = vrot.slane %v8827_v19, 7  ;;  %v7117_v32 = vld [vmem:[%s10704_s26 + $0x40] ss:$8 sps:$4 sm:$0xff]  }
 0x320   :  { %v2550_v9 = vpop.f32.mrf.mxu1  ;;  %6759 = vmatprep.subr.bf16.mxu1 %v7107_v44 }
 0x321   :  { %v7516_v9 = vld [vmem:[%s10694_s2 + $0xf8] ss:$20 sps:$4 sm:$0xff]  }
 0x322   :  { %v2551_v38 = vpop.f32.mrf.mxu1 }
 0x323   :  { %v2859_v29 = vrot.slane %v2551_v38, 7  ;;  %6760 = vmatpush3.bf16.msra.mxu1 %v7107_v44  ;;  %v7119_v44 = vld [vmem:[%s10704_s26 + $0x44] ss:$8 sps:$4 sm:$0xff]   ;;  %v7517_v38 = vld [vmem:[%s10694_s2 + $0xd4] ss:$20 sps:$4 sm:$0xff]  }
 0x324   :  { %v2553_v45 = vpop.f32.mrf.mxu1  ;;  %2982 = vmatprep.subr.bf16.mxu1 %v7497_v62  ;;  %v7520_v62 = vld [vmem:[%s10694_s2 + $0xa8] ss:$20 sps:$4 sm:$0xff]  }
 0x325   :  { %v8840_v11 = vsel %vm2837_vm3, %v10679_v55, %v2859_v29  ;;  %v7518_v29 = vld [vmem:[%s10694_s2 + $0xd0] ss:$20 sps:$4 sm:$0xff]   ;;  %v7519_v45 = vld [vmem:[%s10694_s2 + $0xac] ss:$20 sps:$4 sm:$0xff]  }
 0x326   :  { %6333 = vmatmul.mubr.msk.bf16.gmra.mxu1 %vm8527_vm2, %v8700_v5 }
 0x327   :  { %2667 = vmatprep.mubr.bf16.mxu1 %v10699_v40 }
 0x32e   :  { %6336 = vmatmul.mubr.msk.bf16.gmra.mxu1 %vm8527_vm2, %v8721_v46 }
 0x32f   :  { %2675 = vmatprep.mubr.bf16.mxu1 %v10699_v40 }
 0x336   :  { %6339 = vmatmul.mubr.msk.bf16.gmra.mxu1 %vm8527_vm2, %v8742_v41 }
 0x337   :  { %2683 = vmatprep.mubr.bf16.mxu1 %v10699_v40 }
 0x33e   :  { %v8860_v31 = vpop.f32.mrf.mxu1  ;;  %6342 = vmatmul.mubr.msk.bf16.gmra.mxu1 %vm8527_vm2, %v8770_v14 }
 0x33f   :  { %6761 = vmatprep.mubr.msk.bf16.mxu1 %vm8527_vm2, %v8531_v37  ;;  %v10677_v56 = vrot.slane %v8860_v31, 7  ;;  %v7498_v37 = vld [vmem:[%s10694_s2 + $0x118] ss:$20 sps:$4 sm:$0xff]  }
 0x340   :  { %v2558_v23 = vpop.f32.mrf.mxu1 }
 0x341   :  { %v7523_v23 = vld [vmem:[%s10694_s2 + $0x5c] ss:$20 sps:$4 sm:$0xff]  }
 0x342   :  { %v2559_v30 = vpop.f32.mrf.mxu1 }
 0x343   :  { %v2868_v7 = vrot.slane %v2559_v30, 7  ;;  %v7120_v30 = vld [vmem:[%s10704_s26 + $0x30] ss:$8 sps:$4 sm:$0xff]  }
 0x344   :  { %v2561_v22 = vpop.f32.mrf.mxu1 }
 0x345   :  { %v8872_v25 = vsel %vm2837_vm3, %v10677_v56, %v2868_v7  ;;  %v7122_v7 = vld [vmem:[%s10704_s26 + $0x34] ss:$8 sps:$4 sm:$0xff]   ;;  %v7524_v22 = vld [vmem:[%s10694_s2 + $0x58] ss:$20 sps:$4 sm:$0xff]  }
 0x346   :  { %6762 = vmatmul.mubr.msk.bf16.vlgmr.msra.gmra.mxu1 %vm8527_vm2, %v8574_v17  ;;  %v7113_v17 = vld [vmem:[%s10704_s26 + $0x64] ss:$8 sps:$4 sm:$0xff]  }
 0x347   :  { %6765 = vmatprep.mubr.msk.bf16.mxu1 %vm8527_vm2, %v8616_v13  ;;  %2983 = vmatpush1.bf16.msra.mxu1 %v7498_v37  ;;  %v7500_v13 = vld [vmem:[%s10694_s2 + $0xf0] ss:$20 sps:$4 sm:$0xff]   ;;  %v7525_v37 = vld [vmem:[%s10694_s2 + $0x34] ss:$20 sps:$4 sm:$0xff]  }
 0x348   :  { %2984 = vmatprep.subr.bf16.mxu1 %v7499_v48  ;;  %5277 = vmatprep.subr.bf16.mxu0 %v7113_v17 }
 0x349   :  { %5278 = vmatpush1.bf16.msra.mxu0 %v7111_v6  ;;  %v7526_v6 = vld [vmem:[%s10694_s2 + $0x30] ss:$20 sps:$4 sm:$0xff]  }
 0x34b   :  { %2985 = vmatpush1.bf16.msra.mxu1 %v7500_v13  ;;  %v7527_v13 = vld [vmem:[%s10694_s2 + $0xc] ss:$20 sps:$4 sm:$0xff]  }
 0x34c   :  { %2986 = vmatprep.subr.bf16.mxu1 %v7501_v27 }
 0x34e   :  { %6766 = vmatmul.mubr.msk.bf16.gmra.mxu1 %vm8527_vm2, %v8661_v20  ;;  %v7505_v20 = vld [vmem:[%s10694_s2 + $0x7c] ss:$20 sps:$4 sm:$0xff]  }
 0x34f   :  { %6769 = vmatprep.mubr.msk.bf16.mxu1 %vm8527_vm2, %v8700_v5  ;;  %2987 = vmatpush1.bf16.msra.mxu1 %v7502_v42  ;;  %v7506_v5 = vld [vmem:[%s10694_s2 + $0x78] ss:$20 sps:$4 sm:$0xff]  }
 0x350   :  { %2988 = vmatprep.subr.bf16.mxu1 %v7503_v51 }
 0x353   :  { %2989 = vmatpush1.bf16.msra.mxu1 %v7504_v16  ;;  %v7528_v16 = vld [vmem:[%s10694_s2 + $0x8] ss:$20 sps:$4 sm:$0xff]  }
 0x354   :  { %2990 = vmatprep.subr.bf16.mxu1 %v7505_v20 }
 0x356   :  { %6770 = vmatmul.mubr.msk.bf16.gmra.mxu1 %vm8527_vm2, %v8721_v46  ;;  %v7116_v46 = vld [vmem:[%s10704_s26 + $0x54] ss:$8 sps:$4 sm:$0xff]  }
 0x357   :  { %6773 = vmatprep.mubr.msk.bf16.mxu1 %vm8527_vm2, %v8742_v41  ;;  %2991 = vmatpush1.bf16.msra.mxu1 %v7506_v5  ;;  %v7508_v41 = vld [vmem:[%s10694_s2 + $0x50] ss:$20 sps:$4 sm:$0xff]  }
 0x358   :  { %2992 = vmatprep.subr.bf16.mxu1 %v7507_v34  ;;  %5279 = vmatprep.subr.bf16.mxu0 %v7116_v46  ;;  %v7123_v34 = vld [vmem:[%s10704_s26 + $0x20] ss:$8 sps:$4 sm:$0xff]   ;;  %v7126_v46 = vld [vmem:[%s10704_s26 + $0x10] ss:$8 sps:$4 sm:$0xff]  }
 0x359   :  { %5280 = vmatpush1.bf16.msra.mxu0 %v7114_v35  ;;  %v7125_v35 = vld [vmem:[%s10704_s26 + $0x24] ss:$8 sps:$4 sm:$0xff]  }
 0x35a   :  { %5281 = vmatprep.subr.bf16.mxu0 %v7119_v44 }
 0x35b   :  { %2993 = vmatpush1.bf16.msra.mxu1 %v7508_v41  ;;  %v7128_v41 = vld [vmem:[%s10704_s26 + $0x14] ss:$8 sps:$4 sm:$0xff]  }
 0x35c   :  { %2994 = vmatprep.subr.bf16.mxu1 %v7509_v0 }
 0x35d   :  { %5282 = vmatpush1.bf16.msra.mxu0 %v7117_v32 }
 0x35e   :  { %v8940_v49 = vpop.f32.mrf.mxu1  ;;  %6774 = vmatmul.mubr.msk.bf16.gmra.mxu1 %vm8527_vm2, %v8770_v14  ;;  %v7512_v14 = vld [vmem:[%s10694_s2] ss:$20 sps:$4 sm:$0xff]   ;;  %5283 = vmatprep.subr.bf16.mxu0 %v7122_v7  ;;  %v7137_v7 = vld [vmem:[%s10704_s26 + $0xe4] ss:$8 sps:$4 sm:$0xff]  }
 0x35f   :  { %2995 = vmatpush1.bf16.msra.mxu1 %v7510_v61  ;;  %3014 = vmatprep.mubr.bf16.mxu1 %v10699_v40  ;;  %v10675_v2 = vrot.slane %v8940_v49, 7 }
 0x360   :  { %v2566_v53 = vpop.f32.mrf.mxu1  ;;  %2996 = vmatprep.subr.bf16.mxu1 %v7511_v15 }
 0x361   :  { %5284 = vmatpush1.bf16.msra.mxu0 %v7120_v30 }
 0x362   :  { %v2567_v39 = vpop.f32.mrf.mxu1  ;;  %5285 = vmatprep.subr.bf16.mxu0 %v7125_v35 }
 0x363   :  { %v2877_v8 = vrot.slane %v2567_v39, 7  ;;  %2997 = vmatpush1.bf16.msra.mxu1 %v7512_v14 }
 0x364   :  { %v2569_v28 = vpop.f32.mrf.mxu1  ;;  %3079 = vmatprep.subr.bf16.mxu1 %v7513_v43  ;;  %v7131_v43 = vld [vmem:[%s10704_s26 + $0x4] ss:$8 sps:$4 sm:$0xff]  }
 0x365   :  { %v8962_v63 = vsel %vm2837_vm3, %v10675_v2, %v2877_v8  ;;  %5286 = vmatpush1.bf16.msra.mxu0 %v7123_v34  ;;  %v7129_v28 = vld [vmem:[%s10704_s26] ss:$8 sps:$4 sm:$0xff]  }
 0x366   :  { %6369 = vmatmul.mubr.msk.bf16.vlgmr.msra.gmra.mxu1 %vm8527_vm2, %v8554_v57  ;;  %5287 = vmatprep.subr.bf16.mxu0 %v7128_v41 }
 0x367   :  { %3080 = vmatpush1.bf16.msra.mxu1 %v7514_v54  ;;  %3022 = vmatprep.mubr.bf16.mxu1 %v10699_v40  ;;  %v7134_v54 = vld [vmem:[%s10704_s26 + $0xf4] ss:$8 sps:$4 sm:$0xff]  }
 0x368   :  { %3081 = vmatprep.subr.bf16.mxu1 %v7515_v36 }
 0x369   :  { %5288 = vmatpush1.bf16.msra.mxu0 %v7126_v46 }
 0x36a   :  { %5289 = vmatprep.subr.bf16.mxu0 %v7131_v43 }
 0x36b   :  { %3082 = vmatpush1.bf16.msra.mxu1 %v7516_v9 }
 0x36c   :  { %3083 = vmatprep.subr.bf16.mxu1 %v7517_v38 }
 0x36d   :  { %5290 = vmatpush1.bf16.msra.mxu0 %v7129_v28 }
 0x36e   :  { %6372 = vmatmul.mubr.msk.bf16.gmra.mxu1 %vm8527_vm2, %v8596_v52  ;;  %5291 = vmatprep.subr.bf16.mxu0 %v7134_v54 }
 0x36f   :  { %3030 = vmatprep.mubr.bf16.mxu1 %v10699_v40  ;;  %3084 = vmatpush1.bf16.msra.mxu1 %v7518_v29 }
 0x370   :  { %3085 = vmatprep.subr.bf16.mxu1 %v7519_v45 }
 0x373   :  { %3086 = vmatpush1.bf16.msra.mxu1 %v7520_v62 }
 0x374   :  { %3087 = vmatprep.subr.bf16.mxu1 %v7521_v26 }
 0x376   :  { %6375 = vmatmul.mubr.msk.bf16.gmra.mxu1 %vm8527_vm2, %v8641_v10 }
 0x377   :  { %3038 = vmatprep.mubr.bf16.mxu1 %v10699_v40  ;;  %3088 = vmatpush1.bf16.msra.mxu1 %v7522_v59 }
 0x378   :  { %3089 = vmatprep.subr.bf16.mxu1 %v7523_v23 }
 0x37b   :  { %3090 = vmatpush1.bf16.msra.mxu1 %v7524_v22 }
 0x37c   :  { %3091 = vmatprep.subr.bf16.mxu1 %v7525_v37 }
 0x37e   :  { %v9024_v48 = vpop.f32.mrf.mxu1  ;;  %6378 = vmatmul.mubr.msk.bf16.gmra.mxu1 %vm8527_vm2, %v8686_v60 }
 0x37f   :  { %3046 = vmatprep.mubr.bf16.mxu1 %v10699_v40  ;;  %3092 = vmatpush1.bf16.msra.mxu1 %v7526_v6  ;;  %v10673_v42 = vrot.slane %v9024_v48, 7 }
 0x380   :  { %v2574_v17 = vpop.f32.mrf.mxu1  ;;  %3093 = vmatprep.subr.bf16.mxu1 %v7527_v13 }
 0x382   :  { %v2575_v27 = vpop.f32.mrf.mxu1 }
 0x383   :  { %v2886_v51 = vrot.slane %v2575_v27, 7  ;;  %3094 = vmatpush1.bf16.msra.mxu1 %v7528_v16 }
 0x384   :  { %v2577_v20 = vpop.f32.mrf.mxu1 }
 0x385   :  { %v9043_v5 = vsel %vm2837_vm3, %v10673_v42, %v2886_v51 }
 0x386   :  { %6381 = vmatmul.mubr.msk.bf16.gmra.mxu1 %vm8527_vm2, %v8713_v24 }
 0x387   :  { %3054 = vmatprep.mubr.bf16.mxu1 %v10699_v40 }
 0x38e   :  { %6384 = vmatmul.mubr.msk.bf16.gmra.mxu1 %vm8527_vm2, %v8734_v58 }
 0x38f   :  { %3062 = vmatprep.mubr.bf16.mxu1 %v10699_v40 }
 0x396   :  { %6387 = vmatmul.mubr.msk.bf16.gmra.mxu1 %vm8527_vm2, %v8763_v1 }
 0x397   :  { %3070 = vmatprep.mubr.bf16.mxu1 %v10699_v40 }
 0x39e   :  { %v9069_v0 = vpop.f32.mrf.mxu1  ;;  %6390 = vmatmul.mubr.msk.bf16.gmra.mxu1 %vm8527_vm2, %v8802_v33 }
 0x39f   :  { %3111 = vmatprep.mubr.bf16.mxu1 %v10699_v40  ;;  %v10671_v15 = vrot.slane %v9069_v0, 7 }
 0x3a0   :  { %v2582_v61 = vpop.f32.mrf.mxu1 }
 0x3a1   :  { %v7140_v61 = vld [vmem:[%s10704_s26 + $0xd4] ss:$8 sps:$4 sm:$0xff]  }
 0x3a2   :  { %v2583_v53 = vpop.f32.mrf.mxu1 }
 0x3a3   :  { %v2895_v39 = vrot.slane %v2583_v53, 7 }
 0x3a4   :  { %v2585_v8 = vpop.f32.mrf.mxu1 }
 0x3a5   :  { %v9079_v14 = vsel %vm2837_vm3, %v10671_v15, %v2895_v39 }
 0x3a6   :  { %6393 = vmatmul.mubr.msk.bf16.vlgmr.msra.gmra.mxu1 %vm8527_vm2, %v8554_v57 }
 0x3a7   :  { %3119 = vmatprep.mubr.bf16.mxu1 %v10699_v40 }
 0x3ae   :  { %6396 = vmatmul.mubr.msk.bf16.gmra.mxu1 %vm8527_vm2, %v8596_v52  ;;  %v7132_v52 = vld [vmem:[%s10704_s26 + $0xf0] ss:$8 sps:$4 sm:$0xff]  }
 0x3af   :  { %3127 = vmatprep.mubr.bf16.mxu1 %v10699_v40  ;;  %5292 = vmatpush2.bf16.msra.mxu0 %v7132_v52 }
 0x3b0   :  { %5293 = vmatprep.subr.bf16.mxu0 %v7137_v7 }
 0x3b6   :  { %6399 = vmatmul.mubr.msk.bf16.gmra.mxu1 %vm8527_vm2, %v8641_v10 }
 0x3b7   :  { %3135 = vmatprep.mubr.bf16.mxu1 %v10699_v40 }
 0x3be   :  { %v9099_v57 = vpop.f32.mrf.mxu1  ;;  %6402 = vmatmul.mubr.msk.bf16.gmra.mxu1 %vm8527_vm2, %v8686_v60 }
 0x3bf   :  { %3143 = vmatprep.mubr.bf16.mxu1 %v10699_v40  ;;  %v10669_v32 = vrot.slane %v9099_v57, 7 }
 0x3c0   :  { %v2590_v36 = vpop.f32.mrf.mxu1 }
 0x3c2   :  { %v2591_v10 = vpop.f32.mrf.mxu1 }
 0x3c3   :  { %v2904_v44 = vrot.slane %v2591_v10, 7 }
 0x3c4   :  { %v2593_v9 = vpop.f32.mrf.mxu1 }
 0x3c5   :  { %v9115_v60 = vsel %vm2837_vm3, %v10669_v32, %v2904_v44  ;;  %v7141_v9 = vld [vmem:[%s10704_s26 + $0xc0] ss:$8 sps:$4 sm:$0xff]  }
 0x3c6   :  { %v9117_v38 = vpop.f32.mrf.mxu1  ;;  %6405 = vmatmul.mubr.msk.bf16.gmra.mxu1 %vm8527_vm2, %v8713_v24  ;;  %v7135_v24 = vld [vmem:[%s10704_s26 + $0xe0] ss:$8 sps:$4 sm:$0xff]  }
 0x3c7   :  { %3151 = vmatprep.mubr.bf16.mxu1 %v10699_v40  ;;  %v2839_v62 = vrot.slane %v9117_v38, 7  ;;  %5294 = vmatpush2.bf16.msra.mxu0 %v7135_v24 }
 0x3c8   :  { %v2631_v29 = vpop.f32.mrf.mxu1  ;;  %5295 = vmatprep.subr.bf16.mxu0 %v7140_v61 }
 0x3c9   :  { %v7143_v29 = vld [vmem:[%s10704_s26 + $0xc4] ss:$8 sps:$4 sm:$0xff]  }
 0x3ca   :  { %v2632_v45 = vpop.f32.mrf.mxu1 }
 0x3cb   :  { %v2843_v26 = vrot.slane %v2632_v45, 7 }
 0x3cc   :  { %v2634_v59 = vpop.f32.mrf.mxu1 }
 0x3cd   :  { %v9127_v23 = vsel %vm2837_vm3, %v2839_v62, %v2843_v26 }
 0x3ce   :  { %v9129_v30 = vpop.f32.mrf.mxu1  ;;  %6408 = vmatmul.mubr.msk.bf16.gmra.mxu1 %vm8527_vm2, %v8734_v58  ;;  %v10683_v38 = vrot.slane %v9127_v23, 1 }
 0x3cf   :  { %3159 = vmatprep.mubr.bf16.mxu1 %v10699_v40  ;;  %v10682_v6 = vrot.slane %v9129_v30, 7 }
 0x3d0   :  { %v2639_v22 = vpop.f32.mrf.mxu1 }
 0x3d2   :  { %v2640_v37 = vpop.f32.mrf.mxu1 }
 0x3d3   :  { %v2852_v17 = vrot.slane %v2640_v37, 7 }
 0x3d4   :  { %v2642_v13 = vpop.f32.mrf.mxu1 }
 0x3d5   :  { %v9145_v58 = vsel %vm2837_vm3, %v10682_v6, %v2852_v17 }
 0x3d6   :  { %v9147_v27 = vpop.f32.mrf.mxu1  ;;  %6411 = vmatmul.mubr.msk.bf16.gmra.mxu1 %vm8527_vm2, %v8763_v1  ;;  %v7138_v1 = vld [vmem:[%s10704_s26 + $0xd0] ss:$8 sps:$4 sm:$0xff]  }
 0x3d7   :  { %3167 = vmatprep.mubr.bf16.mxu1 %v10699_v40  ;;  %v10680_v20 = vrot.slane %v9147_v27, 7  ;;  %5296 = vmatpush2.bf16.msra.mxu0 %v7138_v1  ;;  %v7152_v1 = vld [vmem:[%s10704_s26 + $0x164] ss:$8 sps:$4 sm:$0xff]  }
 0x3d8   :  { %v2647_v51 = vpop.f32.mrf.mxu1  ;;  %5297 = vmatprep.subr.bf16.mxu0 %v7143_v29  ;;  %v7149_v29 = vld [vmem:[%s10704_s26 + $0xb4] ss:$8 sps:$4 sm:$0xff]  }
 0x3d9   :  { %v7146_v51 = vld [vmem:[%s10704_s26 + $0x174] ss:$8 sps:$4 sm:$0xff]  }
 0x3da   :  { %v2648_v16 = vpop.f32.mrf.mxu1  ;;  %5316 = vmatprep.subr.bf16.mxu1 %v7146_v51  ;;  %v7156_v51 = vld [vmem:[%s10704_s26 + $0x140] ss:$8 sps:$4 sm:$0xff]  }
 0x3db   :  { %v2861_v34 = vrot.slane %v2648_v16, 7  ;;  %5298 = vmatpush2.bf16.msra.mxu0 %v7141_v9  ;;  %v7144_v16 = vld [vmem:[%s10704_s26 + $0x170] ss:$8 sps:$4 sm:$0xff]  }
 0x3dc   :  { %v2650_v35 = vpop.f32.mrf.mxu1  ;;  %5317 = vmatpush1.bf16.msra.mxu1 %v7144_v16  ;;  %v7147_v9 = vld [vmem:[%s10704_s26 + $0xb0] ss:$8 sps:$4 sm:$0xff]   ;;  %5299 = vmatprep.subr.bf16.mxu0 %v7149_v29 }
 0x3dd   :  { %v9157_v46 = vsel %vm2837_vm3, %v10680_v20, %v2861_v34  ;;  %5318 = vmatprep.subr.bf16.mxu1 %v7152_v1  ;;  %v7161_v1 = vld [vmem:[%s10704_s26 + $0x134] ss:$8 sps:$4 sm:$0xff]  }
 0x3de   :  { %v9159_v41 = vpop.f32.mrf.mxu1  ;;  %6414 = vmatmul.mubr.msk.bf16.gmra.mxu1 %vm8527_vm2, %v8802_v33 }
 0x3df   :  { %v10678_v8 = vrot.slane %v9159_v41, 7  ;;  %5300 = vmatpush2.bf16.msra.mxu0 %v7147_v9 }
 0x3e0   :  { %v2655_v53 = vpop.f32.mrf.mxu1 }
 0x3e2   :  { %v2656_v39 = vpop.f32.mrf.mxu1 }
 0x3e3   :  { %v2870_v28 = vrot.slane %v2656_v39, 7  ;;  %v7150_v39 = vld [vmem:[%s10704_s26 + $0x160] ss:$8 sps:$4 sm:$0xff]  }
 0x3e4   :  { %v2658_v43 = vpop.f32.mrf.mxu1  ;;  %5319 = vmatpush1.bf16.msra.mxu1 %v7150_v39  ;;  %v7159_v39 = vld [vmem:[%s10704_s26 + $0x130] ss:$8 sps:$4 sm:$0xff]  }
 0x3e5   :  { %v9174_v4 = vsel %vm2837_vm3, %v10678_v8, %v2870_v28 }
 0x3e6   :  { %v9176_v33 = vpop.f32.mrf.mxu1 }
 0x3e7   :  { %v10676_v36 = vrot.slane %v9176_v33, 7 }
 0x3e8   :  { %v2663_v52 = vpop.f32.mrf.mxu1 }
 0x3ea   :  { %v2664_v54 = vpop.f32.mrf.mxu1 }
 0x3eb   :  { %v2879_v10 = vrot.slane %v2664_v54, 7  ;;  %v7155_v54 = vld [vmem:[%s10704_s26 + $0x154] ss:$8 sps:$4 sm:$0xff]  }
 0x3ec   :  { %v2666_v44 = vpop.f32.mrf.mxu1  ;;  %5320 = vmatprep.subr.bf16.mxu1 %v7155_v54 }
 0x3ed   :  { %v9188_v45 = vsel %vm2837_vm3, %v10676_v36, %v2879_v10  ;;  %v7153_v10 = vld [vmem:[%s10704_s26 + $0x150] ss:$8 sps:$4 sm:$0xff]  }
 0x3ee   :  { %v9190_v26 = vpop.f32.mrf.mxu1  ;;  %5321 = vmatpush1.bf16.msra.mxu1 %v7153_v10 }
 0x3ef   :  { %v10674_v7 = vrot.slane %v9190_v26, 7 }
 0x3f0   :  { %v2671_v59 = vpop.f32.mrf.mxu1 }
 0x3f2   :  { %v2672_v24 = vpop.f32.mrf.mxu1 }
 0x3f3   :  { %v2888_v22 = vrot.slane %v2672_v24, 7  ;;  %v7158_v24 = vld [vmem:[%s10704_s26 + $0x144] ss:$8 sps:$4 sm:$0xff]  }
 0x3f4   :  { %v2674_v37 = vpop.f32.mrf.mxu1  ;;  %5322 = vmatprep.subr.bf16.mxu1 %v7158_v24 }
 0x3f5   :  { %v9196_v17 = vsel %vm2837_vm3, %v10674_v7, %v2888_v22  ;;  %5323 = vmatpush1.bf16.msra.mxu1 %v7156_v51 }
 0x3f6   :  { %v9198_v13 = vpop.f32.mrf.mxu1  ;;  %5324 = vmatprep.subr.bf16.mxu1 %v7161_v1 }
 0x3f7   :  { %v10672_v61 = vrot.slane %v9198_v13, 7 }
 0x3f8   :  { %v2679_v34 = vpop.f32.mrf.mxu1 }
 0x3f9   :  { %5325 = vmatpush1.bf16.msra.mxu1 %v7159_v39 }
 0x3fa   :  { %v2680_v35 = vpop.f32.mrf.mxu1 }
 0x3fb   :  { %v2897_v53 = vrot.slane %v2680_v35, 7 }
 0x3fc   :  { %v2682_v28 = vpop.f32.mrf.mxu1 }
 0x3fd   :  { %v9216_v43 = vsel %vm2837_vm3, %v10672_v61, %v2897_v53 }
 0x3fe   :  { %v9218_v52 = vpop.f32.mrf.mxu1 }
 0x3ff   :  { %v10670_v22 = vrot.slane %v9218_v52, 7 }
 0x400   :  { %v2687_v44 = vpop.f32.mrf.mxu1 }
 0x401   :  { %v7167_v44 = vld [vmem:[%s10704_s26 + $0x124] ss:$8 sps:$4 sm:$0xff]  }
 0x402   :  { %v2688_v59 = vpop.f32.mrf.mxu1  ;;  %5326 = vmatprep.subr.bf16.mxu1 %v7167_v44  ;;  %v7168_v44 = vld [vmem:[%s10704_s26 + $0x110] ss:$8 sps:$4 sm:$0xff]  }
 0x403   :  { %v2906_v37 = vrot.slane %v2688_v59, 7  ;;  %v7165_v59 = vld [vmem:[%s10704_s26 + $0x120] ss:$8 sps:$4 sm:$0xff]  }
 0x404   :  { %v2690_v16 = vpop.f32.mrf.mxu1  ;;  %5327 = vmatpush1.bf16.msra.mxu1 %v7165_v59 }
 0x405   :  { %v9242_v34 = vsel %vm2837_vm3, %v10670_v22, %v2906_v37 }
 0x406   :  { %v6763_v35 = vpop.f32.mrf.mxu1 }
 0x407   :  { %v2849_v53 = vrot.slane %v6763_v35, 7 }
 0x408   :  { %v2726_v28 = vpop.f32.mrf.mxu1 }
 0x409   :  { %v2840_v54 = vrot.slane %v2726_v28, 7  ;;  %v2947_v9 = vsel %vm2837_vm3, 0.0, %v2849_v53 }
 0x40a   :  { %v6764_v10 = vpop.f32.mrf.mxu1  ;;  %v3455_v1 = vrot.slane %v2947_v9, 2 }
 0x40b   :  { %v2854_v29 = vrot.slane %v6764_v10, 7  ;;  %v2944_v37 = vsel %vm2837_vm3, 0.0, %v2840_v54  ;;  %v7170_v10 = vld [vmem:[%s10704_s26 + $0x114] ss:$8 sps:$4 sm:$0xff]  }
 0x40c   :  { %v2729_v24 = vpop.f32.mrf.mxu1  ;;  %v3450_v61 = vrot.slane %v2944_v37, 2  ;;  %5328 = vmatprep.subr.bf16.mxu1 %v7170_v10 }
 0x40d   :  { %v2855_v51 = vsel %vm2837_vm3, %v2849_v53, %v2854_v29  ;;  %v3458_v16 = vrot.slane %v2854_v29, 2  ;;  %v2845_v35 = vrot.slane %v2729_v24, 7  ;;  %5329 = vmatpush1.bf16.msra.mxu1 %v7168_v44 }
 0x40e   :  { %v3456_v39 = vrot.slane %v2855_v51, 2  ;;  %v6767_v28 = vpop.f32.mrf.mxu1  ;;  %v7164_v51 = vld [vmem:[%s10704_s26 + $0xa4] ss:$8 sps:$4 sm:$0xff]  }
 0x40f   :  { %v2846_v32 = vsel %vm2837_vm3, %v2840_v54, %v2845_v35  ;;  %v3453_v22 = vrot.slane %v2845_v35, 2  ;;  %v2867_v15 = vrot.slane %v6767_v28, 7  ;;  %v7162_v54 = vld [vmem:[%s10704_s26 + $0xa0] ss:$8 sps:$4 sm:$0xff]   ;;  %5301 = vmatprep.subr.bf16.mxu0 %v7164_v51  ;;  %v7176_v51 = vld [vmem:[%s10704_s26 + $0x1f4] ss:$8 sps:$4 sm:$0xff]  }
 0x410   :  { %v9267_v53 = vsel %vm3449_vm4, %v3455_v1, %v3456_v39  ;;  %v9270_v9 = vsel %vm3449_vm4, %v3456_v39, %v3458_v16  ;;  %v3451_v29 = vrot.slane %v2846_v32, 2  ;;  %v2742_v59 = vpop.f32.mrf.mxu1  ;;  %v7173_v32 = vld [vmem:[%s10704_s26 + $0x104] ss:$8 sps:$4 sm:$0xff]   ;;  %v7171_v28 = vld [vmem:[%s10704_s26 + $0x100] ss:$8 sps:$4 sm:$0xff]   ;;  %5302 = vmatpush2.bf16.msra.mxu0 %v7162_v54 }
 0x411   :  { %v2858_v24 = vrot.slane %v2742_v59, 7  ;;  %v2953_v1 = vsel %vm2837_vm3, 0.0, %v2867_v15  ;;  %5330 = vmatprep.subr.bf16.mxu1 %v7173_v32  ;;  %v7174_v54 = vld [vmem:[%s10704_s26 + $0x1f0] ss:$8 sps:$4 sm:$0xff]  }
 0x412   :  { %v9279_v37 = vsel %vm3449_vm4, %v3450_v61, %v3451_v29  ;;  %v9282_v35 = vsel %vm3449_vm4, %v3451_v29, %v3453_v22  ;;  %v6768_v16 = vpop.f32.mrf.mxu1  ;;  %5331 = vmatpush1.bf16.msra.mxu1 %v7171_v28  ;;  %v3465_v59 = vrot.slane %v2953_v1, 2 }
 0x413   :  { %v2872_v39 = vrot.slane %v6768_v16, 7  ;;  %v2950_v61 = vsel %vm2837_vm3, 0.0, %v2858_v24  ;;  %5332 = vmatprep.subr.bf16.mxu1 %v7176_v51 }
 0x414   :  { %v2745_v10 = vpop.f32.mrf.mxu1  ;;  %v3460_v32 = vrot.slane %v2950_v61, 2  ;;  %v7182_v61 = vld [vmem:[%s10704_s26 + $0x1e4] ss:$8 sps:$4 sm:$0xff]  }
 0x415   :  { %v2873_v22 = vsel %vm2837_vm3, %v2867_v15, %v2872_v39  ;;  %v3468_v44 = vrot.slane %v2872_v39, 2  ;;  %v2863_v29 = vrot.slane %v2745_v10, 7 }
 0x416   :  { %v3466_v42 = vrot.slane %v2873_v22, 2  ;;  %v6771_v7 = vpop.f32.mrf.mxu1  ;;  %5333 = vmatpush2.bf16.msra.mxu1 %v7174_v54 }
 0x417   :  { %v2864_v16 = vsel %vm2837_vm3, %v2858_v24, %v2863_v29  ;;  %v3463_v2 = vrot.slane %v2863_v29, 2  ;;  %v2885_v36 = vrot.slane %v6771_v7, 7  ;;  %5334 = vmatprep.subr.bf16.mxu1 %v7182_v61  ;;  %v7183_v61 = vld [vmem:[%s10704_s26 + $0x1d0] ss:$8 sps:$4 sm:$0xff]  }
 0x418   :  { %v9301_v15 = vsel %vm3449_vm4, %v3465_v59, %v3466_v42  ;;  %v9304_v1 = vsel %vm3449_vm4, %v3466_v42, %v3468_v44  ;;  %v3461_v39 = vrot.slane %v2864_v16, 2  ;;  %v2758_v28 = vpop.f32.mrf.mxu1  ;;  %v7180_v44 = vld [vmem:[%s10704_s26 + $0x1e0] ss:$8 sps:$4 sm:$0xff]  }
 0x419   :  { %v2876_v10 = vrot.slane %v2758_v28, 7  ;;  %v2959_v29 = vsel %vm2837_vm3, 0.0, %v2885_v36 }
 0x41a   :  { %v9307_v24 = vsel %vm3449_vm4, %v3460_v32, %v3461_v39  ;;  %v9310_v7 = vsel %vm3449_vm4, %v3461_v39, %v3463_v2  ;;  %v6772_v22 = vpop.f32.mrf.mxu1  ;;  %5335 = vmatpush2.bf16.msra.mxu1 %v7180_v44  ;;  %v3475_v32 = vrot.slane %v2959_v29, 2 }
 0x41b   :  { %v2890_v42 = vrot.slane %v6772_v22, 7  ;;  %v2956_v51 = vsel %vm2837_vm3, 0.0, %v2876_v10  ;;  %v7185_v22 = vld [vmem:[%s10704_s26 + $0x1d4] ss:$8 sps:$4 sm:$0xff]  }
 0x41c   :  { %v2761_v59 = vpop.f32.mrf.mxu1  ;;  %v3470_v20 = vrot.slane %v2956_v51, 2  ;;  %5336 = vmatprep.subr.bf16.mxu1 %v7185_v22 }
 0x41d   :  { %v2891_v16 = vsel %vm2837_vm3, %v2885_v36, %v2890_v42  ;;  %v3478_v2 = vrot.slane %v2890_v42, 2  ;;  %v2881_v54 = vrot.slane %v2761_v59, 7 }
 0x41e   :  { %v3476_v39 = vrot.slane %v2891_v16, 2  ;;  %v6775_v28 = vpop.f32.mrf.mxu1  ;;  %v7179_v16 = vld [vmem:[%s10704_s26 + $0x94] ss:$8 sps:$4 sm:$0xff]   ;;  %5337 = vmatpush2.bf16.msra.mxu1 %v7183_v61 }
 0x41f   :  { %v2882_v56 = vsel %vm2837_vm3, %v2876_v10, %v2881_v54  ;;  %v3473_v8 = vrot.slane %v2881_v54, 2  ;;  %v2903_v55 = vrot.slane %v6775_v28, 7  ;;  %v7177_v10 = vld [vmem:[%s10704_s26 + $0x90] ss:$8 sps:$4 sm:$0xff]   ;;  %5303 = vmatprep.subr.bf16.mxu0 %v7179_v16  ;;  %v7186_v28 = vld [vmem:[%s10704_s26 + $0x1c0] ss:$8 sps:$4 sm:$0xff]  }
 0x420   :  { %v9329_v36 = vsel %vm3449_vm4, %v3475_v32, %v3476_v39  ;;  %v9332_v29 = vsel %vm3449_vm4, %v3476_v39, %v3478_v2  ;;  %v3471_v42 = vrot.slane %v2882_v56, 2  ;;  %v2774_v44 = vpop.f32.mrf.mxu1  ;;  %v7188_v56 = vld [vmem:[%s10704_s26 + $0x1c4] ss:$8 sps:$4 sm:$0xff]   ;;  %5304 = vmatpush2.bf16.msra.mxu0 %v7177_v10  ;;  %v7191_v16 = vld [vmem:[%s10704_s26 + $0x1b4] ss:$8 sps:$4 sm:$0xff]  }
 0x421   :  { %v2894_v59 = vrot.slane %v2774_v44, 7  ;;  %v2965_v32 = vsel %vm2837_vm3, 0.0, %v2903_v55  ;;  %5338 = vmatprep.subr.bf16.mxu1 %v7188_v56 }
 0x422   :  { %v9341_v51 = vsel %vm3449_vm4, %v3470_v20, %v3471_v42  ;;  %v9344_v54 = vsel %vm3449_vm4, %v3471_v42, %v3473_v8  ;;  %v6776_v2 = vpop.f32.mrf.mxu1  ;;  %5339 = vmatpush2.bf16.msra.mxu1 %v7186_v28  ;;  %v3485_v44 = vrot.slane %v2965_v32, 2 }
 0x423   :  { %v2908_v39 = vrot.slane %v6776_v2, 7  ;;  %v2962_v20 = vsel %vm2837_vm3, 0.0, %v2894_v59  ;;  %v2943_v2 = vsel %vm2837_vm3, 0.0, %v2839_v62  ;;  %5340 = vmatprep.subr.bf16.mxu1 %v7191_v16  ;;  %v7195_v16 = vld [vmem:[%s10704_s26 + $0x1a0] ss:$8 sps:$4 sm:$0xff]  }
 0x424   :  { %v2777_v22 = vpop.f32.mrf.mxu1 }
 0x425   :  { %v2909_v8 = vsel %vm2837_vm3, %v2903_v55, %v2908_v39  ;;  %v3488_v61 = vrot.slane %v2908_v39, 2  ;;  %v2899_v42 = vrot.slane %v2777_v22, 7  ;;  %v7189_v55 = vld [vmem:[%s10704_s26 + $0x1b0] ss:$8 sps:$4 sm:$0xff]   ;;  %v3480_v39 = vrot.slane %v2962_v20, 2 }
 0x426   :  { %v3486_v50 = vrot.slane %v2909_v8, 2  ;;  %v3016_v6 = vpop.f32.mrf.mxu1  ;;  %5341 = vmatpush2.bf16.msra.mxu1 %v7189_v55 }
 0x427   :  { %v2900_v10 = vsel %vm2837_vm3, %v2894_v59, %v2899_v42  ;;  %v3483_v56 = vrot.slane %v2899_v42, 2  ;;  %v7197_v42 = vld [vmem:[%s10704_s26 + $0x1a4] ss:$8 sps:$4 sm:$0xff]  }
 0x428   :  { %v9366_v32 = vsel %vm3449_vm4, %v3485_v44, %v3486_v50  ;;  %v9369_v6 = vsel %vm3449_vm4, %v3486_v50, %v3488_v61  ;;  %v3481_v28 = vrot.slane %v2900_v10, 2  ;;  %v3017_v22 = vpop.f32.mrf.mxu1  ;;  %v2942_v50 = vsel %vm2837_vm3, 0.0, %v2838_v21  ;;  %5342 = vmatprep.subr.bf16.mxu1 %v7197_v42  ;;  %v7200_v21 = vld [vmem:[%s10704_s26 + $0x194] ss:$8 sps:$4 sm:$0xff]  }
 0x429   :  { %v3208_v62 = vrot.slane %v3017_v22, 7  ;;  %v3321_v61 = vrot.slane %v2943_v2, 1  ;;  %v7198_v22 = vld [vmem:[%s10704_s26 + $0x190] ss:$8 sps:$4 sm:$0xff]  }
 0x42a   :  { %v9373_v59 = vsel %vm3449_vm4, %v3480_v39, %v3481_v28  ;;  %v9376_v8 = vsel %vm3449_vm4, %v3481_v28, %v3483_v56  ;;  %v3019_v20 = vpop.f32.mrf.mxu1  ;;  %5343 = vmatpush2.bf16.msra.mxu1 %v7195_v16 }
 0x42b   :  { %v3280_v44 = vsel %vm2837_vm3, 0.0, %v3208_v62  ;;  %v3323_v56 = vsel %vm1867_vm0, %v3321_v61, %v10683_v38  ;;  %v10705_v20 = vrot.slane %v9129_v30, 7  ;;  %5344 = vmatprep.subr.bf16.mxu1 %v7200_v21 }
 0x42c   :  { %v3297_v10 = vadd.f32 %v3280_v44, %v2942_v50  ;;  %v3020_v55 = vpop.f32.mrf.mxu1  ;;  %v3325_v44 = vrot.slane %v9145_v58, 1 }
 0x42d   :  { %v3210_v39 = vrot.slane %v3020_v55, 7  ;;  %v2946_v42 = vsel %vm2837_vm3, 0.0, %v10705_v20  ;;  %v7203_v55 = vld [vmem:[%s10704_s26 + $0x184] ss:$8 sps:$4 sm:$0xff]  }
 0x42e   :  { %v9391_v28 = vadd.f32 %v3323_v56, %v3297_v10  ;;  %v3024_v47 = vpop.f32.mrf.mxu1  ;;  %v7194_v10 = vld [vmem:[%s10704_s26 + $0x84] ss:$8 sps:$4 sm:$0xff]   ;;  %5345 = vmatpush2.bf16.msra.mxu1 %v7198_v22  ;;  %v10706_v56 = vrot.slane %v8772_v18, 7  ;;  %v7206_v18 = vld [vmem:[%s10704_s26 + $0x274] ss:$8 sps:$4 sm:$0xff]  }
 0x42f   :  { %v3211_v2 = vsel %vm2837_vm3, %v3208_v62, %v3210_v39  ;;  %v7192_v62 = vld [vmem:[%s10704_s26 + $0x80] ss:$8 sps:$4 sm:$0xff]   ;;  %v3324_v47 = vrot.slane %v2946_v42, 1  ;;  %5305 = vmatprep.subr.bf16.mxu0 %v7194_v10  ;;  %5346 = vmatprep.subr.bf16.mxu1 %v7203_v55  ;;  %v7209_v42 = vld [vmem:[%s10704_s26 + $0x374] ss:$8 sps:$4 sm:$0xff]   ;;  %v10707_v10 = vrot.slane %v9147_v27, 7 }
 0x430   :  { %v9404_v50 = vadd.f32 %v3211_v2, %v8758_v12  ;;  %v3025_v61 = vpop.f32.mrf.mxu1  ;;  %v7201_v12 = vld [vmem:[%s10704_s26 + $0x180] ss:$8 sps:$4 sm:$0xff]   ;;  %v2945_v39 = vsel %vm2837_vm3, 0.0, %v10706_v56  ;;  %5306 = vmatpush2.bf16.msra.mxu0 %v7192_v62 }
 0x431   :  { %v3214_v16 = vrot.slane %v3025_v61, 7  ;;  %v3326_v22 = vsel %vm1867_vm0, %v3324_v47, %v3325_v44  ;;  %v2949_v55 = vsel %vm2837_vm3, 0.0, %v10707_v10  ;;  %5357 = vmatprep.subr.bf16.mxu0 %v7206_v18  ;;  %v10709_v10 = vrot.slane %v9159_v41, 7 }
 0x432   :  { %v3027_v30 = vpop.f32.mrf.mxu1  ;;  %5347 = vmatpush2.bf16.msra.mxu1 %v7201_v12 }
 0x433   :  { %v3282_v21 = vsel %vm2837_vm3, 0.0, %v3214_v16  ;;  %5398 = vmatprep.subr.bf16.mxu1 %v7209_v42 }
 0x434   :  { %v3299_v2 = vadd.f32 %v3282_v21, %v2945_v39  ;;  %v3028_v20 = vpop.f32.mrf.mxu1  ;;  %v10708_v21 = vrot.slane %v8827_v19, 7  ;;  %v2952_v19 = vsel %vm2837_vm3, 0.0, %v10709_v10  ;;  %v10711_v10 = vrot.slane %v9176_v33, 7 }
 0x435   :  { %v3216_v61 = vrot.slane %v3028_v20, 7  ;;  %v3327_v20 = vrot.slane %v2949_v55, 1 }
 0x436   :  { %v9426_v30 = vadd.f32 %v3326_v22, %v3299_v2  ;;  %v3032_v38 = vpop.f32.mrf.mxu1  ;;  %v2948_v2 = vsel %vm2837_vm3, 0.0, %v10708_v21 }
 0x437   :  { %v3217_v62 = vsel %vm2837_vm3, %v3214_v16, %v3216_v61  ;;  %v3328_v38 = vrot.slane %v9157_v46, 1  ;;  %v10721_v46 = vrot.slane %v9216_v43, 1 }
 0x438   :  { %v9439_v56 = vadd.f32 %v3217_v62, %v8789_v3  ;;  %v3033_v12 = vpop.f32.mrf.mxu1 }
 0x439   :  { %v3220_v39 = vrot.slane %v3033_v12, 7  ;;  %v3329_v3 = vsel %vm1867_vm0, %v3327_v20, %v3328_v38  ;;  %v10710_v20 = vrot.slane %v8860_v31, 7  ;;  %v2955_v31 = vsel %vm2837_vm3, 0.0, %v10711_v10 }
 0x43a   :  { %v3035_v47 = vpop.f32.mrf.mxu1  ;;  %v10713_v10 = vrot.slane %v9190_v26, 7 }
 0x43b   :  { %v3284_v16 = vsel %vm2837_vm3, 0.0, %v3220_v39  ;;  %v3331_v47 = vrot.slane %v9174_v4, 1 }
 0x43c   :  { %v3301_v27 = vadd.f32 %v3284_v16, %v2948_v2  ;;  %v3036_v22 = vpop.f32.mrf.mxu1  ;;  %v2951_v16 = vsel %vm2837_vm3, 0.0, %v10710_v20 }
 0x43d   :  { %v3222_v61 = vrot.slane %v3036_v22, 7 }
 0x43e   :  { %v9449_v18 = vadd.f32 %v3329_v3, %v3301_v27  ;;  %v3040_v42 = vpop.f32.mrf.mxu1  ;;  %v3330_v27 = vrot.slane %v2952_v19, 1 }
 0x43f   :  { %v3223_v62 = vsel %vm2837_vm3, %v3220_v39, %v3222_v61 }
 0x440   :  { %v9456_v55 = vadd.f32 %v3223_v62, %v8840_v11  ;;  %v3041_v12 = vpop.f32.mrf.mxu1  ;;  %v3332_v41 = vsel %vm1867_vm0, %v3330_v27, %v3331_v47  ;;  %v10712_v27 = vrot.slane %v8940_v49, 7  ;;  %v2958_v49 = vsel %vm2837_vm3, 0.0, %v10713_v10 }
 0x441   :  { %v3226_v21 = vrot.slane %v3041_v12, 7  ;;  %v10715_v10 = vrot.slane %v9198_v13, 7 }
 0x442   :  { %v3043_v2 = vpop.f32.mrf.mxu1 }
 0x443   :  { %v3286_v22 = vsel %vm2837_vm3, 0.0, %v3226_v21  ;;  %v3334_v2 = vrot.slane %v9188_v45, 1 }
 0x444   :  { %v3303_v39 = vadd.f32 %v3286_v22, %v2951_v16  ;;  %v3044_v3 = vpop.f32.mrf.mxu1  ;;  %v2954_v22 = vsel %vm2837_vm3, 0.0, %v10712_v27 }
 0x445   :  { %v3228_v11 = vrot.slane %v3044_v3, 7 }
 0x446   :  { %v9466_v61 = vadd.f32 %v3332_v41, %v3303_v39  ;;  %v3048_v42 = vpop.f32.mrf.mxu1  ;;  %v3333_v39 = vrot.slane %v2955_v31, 1 }
 0x447   :  { %v3229_v62 = vsel %vm2837_vm3, %v3226_v21, %v3228_v11 }
 0x448   :  { %v9473_v19 = vadd.f32 %v3229_v62, %v8872_v25  ;;  %v3049_v12 = vpop.f32.mrf.mxu1  ;;  %v3335_v33 = vsel %vm1867_vm0, %v3333_v39, %v3334_v2  ;;  %v10714_v39 = vrot.slane %v9024_v48, 7  ;;  %v2961_v48 = vsel %vm2837_vm3, 0.0, %v10715_v10 }
 0x449   :  { %v3232_v20 = vrot.slane %v3049_v12, 7  ;;  %v10717_v10 = vrot.slane %v9218_v52, 7 }
 0x44a   :  { %v3051_v16 = vpop.f32.mrf.mxu1  ;;  %v9566_v58 = vadd.f32 %v3331_v47, %v9473_v19 }
 0x44b   :  { %v3288_v3 = vsel %vm2837_vm3, 0.0, %v3232_v20  ;;  %v3337_v16 = vrot.slane %v9196_v17, 1 }
 0x44c   :  { %v3305_v21 = vadd.f32 %v3288_v3, %v2954_v22  ;;  %v3052_v41 = vpop.f32.mrf.mxu1  ;;  %v2957_v3 = vsel %vm2837_vm3, 0.0, %v10714_v39 }
 0x44d   :  { %v3234_v25 = vrot.slane %v3052_v41, 7 }
 0x44e   :  { %v9483_v11 = vadd.f32 %v3335_v33, %v3305_v21  ;;  %v3056_v42 = vpop.f32.mrf.mxu1  ;;  %v3336_v21 = vrot.slane %v2958_v49, 1 }
 0x44f   :  { %v3235_v62 = vsel %vm2837_vm3, %v3232_v20, %v3234_v25 }
 0x450   :  { %v9490_v31 = vadd.f32 %v3235_v62, %v8962_v63  ;;  %v3057_v12 = vpop.f32.mrf.mxu1  ;;  %v3338_v26 = vsel %vm1867_vm0, %v3336_v21, %v3337_v16  ;;  %v10716_v21 = vrot.slane %v9069_v0, 7  ;;  %v2964_v0 = vsel %vm2837_vm3, 0.0, %v10717_v10 }
 0x451   :  { %v3238_v27 = vrot.slane %v3057_v12, 7 }
 0x452   :  { %v3059_v22 = vpop.f32.mrf.mxu1 }
 0x453   :  { %v3290_v41 = vsel %vm2837_vm3, 0.0, %v3238_v27  ;;  %v10684_v22 = vrot.slane %v9216_v43, 1 }
 0x454   :  { %v3307_v20 = vadd.f32 %v3290_v41, %v2957_v3  ;;  %v3060_v33 = vpop.f32.mrf.mxu1  ;;  %v2960_v41 = vsel %vm2837_vm3, 0.0, %v10716_v21 }
 0x455   :  { %v3240_v63 = vrot.slane %v3060_v33, 7 }
 0x456   :  { %v9500_v25 = vadd.f32 %v3338_v26, %v3307_v20  ;;  %v3064_v42 = vpop.f32.mrf.mxu1  ;;  %v3339_v20 = vrot.slane %v2961_v48, 1 }
 0x457   :  { %v3241_v62 = vsel %vm2837_vm3, %v3238_v27, %v3240_v63 }
 0x458   :  { %v9507_v49 = vadd.f32 %v3241_v62, %v9043_v5  ;;  %v3065_v12 = vpop.f32.mrf.mxu1  ;;  %v3341_v13 = vsel %vm1867_vm0, %v3339_v20, %v10684_v22 }
 0x459   :  { %v3244_v39 = vrot.slane %v3065_v12, 7 }
 0x45a   :  { %v3067_v3 = vpop.f32.mrf.mxu1 }
 0x45b   :  { %v3292_v33 = vsel %vm2837_vm3, 0.0, %v3244_v39  ;;  %v3343_v3 = vrot.slane %v9242_v34, 1 }
 0x45c   :  { %v3309_v27 = vadd.f32 %v3292_v33, %v2960_v41  ;;  %v3068_v26 = vpop.f32.mrf.mxu1  ;;  %v10718_v33 = vrot.slane %v9099_v57, 7 }
 0x45d   :  { %v3246_v5 = vrot.slane %v3068_v26, 7 }
 0x45e   :  { %v9517_v63 = vadd.f32 %v3341_v13, %v3309_v27  ;;  %v3072_v42 = vpop.f32.mrf.mxu1  ;;  %v2963_v20 = vsel %vm2837_vm3, 0.0, %v10718_v33  ;;  %v3342_v27 = vrot.slane %v2964_v0, 1 }
 0x45f   :  { %v3247_v62 = vsel %vm2837_vm3, %v3244_v39, %v3246_v5 }
 0x460   :  { %v3310_v48 = vadd.f32 %v3247_v62, %v9079_v14  ;;  %v3073_v12 = vpop.f32.mrf.mxu1  ;;  %v3344_v52 = vsel %vm1867_vm0, %v3342_v27, %v3343_v3  ;;  %v10719_v27 = vrot.slane %v9127_v23, 1 }
 0x461   :  { %v3250_v21 = vrot.slane %v3073_v12, 7 }
 0x462   :  { %v3075_v41 = vpop.f32.mrf.mxu1 }
 0x463   :  { %v3294_v26 = vsel %vm2837_vm3, 0.0, %v3250_v21 }
 0x464   :  { %v3311_v13 = vadd.f32 %v3294_v26, %v2963_v20  ;;  %v3076_v39 = vpop.f32.mrf.mxu1  ;;  %v3362_v26 = vadd.f32 %v10719_v27, %v9404_v50  ;;  %v3364_v27 = vadd.f32 %v3325_v44, %v9439_v56  ;;  %v9571_v44 = vadd.f32 %v3334_v2, %v9490_v31 }
 0x465   :  { %v3252_v5 = vrot.slane %v3076_v39, 7 }
 0x466   :  { %v9530_v42 = vadd.f32 %v3344_v52, %v3311_v13  ;;  %v3113_v14 = vpop.f32.mrf.mxu1 }
 0x467   :  { %v3253_v62 = vsel %vm2837_vm3, %v3250_v21, %v3252_v5 }
 0x468   :  { %v3312_v34 = vadd.f32 %v3253_v62, %v9115_v60  ;;  %v3114_v10 = vpop.f32.mrf.mxu1  ;;  %v9543_v62 = vld [vmem:[%s10720_s3] ss:$0 sm:$0xff] }
 0x469   :  { %v3209_v12 = vrot.slane %v3114_v10, 7 }
 0x46a   :  { %v3116_v57 = vpop.f32.mrf.mxu1  ;;  %v9585_v19 = vadd.f32 %v3343_v3, %v3312_v34 }
 0x46b   :  { %v3281_v0 = vsel %vm2837_vm3, 0.0, %v3209_v12 }
 0x46c   :  { %v3117_v41 = vpop.f32.mrf.mxu1  ;;  %v3385_v13 = vrot.slane %v3281_v0, 1 }
 0x46d   :  { %v3212_v33 = vrot.slane %v3117_v41, 7 }
 0x46e   :  { %v3121_v22 = vpop.f32.mrf.mxu1 }
 0x46f   :  { %v3213_v20 = vsel %vm2837_vm3, %v3209_v12, %v3212_v33 }
 0x470   :  { %v3386_v39 = vrot.slane %v3213_v20, 1  ;;  %v3122_v52 = vpop.f32.mrf.mxu1 }
 0x471   :  { %v3215_v21 = vrot.slane %v3122_v52, 7 }
 0x472   :  { %v3387_v60 = vsel %vm1867_vm0, %v3385_v13, %v3386_v39  ;;  %v3426_v5 = vadd.f32 %v3386_v39, %v3362_v26  ;;  %v3124_v14 = vpop.f32.mrf.mxu1 }
 0x473   :  { %v3425_v22 = vadd.f32 %v3387_v60, %v9391_v28  ;;  %v3283_v50 = vsel %vm2837_vm3, 0.0, %v3215_v21  ;;  %v9577_v14 = vadd.f32 %v3337_v16, %v9507_v49 }
 0x474   :  { %v3507_v10 = vadd.f32 %v9282_v35, %v3426_v5  ;;  %v3125_v12 = vpop.f32.mrf.mxu1  ;;  %v3388_v28 = vrot.slane %v3283_v50, 1 }
 0x475   :  { %v3506_v23 = vadd.f32 %v9279_v37, %v3425_v22  ;;  %v3218_v57 = vrot.slane %v3125_v12, 7 }
 0x476   :  { %v3529_v41 = vadd.f32 %v9543_v62, %v3507_v10  ;;  %v3129_v0 = vpop.f32.mrf.mxu1 }
 0x477   :  { %v3528_v33 = vadd.f32 %v9543_v62, %v3506_v23  ;;  %v3219_v20 = vsel %vm2837_vm3, %v3215_v21, %v3218_v57  ;;  %v3366_v21 = vadd.f32 %v3328_v38, %v9456_v55  ;;  %v9581_v38 = vadd.f32 %v10721_v46, %v3310_v48 }
 0x478   :  { %v3389_v26 = vrot.slane %v3219_v20, 1  ;;  %v3130_v35 = vpop.f32.mrf.mxu1  ;;  %v9555_v13 = vmax.f32 %v3529_v41, 0.0 }
 0x479   :  { %v3221_v37 = vrot.slane %v3130_v35, 7  ;;  %v9557_v39 = vmax.f32 %v3528_v33, 0.0 }
 0x47a   :  { %v3390_v52 = vsel %vm1867_vm0, %v3388_v28, %v3389_v26  ;;  %v3428_v60 = vadd.f32 %v3389_v26, %v3364_v27  ;;  %v3132_v5 = vpop.f32.mrf.mxu1  ;;  %v3748_v49 = vrot.slane %v9555_v13, 3 }
 0x47b   :  { %v3427_v56 = vadd.f32 %v3390_v52, %v9426_v30  ;;  %v3285_v55 = vsel %vm2837_vm3, 0.0, %v3221_v37  ;;  %v3718_v30 = vrot.slane %v9555_v13, 1  ;;  %v3590_v16 = vrot.slane %v9557_v39, 1 }
 0x47c   :  { %v3509_v4 = vadd.f32 %v9270_v9, %v3428_v60  ;;  %v3133_v47 = vpop.f32.mrf.mxu1  ;;  %v3620_v43 = vrot.slane %v9557_v39, 3  ;;  %v3391_v48 = vrot.slane %v3285_v55, 1  ;;  %v3605_v34 = vrot.slane %v9557_v39, 2 }
 0x47d   :  { %v3508_v45 = vadd.f32 %v9267_v53, %v3427_v56  ;;  %v3224_v2 = vrot.slane %v3133_v47, 7  ;;  %v3650_v12 = vrot.slane %v9557_v39, 5  ;;  %v3680_v23 = vrot.slane %v9557_v39, 7 }
 0x47e   :  { %v3531_v17 = vadd.f32 %v9543_v62, %v3509_v4  ;;  %v3137_v31 = vpop.f32.mrf.mxu1  ;;  %v3635_v41 = vrot.slane %v9557_v39, 4  ;;  %v3665_v0 = vrot.slane %v9557_v39, 6 }
 0x47f   :  { %v3530_v9 = vadd.f32 %v9543_v62, %v3508_v45  ;;  %v3225_v3 = vsel %vm2837_vm3, %v3221_v37, %v3224_v2 }
 0x480   :  { %v9596_v53 = vmax.f32 %v3531_v17, 0.0  ;;  %v3392_v22 = vrot.slane %v3225_v3, 1  ;;  %v3138_v10 = vpop.f32.mrf.mxu1 }
 0x481   :  { %v3546_v50 = vmax.f32 %v3530_v9, 0.0  ;;  %v3227_v57 = vrot.slane %v3138_v10, 7 }
 0x482   :  { %v3393_v33 = vsel %vm1867_vm0, %v3391_v48, %v3392_v22  ;;  %v3430_v20 = vadd.f32 %v3392_v22, %v3366_v21  ;;  %v3140_v27 = vpop.f32.mrf.mxu1  ;;  %v9605_v28 = vsel %vm3569_vm5, %v9596_v53, %v3718_v30  ;;  %v3749_v26 = vrot.slane %v9596_v53, 2 }
 0x483   :  { %v3429_v35 = vadd.f32 %v3393_v33, %v9449_v18  ;;  %v3287_v37 = vsel %vm2837_vm3, 0.0, %v3227_v57  ;;  %v3591_v52 = vsel %vm3569_vm5, %v3546_v50, %v3590_v16  ;;  %v3621_v60 = vrot.slane %v3546_v50, 2 }
 0x484   :  { %v3511_v5 = vadd.f32 %v9310_v7, %v3430_v20  ;;  %v3394_v56 = vrot.slane %v3287_v37, 1  ;;  %v3141_v46 = vpop.f32.mrf.mxu1  ;;  %v3568_v4 = vrot.slane %v3546_v50, 7  ;;  %v3606_v21 = vrot.slane %v3546_v50, 1 }
 0x485   :  { %v3510_v55 = vadd.f32 %v9307_v24, %v3429_v35  ;;  %v3230_v47 = vrot.slane %v3141_v46, 7  ;;  %v3622_v45 = vsel %vm3569_vm5, %v3621_v60, %v3620_v43  ;;  %v3651_v2 = vrot.slane %v3546_v50, 4 }
 0x486   :  { %v3533_v30 = vadd.f32 %v9543_v62, %v3511_v5  ;;  %v3145_v18 = vpop.f32.mrf.mxu1  ;;  %v3570_v17 = vsel %vm3569_vm5, %v3568_v4, %v9557_v39  ;;  %v3607_v31 = vsel %vm3569_vm5, %v3606_v21, %v3605_v34  ;;  %v3681_v16 = vrot.slane %v3546_v50, 6 }
 0x487   :  { %v3532_v7 = vadd.f32 %v9543_v62, %v3510_v55  ;;  %v3231_v9 = vsel %vm2837_vm3, %v3227_v57, %v3230_v47  ;;  %v3652_v48 = vsel %vm3569_vm5, %v3651_v2, %v3650_v12  ;;  %v3636_v24 = vrot.slane %v3546_v50, 3 }
 0x488   :  { %v9621_v3 = vmax.f32 %v3533_v30, 0.0  ;;  %v3395_v43 = vrot.slane %v3231_v9, 1  ;;  %v3146_v22 = vpop.f32.mrf.mxu1  ;;  %v3682_v10 = vsel %vm3569_vm5, %v3681_v16, %v3680_v23  ;;  %v3666_v33 = vrot.slane %v3546_v50, 5 }
 0x489   :  { %v3548_v20 = vmax.f32 %v3532_v7, 0.0  ;;  %v3233_v39 = vrot.slane %v3146_v22, 7  ;;  %v3637_v34 = vsel %vm3569_vm5, %v3636_v24, %v3635_v41  ;;  %v9626_v27 = vsel %vm3569_vm5, %v3749_v26, %v3748_v49 }
 0x48a   :  { %v3396_v57 = vsel %vm1867_vm0, %v3394_v56, %v3395_v43  ;;  %v3432_v12 = vadd.f32 %v3395_v43, %v9566_v58  ;;  %v3148_v35 = vpop.f32.mrf.mxu1  ;;  %v3667_v37 = vsel %vm3569_vm5, %v3666_v33, %v3665_v0  ;;  %v3720_v60 = vrot.slane %v9621_v3, 7 }
 0x48b   :  { %v3431_v5 = vadd.f32 %v3396_v57, %v9466_v61  ;;  %v3289_v23 = vsel %vm2837_vm3, 0.0, %v3233_v39  ;;  %v3592_v50 = vrot.slane %v3548_v20, 7  ;;  %v3623_v46 = vrot.slane %v3548_v20, 1 }
 0x48c   :  { %v3513_v41 = vadd.f32 %v9304_v1, %v3432_v12  ;;  %v3397_v4 = vrot.slane %v3289_v23, 1  ;;  %v3149_v49 = vpop.f32.mrf.mxu1  ;;  %v3571_v26 = vrot.slane %v3548_v20, 6  ;;  %v3608_v56 = vsel %vm3572_vm6, %v3548_v20, %v3607_v31 }
 0x48d   :  { %v3512_v58 = vadd.f32 %v9301_v15, %v3431_v5  ;;  %v3236_v21 = vrot.slane %v3149_v49, 7  ;;  %v3593_v0 = vsel %vm3572_vm6, %v3592_v50, %v3591_v52  ;;  %v3624_v55 = vsel %vm3572_vm6, %v3623_v46, %v3622_v45 }
 0x48e   :  { %v3535_v61 = vadd.f32 %v9543_v62, %v3513_v41  ;;  %v3153_v47 = vpop.f32.mrf.mxu1  ;;  %v3573_v2 = vsel %vm3572_vm6, %v3571_v26, %v3570_v17  ;;  %v3653_v30 = vrot.slane %v3548_v20, 3  ;;  %v3683_v18 = vrot.slane %v3548_v20, 5 }
 0x48f   :  { %v3534_v1 = vadd.f32 %v9543_v62, %v3512_v58  ;;  %v3237_v16 = vsel %vm2837_vm3, %v3233_v39, %v3236_v21  ;;  %v3638_v7 = vrot.slane %v3548_v20, 2  ;;  %v3668_v31 = vrot.slane %v3548_v20, 4 }
 0x490   :  { %v9643_v9 = vmax.f32 %v3535_v61, 0.0  ;;  %v3398_v15 = vrot.slane %v3237_v16, 1  ;;  %v3154_v24 = vpop.f32.mrf.mxu1  ;;  %v3654_v52 = vsel %vm3572_vm6, %v3653_v30, %v3652_v48  ;;  %v3684_v45 = vsel %vm3572_vm6, %v3683_v18, %v3682_v10 }
 0x491   :  { %v3550_v43 = vmax.f32 %v3534_v1, 0.0  ;;  %v3239_v22 = vrot.slane %v3154_v24, 7  ;;  %v3639_v17 = vsel %vm3572_vm6, %v3638_v7, %v3637_v34  ;;  %v3669_v33 = vsel %vm3572_vm6, %v3668_v31, %v3667_v37 }
 0x492   :  { %v3399_v57 = vsel %vm1867_vm0, %v3397_v4, %v3398_v15  ;;  %v3434_v39 = vadd.f32 %v3398_v15, %v9571_v44  ;;  %v3156_v12 = vpop.f32.mrf.mxu1  ;;  %v3721_v20 = vsel %vm3572_vm6, %v3720_v60, %v9605_v28  ;;  %v3722_v35 = vrot.slane %v9643_v9, 6 }
 0x493   :  { %v3433_v48 = vadd.f32 %v3399_v57, %v9483_v11  ;;  %v3291_v10 = vsel %vm2837_vm3, 0.0, %v3239_v22  ;;  %v3594_v5 = vrot.slane %v3550_v43, 6  ;;  %v3625_v23 = vsel %vm3575_vm7, %v3550_v43, %v3624_v55 }
 0x494   :  { %v3515_v34 = vadd.f32 %v9344_v54, %v3434_v39  ;;  %v3400_v37 = vrot.slane %v3291_v10, 1  ;;  %v3157_v50 = vpop.f32.mrf.mxu1  ;;  %v3574_v46 = vrot.slane %v3550_v43, 5  ;;  %v3609_v44 = vrot.slane %v3550_v43, 7 }
 0x495   :  { %v3514_v41 = vadd.f32 %v9341_v51, %v3433_v48  ;;  %v3242_v4 = vrot.slane %v3157_v50, 7  ;;  %v3595_v28 = vsel %vm3575_vm7, %v3594_v5, %v3593_v0  ;;  %v3655_v60 = vrot.slane %v3550_v43, 2 }
 0x496   :  { %v3537_v11 = vadd.f32 %v9543_v62, %v3515_v34  ;;  %v3161_v49 = vpop.f32.mrf.mxu1  ;;  %v3576_v26 = vsel %vm3575_vm7, %v3574_v46, %v3573_v2  ;;  %v3610_v58 = vsel %vm3575_vm7, %v3609_v44, %v3608_v56  ;;  %v3685_v21 = vrot.slane %v3550_v43, 4 }
 0x497   :  { %v3536_v54 = vadd.f32 %v9543_v62, %v3514_v41  ;;  %v3243_v55 = vsel %vm2837_vm3, %v3239_v22, %v3242_v4  ;;  %v3656_v61 = vsel %vm3575_vm7, %v3655_v60, %v3654_v52  ;;  %v3640_v47 = vrot.slane %v3550_v43, 1 }
 0x498   :  { %v9666_v51 = vmax.f32 %v3537_v11, 0.0  ;;  %v3401_v30 = vrot.slane %v3243_v55, 1  ;;  %v3162_v0 = vpop.f32.mrf.mxu1  ;;  %v3686_v18 = vsel %vm3575_vm7, %v3685_v21, %v3684_v45  ;;  %v3670_v1 = vrot.slane %v3550_v43, 3 }
 0x499   :  { %v3552_v16 = vmax.f32 %v3536_v54, 0.0  ;;  %v3245_v7 = vrot.slane %v3162_v0, 7  ;;  %v3641_v2 = vsel %vm3575_vm7, %v3640_v47, %v3639_v17  ;;  %v3723_v56 = vsel %vm3575_vm7, %v3722_v35, %v3721_v20 }
 0x49a   :  { %v3402_v31 = vsel %vm1867_vm0, %v3400_v37, %v3401_v30  ;;  %v3436_v15 = vadd.f32 %v3401_v30, %v9577_v14  ;;  %v3164_v24 = vpop.f32.mrf.mxu1  ;;  %v3671_v52 = vsel %vm3575_vm7, %v3670_v1, %v3669_v33  ;;  %v3724_v22 = vrot.slane %v9666_v51, 5 }
 0x49b   :  { %v3435_v57 = vadd.f32 %v3402_v31, %v9500_v25  ;;  %v3293_v45 = vsel %vm2837_vm3, 0.0, %v3245_v7  ;;  %v3596_v43 = vrot.slane %v3552_v16, 5  ;;  %v3626_v39 = vrot.slane %v3552_v16, 7 }
 0x49c   :  { %v3517_v17 = vadd.f32 %v9332_v29, %v3436_v15  ;;  %v3403_v12 = vrot.slane %v3293_v45, 1  ;;  %v3165_v20 = vpop.f32.mrf.mxu1  ;;  %v3577_v35 = vrot.slane %v3552_v16, 4  ;;  %v3611_v48 = vrot.slane %v3552_v16, 6 }
 0x49d   :  { %v3516_v14 = vadd.f32 %v9329_v36, %v3435_v57  ;;  %v3248_v10 = vrot.slane %v3165_v20, 7  ;;  %v3597_v33 = vsel %vm3578_vm8, %v3596_v43, %v3595_v28  ;;  %v3627_v5 = vsel %vm3578_vm8, %v3626_v39, %v3625_v23 }
 0x49e   :  { %v3539_v25 = vadd.f32 %v9543_v62, %v3517_v17  ;;  %v3169_v34 = vpop.f32.mrf.mxu1  ;;  %v3579_v37 = vsel %vm3578_vm8, %v3577_v35, %v3576_v26  ;;  %v3612_v50 = vsel %vm3578_vm8, %v3611_v48, %v3610_v58  ;;  %v3657_v46 = vrot.slane %v3552_v16, 1 }
 0x49f   :  { %v3538_v29 = vadd.f32 %v9543_v62, %v3516_v14  ;;  %v3249_v44 = vsel %vm2837_vm3, %v3245_v7, %v3248_v10  ;;  %v3687_v41 = vrot.slane %v3552_v16, 3  ;;  %v3642_v36 = vsel %vm3578_vm8, %v3552_v16, %v3641_v2 }
 0x4a0   :  { %v9687_v4 = vmax.f32 %v3539_v25, 0.0  ;;  %v3404_v28 = vrot.slane %v3249_v44, 1  ;;  %v3170_v60 = vpop.f32.mrf.mxu1  ;;  %v3658_v23 = vsel %vm3578_vm8, %v3657_v46, %v3656_v61  ;;  %v3672_v11 = vrot.slane %v3552_v16, 2 }
 0x4a1   :  { %v3554_v49 = vmax.f32 %v3538_v29, 0.0  ;;  %v3251_v21 = vrot.slane %v3170_v60, 7  ;;  %v3688_v26 = vsel %vm3578_vm8, %v3687_v41, %v3686_v18  ;;  %v3725_v58 = vsel %vm3578_vm8, %v3724_v22, %v3723_v56 }
 0x4a2   :  { %v3405_v54 = vsel %vm1867_vm0, %v3403_v12, %v3404_v28  ;;  %v3438_v55 = vadd.f32 %v3404_v28, %v9581_v38  ;;  %v3172_v47 = vpop.f32.mrf.mxu1  ;;  %v3673_v30 = vsel %vm3578_vm8, %v3672_v11, %v3671_v52  ;;  %v3726_v0 = vrot.slane %v9687_v4, 4 }
 0x4a3   :  { %v3437_v1 = vadd.f32 %v3405_v54, %v9517_v63  ;;  %v3295_v61 = vsel %vm2837_vm3, 0.0, %v3251_v21  ;;  %v3598_v16 = vrot.slane %v3554_v49, 4  ;;  %v3628_v7 = vrot.slane %v3554_v49, 6 }
 0x4a4   :  { %v3519_v2 = vadd.f32 %v9376_v8, %v3438_v55  ;;  %v3406_v18 = vrot.slane %v3295_v61, 1  ;;  %v3173_v31 = vpop.f32.mrf.mxu1  ;;  %v3580_v56 = vrot.slane %v3554_v49, 3  ;;  %v3613_v15 = vrot.slane %v3554_v49, 5 }
 0x4a5   :  { %v3518_v38 = vadd.f32 %v9373_v59, %v3437_v1  ;;  %v3254_v24 = vrot.slane %v3173_v31, 7  ;;  %v3599_v52 = vsel %vm3581_vm9, %v3598_v16, %v3597_v33  ;;  %v3629_v22 = vsel %vm3581_vm9, %v3628_v7, %v3627_v5 }
 0x4a6   :  { %v3541_v63 = vadd.f32 %v9543_v62, %v3519_v2  ;;  %v3582_v57 = vsel %vm3581_vm9, %v3580_v56, %v3579_v37  ;;  %v3614_v45 = vsel %vm3581_vm9, %v3613_v15, %v3612_v50  ;;  %v3659_v8 = vsel %vm3581_vm9, %v3554_v49, %v3658_v23 }
 0x4a7   :  { %v3540_v43 = vadd.f32 %v9543_v62, %v3518_v38  ;;  %v3255_v39 = vsel %vm2837_vm3, %v3251_v21, %v3254_v24  ;;  %v3689_v17 = vrot.slane %v3554_v49, 2  ;;  %v3643_v12 = vrot.slane %v3554_v49, 7 }
 0x4a8   :  { %v9708_v59 = vmax.f32 %v3541_v63, 0.0  ;;  %v3407_v20 = vrot.slane %v3255_v39, 1  ;;  %v3674_v35 = vrot.slane %v3554_v49, 1  ;;  %v3727_v48 = vsel %vm3581_vm9, %v3726_v0, %v3725_v58 }
 0x4a9   :  { %v3556_v14 = vmax.f32 %v3540_v43, 0.0  ;;  %v3690_v10 = vsel %vm3581_vm9, %v3689_v17, %v3688_v26  ;;  %v3644_v33 = vsel %vm3581_vm9, %v3643_v12, %v3642_v36  ;;  %v3751_v5 = vrot.slane %v9621_v3, 1 }
 0x4aa   :  { %v3408_v25 = vsel %vm1867_vm0, %v3406_v18, %v3407_v20  ;;  %v3440_v34 = vadd.f32 %v3407_v20, %v9585_v19  ;;  %v3675_v37 = vsel %vm3581_vm9, %v3674_v35, %v3673_v30  ;;  %v3728_v50 = vrot.slane %v9708_v59, 3  ;;  %v7204_v20 = vld [vmem:[%s10704_s26 + $0x270] ss:$8 sps:$4 sm:$0xff]  }
 0x4ab   :  { %v3439_v46 = vadd.f32 %v3408_v25, %v9530_v42  ;;  %v3600_v29 = vrot.slane %v3556_v14, 3  ;;  %v3630_v44 = vrot.slane %v3556_v14, 5  ;;  %v3583_v41 = vrot.slane %v3556_v14, 2  ;;  %v7207_v35 = vld [vmem:[%s10704_s26 + $0x370] ss:$8 sps:$4 sm:$0xff]  }
 0x4ac   :  { %v3521_v28 = vadd.f32 %v9369_v6, %v3440_v34  ;;  %v3615_v60 = vrot.slane %v3556_v14, 4  ;;  %v3660_v23 = vrot.slane %v3556_v14, 7  ;;  %v3691_v36 = vrot.slane %v3556_v14, 1 }
 0x4ad   :  { %v3520_v11 = vadd.f32 %v9366_v32, %v3439_v46  ;;  %v3601_v49 = vsel %vm3584_vm10, %v3600_v29, %v3599_v52  ;;  %v3631_v19 = vsel %vm3584_vm10, %v3630_v44, %v3629_v22  ;;  %v3585_v21 = vsel %vm3584_vm10, %v3583_v41, %v3582_v57  ;;  %v7215_v46 = vld [vmem:[%s10704_s26 + $0x364] ss:$8 sps:$4 sm:$0xff]  }
 0x4ae   :  { %v3543_v26 = vadd.f32 %v9543_v62, %v3521_v28  ;;  %v3616_v42 = vsel %vm3584_vm10, %v3615_v60, %v3614_v45  ;;  %v3661_v58 = vsel %vm3584_vm10, %v3660_v23, %v3659_v8  ;;  %v3692_v54 = vsel %vm3584_vm10, %v3691_v36, %v3690_v10  ;;  %v7210_v23 = vld [vmem:[%s10704_s26 + $0x260] ss:$8 sps:$4 sm:$0xff]  }
 0x4af   :  { %v3542_v6 = vadd.f32 %v9543_v62, %v3520_v11  ;;  %v3645_v55 = vrot.slane %v3556_v14, 6  ;;  %v3676_v47 = vsel %vm3584_vm10, %v3556_v14, %v3675_v37  ;;  %v3729_v32 = vsel %vm3584_vm10, %v3728_v50, %v3727_v48  ;;  %v7212_v50 = vld [vmem:[%s10704_s26 + $0x264] ss:$8 sps:$4 sm:$0xff]   ;;  %v7213_v36 = vld [vmem:[%s10704_s26 + $0x360] ss:$8 sps:$4 sm:$0xff]  }
 0x4b0   :  { %v9731_v30 = vmax.f32 %v3543_v26, 0.0  ;;  %v3752_v0 = vsel %vm3572_vm6, %v3751_v5, %v9626_v27  ;;  %v3754_v1 = vrot.slane %v9666_v51, 7  ;;  %v3756_v62 = vrot.slane %v9687_v4, 6  ;;  %v7221_v26 = vld [vmem:[%s10704_s26 + $0x354] ss:$8 sps:$4 sm:$0xff]  }
 0x4b1   :  { %v3558_v61 = vmax.f32 %v3542_v6, 0.0  ;;  %v3646_v16 = vsel %vm3584_vm10, %v3645_v55, %v3644_v33  ;;  %v3753_v7 = vsel %vm3575_vm7, %v9643_v9, %v3752_v0  ;;  %v3758_v31 = vrot.slane %v9708_v59, 5 }
 0x4b2   :  { %v3730_v2 = vrot.slane %v9731_v30, 2  ;;  %v3755_v18 = vsel %vm3578_vm8, %v3754_v1, %v3753_v7  ;;  %v3703_v56 = vrot.slane %v9596_v53, 7  ;;  %v3760_v25 = vrot.slane %v9731_v30, 4 }
 0x4b3   :  { %v3602_v15 = vrot.slane %v3558_v61, 2  ;;  %v3632_v27 = vrot.slane %v3558_v61, 4  ;;  %v3586_v38 = vrot.slane %v3558_v61, 1  ;;  %v3617_v24 = vrot.slane %v3558_v61, 3 }
 0x4b4   :  { %v3662_v52 = vrot.slane %v3558_v61, 6  ;;  %v3693_v22 = vsel %vm3587_vm11, %v3558_v61, %v3692_v54  ;;  %v3647_v63 = vrot.slane %v3558_v61, 5  ;;  %v3677_v57 = vrot.slane %v3558_v61, 7 }
 0x4b5   :  { %v3603_v45 = vsel %vm3587_vm11, %v3602_v15, %v3601_v49  ;;  %v3633_v8 = vsel %vm3587_vm11, %v3632_v27, %v3631_v19  ;;  %v3588_v43 = vsel %vm3587_vm11, %v3586_v38, %v3585_v21  ;;  %v3618_v39 = vsel %vm3587_vm11, %v3617_v24, %v3616_v42  ;;  %v7218_v21 = vld [vmem:[%s10704_s26 + $0x254] ss:$8 sps:$4 sm:$0xff]   ;;  %v7224_v27 = vld [vmem:[%s10704_s26 + $0x244] ss:$8 sps:$4 sm:$0xff]  }
 0x4b6   :  { %v3809_v17 = vpack.c.bf16 %v3603_v45, %v3603_v45  ;;  %v3811_v12 = vpack.c.bf16 %v3633_v8, %v3633_v8  ;;  %v3808_v48 = vpack.c.bf16 %v3588_v43, %v3588_v43  ;;  %v3810_v14 = vpack.c.bf16 %v3618_v39, %v3618_v39  ;;  %v7227_v38 = vld [vmem:[%s10704_s26 + $0x344] ss:$8 sps:$4 sm:$0xff]  }
 0x4b7   :  { %v3663_v10 = vsel %vm3587_vm11, %v3662_v52, %v3661_v58  ;;  %v9757_v33 = vsel %vm3587_vm11, %v3647_v63, %v3646_v16  ;;  %v9760_v5 = vsel %vm3587_vm11, %v3677_v57, %v3676_v47  ;;  %v3815_v37 = vpack.c.bf16 %v3693_v22, %v3693_v22 }
 0x4b8   :  { %5307 = vmatprep.mubr.bf16.mxu0 %v3809_v17  ;;  %5348 = vmatprep.mubr.bf16.mxu1 %v3811_v12  ;;  %v3813_v34 = vpack.c.bf16 %v3663_v10, %v3663_v10  ;;  %v3705_v29 = vrot.slane %v9621_v3, 6  ;;  %v9771_v44 = vsel %vm3587_vm11, %v3730_v2, %v3729_v32  ;;  %v3757_v41 = vsel %vm3581_vm9, %v3756_v62, %v3755_v18  ;;  %v7216_v62 = vld [vmem:[%s10704_s26 + $0x250] ss:$8 sps:$4 sm:$0xff]  }
 0x4b9   :  { %5308 = vmatmul.mubr.bf16.vlgmr.msra.gmra.mxu0 %v3808_v48  ;;  %5349 = vmatmul.mubr.bf16.vlgmr.msra.gmra.mxu1 %v3810_v14  ;;  %v3704_v28 = vsel %vm3569_vm5, %v3703_v56, %v9555_v13  ;;  %v3707_v60 = vrot.slane %v9643_v9, 5  ;;  %v3759_v11 = vsel %vm3584_vm10, %v3758_v31, %v3757_v41  ;;  %v3709_v19 = vrot.slane %v9666_v51, 4  ;;  %v7219_v2 = vld [vmem:[%s10704_s26 + $0x350] ss:$8 sps:$4 sm:$0xff]   ;;  %v7225_v48 = vld [vmem:[%s10704_s26 + $0x340] ss:$8 sps:$4 sm:$0xff]  }
 0x4ba   :  { %5358 = vmatpush1.bf16.msra.mxu0 %v7204_v20  ;;  %5399 = vmatpush1.bf16.msra.mxu1 %v7207_v35  ;;  %v3706_v49 = vsel %vm3572_vm6, %v3705_v29, %v3704_v28  ;;  %v9793_v42 = vsel %vm3587_vm11, %v3760_v25, %v3759_v11  ;;  %v3711_v54 = vrot.slane %v9687_v4, 3  ;;  %v3713_v6 = vrot.slane %v9708_v59, 2  ;;  %v7222_v35 = vld [vmem:[%s10704_s26 + $0x240] ss:$8 sps:$4 sm:$0xff]  }
 0x4bb   :  { %5389 = vmatprep.mubr.bf16.mxu0 %v3813_v34  ;;  %5430 = vmatprep.mubr.bf16.mxu1 %v3815_v37  ;;  %v3708_v58 = vsel %vm3575_vm7, %v3707_v60, %v3706_v49  ;;  %v3715_v47 = vrot.slane %v9731_v30, 1  ;;  %v3733_v32 = vrot.slane %v9555_v13, 2  ;;  %v3734_v0 = vrot.slane %v9596_v53, 1  ;;  %v7230_v37 = vld [vmem:[%s10704_s26 + $0x234] ss:$8 sps:$4 sm:$0xff]  }
 0x4bc   :  { %5359 = vmatprep.subr.bf16.mxu0 %v7212_v50  ;;  %5400 = vmatprep.subr.bf16.mxu1 %v7215_v46  ;;  %v3710_v55 = vsel %vm3578_vm8, %v3709_v19, %v3708_v58  ;;  %v3737_v61 = vrot.slane %v9643_v9, 7  ;;  %v3739_v16 = vrot.slane %v9666_v51, 6  ;;  %v3778_v7 = vrot.slane %v9555_v13, 5  ;;  %v7233_v50 = vld [vmem:[%s10704_s26 + $0x334] ss:$8 sps:$4 sm:$0xff]  }
 0x4bd   :  { %v3712_v1 = vsel %vm3581_vm9, %v3711_v54, %v3710_v55  ;;  %v3735_v31 = vsel %vm3569_vm5, %v3734_v0, %v3733_v32  ;;  %v3741_v56 = vrot.slane %v9687_v4, 5  ;;  %v3743_v15 = vrot.slane %v9708_v59, 4  ;;  %v7239_v32 = vld [vmem:[%s10704_s26 + $0x324] ss:$8 sps:$4 sm:$0xff]  }
 0x4be   :  { %5360 = vmatpush1.bf16.msra.mxu0 %v7210_v23  ;;  %5401 = vmatpush1.bf16.msra.mxu1 %v7213_v36  ;;  %v3714_v18 = vsel %vm3584_vm10, %v3713_v6, %v3712_v1  ;;  %v3736_v52 = vsel %vm3572_vm6, %v9621_v3, %v3735_v31  ;;  %v3779_v22 = vrot.slane %v9596_v53, 4  ;;  %v3781_v63 = vrot.slane %v9621_v3, 3  ;;  %v7234_v31 = vld [vmem:[%s10704_s26 + $0x220] ss:$8 sps:$4 sm:$0xff]  }
 0x4bf   :  { %5361 = vmatprep.subr.bf16.mxu0 %v7218_v21  ;;  %5402 = vmatprep.subr.bf16.mxu1 %v7221_v26  ;;  %v9823_v24 = vsel %vm3587_vm11, %v3715_v47, %v3714_v18  ;;  %v3738_v57 = vsel %vm3575_vm7, %v3737_v61, %v3736_v52  ;;  %v3745_v45 = vrot.slane %v9731_v30, 3  ;;  %v3783_v8 = vrot.slane %v9643_v9, 2  ;;  %v7228_v21 = vld [vmem:[%s10704_s26 + $0x230] ss:$8 sps:$4 sm:$0xff]   ;;  %v7236_v47 = vld [vmem:[%s10704_s26 + $0x224] ss:$8 sps:$4 sm:$0xff]  }
 0x4c0   :  { %v3785_v43 = vrot.slane %v9666_v51, 1  ;;  %v3740_v39 = vsel %vm3578_vm8, %v3739_v16, %v3738_v57  ;;  %v3780_v17 = vsel %vm3569_vm5, %v3779_v22, %v3778_v7  ;;  %v3788_v12 = vrot.slane %v9708_v59, 7  ;;  %v7231_v26 = vld [vmem:[%s10704_s26 + $0x330] ss:$8 sps:$4 sm:$0xff]  }
 0x4c1   :  { %v3793_v20 = vrot.slane %v9555_v13, 6  ;;  %v3742_v14 = vsel %vm3581_vm9, %v3741_v56, %v3740_v39  ;;  %v3782_v10 = vsel %vm3572_vm6, %v3781_v63, %v3780_v17  ;;  %v3794_v25 = vrot.slane %v9596_v53, 5  ;;  %v7237_v56 = vld [vmem:[%s10704_s26 + $0x320] ss:$8 sps:$4 sm:$0xff]   ;;  %v7240_v63 = vld [vmem:[%s10704_s26 + $0x210] ss:$8 sps:$4 sm:$0xff]  }
 0x4c2   :  { %5362 = vmatpush1.bf16.msra.mxu0 %v7216_v62  ;;  %5403 = vmatpush1.bf16.msra.mxu1 %v7219_v2  ;;  %v3796_v34 = vrot.slane %v9621_v3, 4  ;;  %v3744_v46 = vsel %vm3584_vm10, %v3743_v15, %v3742_v14  ;;  %v3784_v29 = vsel %vm3575_vm7, %v3783_v8, %v3782_v10  ;;  %v3790_v41 = vrot.slane %v9731_v30, 6  ;;  %v7245_v15 = vld [vmem:[%s10704_s26 + $0x314] ss:$8 sps:$4 sm:$0xff]   ;;  %v7243_v57 = vld [vmem:[%s10704_s26 + $0x310] ss:$8 sps:$4 sm:$0xff]  }
 0x4c3   :  { %5363 = vmatprep.subr.bf16.mxu0 %v7224_v27  ;;  %5404 = vmatprep.subr.bf16.mxu1 %v7227_v38  ;;  %v9857_v28 = vsel %vm3587_vm11, %v3745_v45, %v3744_v46  ;;  %v3786_v60 = vsel %vm3578_vm8, %v3785_v43, %v3784_v29  ;;  %v3795_v23 = vsel %vm3569_vm5, %v3794_v25, %v3793_v20  ;;  %v3798_v36 = vrot.slane %v9643_v9, 3  ;;  %v7246_v43 = vld [vmem:[%s10704_s26 + $0x200] ss:$8 sps:$4 sm:$0xff]   ;;  %v7254_v17 = vld [vmem:[%s10704_s26 + $0x2f4] ss:$8 sps:$4 sm:$0xff]  }
 0x4c4   :  { %v3787_v11 = vsel %vm3581_vm9, %v9687_v4, %v3786_v60  ;;  %v3797_v49 = vsel %vm3572_vm6, %v3796_v34, %v3795_v23  ;;  %v3800_v19 = vrot.slane %v9666_v51, 2  ;;  %v3802_v6 = vrot.slane %v9687_v4, 1  ;;  %v7249_v39 = vld [vmem:[%s10704_s26 + $0x300] ss:$8 sps:$4 sm:$0xff]   ;;  %v7252_v20 = vld [vmem:[%s10704_s26 + $0x2f0] ss:$8 sps:$4 sm:$0xff]  }
 0x4c5   :  { %v3789_v58 = vsel %vm3584_vm10, %v3788_v12, %v3787_v11  ;;  %v3799_v54 = vsel %vm3575_vm7, %v3798_v36, %v3797_v49  ;;  %v3805_v55 = vrot.slane %v9731_v30, 7  ;;  %v3763_v16 = vrot.slane %v9555_v13, 4  ;;  %v7257_v12 = vld [vmem:[%s10704_s26 + $0x3f4] ss:$8 sps:$4 sm:$0xff]   ;;  %v7263_v14 = vld [vmem:[%s10704_s26 + $0x3e4] ss:$8 sps:$4 sm:$0xff]  }
 0x4c6   :  { %5364 = vmatpush1.bf16.msra.mxu0 %v7222_v35  ;;  %5405 = vmatpush1.bf16.msra.mxu1 %v7225_v48  ;;  %v9883_v0 = vsel %vm3587_vm11, %v3790_v41, %v3789_v58  ;;  %v3801_v1 = vsel %vm3578_vm8, %v3800_v19, %v3799_v54  ;;  %v3764_v7 = vrot.slane %v9596_v53, 3  ;;  %v3766_v62 = vrot.slane %v9621_v3, 2  ;;  %v7255_v35 = vld [vmem:[%s10704_s26 + $0x3f0] ss:$8 sps:$4 sm:$0xff]   ;;  %v7260_v48 = vld [vmem:[%s10704_s26 + $0x2e4] ss:$8 sps:$4 sm:$0xff]  }
 0x4c7   :  { %5365 = vmatprep.subr.bf16.mxu0 %v7230_v37  ;;  %5406 = vmatprep.subr.bf16.mxu1 %v7233_v50  ;;  %v3803_v61 = vsel %vm3581_vm9, %v3802_v6, %v3801_v1  ;;  %v3768_v18 = vrot.slane %v9643_v9, 1  ;;  %v3771_v3 = vrot.slane %v9687_v4, 7  ;;  %v7242_v9 = vld [vmem:[%s10704_s26 + $0x214] ss:$8 sps:$4 sm:$0xff]   ;;  %v3773_v38 = vrot.slane %v9708_v59, 6 }
 0x4c8   :  { %v3804_v2 = vsel %vm3584_vm10, %v9708_v59, %v3803_v61  ;;  %v3765_v53 = vsel %vm3569_vm5, %v3764_v7, %v3763_v16  ;;  %v3775_v22 = vrot.slane %v9731_v30, 5  ;;  %v7248_v59 = vld [vmem:[%s10704_s26 + $0x204] ss:$8 sps:$4 sm:$0xff]   ;;  %v7258_v10 = vld [vmem:[%s10704_s26 + $0x2e0] ss:$8 sps:$4 sm:$0xff]  }
 0x4c9   :  { %v9900_v13 = vsel %vm3587_vm11, %v3805_v55, %v3804_v2  ;;  %v3767_v27 = vsel %vm3572_vm6, %v3766_v62, %v3765_v53  ;;  %v7261_v25 = vld [vmem:[%s10704_s26 + $0x3e0] ss:$8 sps:$4 sm:$0xff]   ;;  %v7266_v34 = vld [vmem:[%s10704_s26 + $0x2d4] ss:$8 sps:$4 sm:$0xff]   ;;  %v7264_v50 = vld [vmem:[%s10704_s26 + $0x2d0] ss:$8 sps:$4 sm:$0xff]  }
 0x4ca   :  { %5366 = vmatpush1.bf16.msra.mxu0 %v7228_v21  ;;  %5407 = vmatpush1.bf16.msra.mxu1 %v7231_v26  ;;  %v3769_v52 = vsel %vm3575_vm7, %v3768_v18, %v3767_v27  ;;  %v7269_v37 = vld [vmem:[%s10704_s26 + $0x3d4] ss:$8 sps:$4 sm:$0xff]   ;;  %v7267_v46 = vld [vmem:[%s10704_s26 + $0x3d0] ss:$8 sps:$4 sm:$0xff]   ;;  %v7272_v29 = vld [vmem:[%s10704_s26 + $0x2c4] ss:$8 sps:$4 sm:$0xff]  }
 0x4cb   :  { %5367 = vmatprep.subr.bf16.mxu0 %v7236_v47  ;;  %5408 = vmatprep.subr.bf16.mxu1 %v7239_v32  ;;  %v3770_v4 = vsel %vm3578_vm8, %v9666_v51, %v3769_v52  ;;  %v7251_v51 = vld [vmem:[%s10704_s26 + $0x304] ss:$8 sps:$4 sm:$0xff]   ;;  %v7270_v60 = vld [vmem:[%s10704_s26 + $0x2c0] ss:$8 sps:$4 sm:$0xff]   ;;  %v7278_v36 = vld [vmem:[%s10704_s26 + $0x2b4] ss:$8 sps:$4 sm:$0xff]  }
 0x4cc   :  { %v3772_v45 = vsel %vm3581_vm9, %v3771_v3, %v3770_v4  ;;  %v7275_v41 = vld [vmem:[%s10704_s26 + $0x3c4] ss:$8 sps:$4 sm:$0xff]   ;;  %v7273_v23 = vld [vmem:[%s10704_s26 + $0x3c0] ss:$8 sps:$4 sm:$0xff]   ;;  %v7281_v11 = vld [vmem:[%s10704_s26 + $0x3b4] ss:$8 sps:$4 sm:$0xff]   ;;  %v3817_v3 = vpack.c.bf16 %v9771_v44, %v9771_v44 }
 0x4cd   :  { %v3774_v30 = vsel %vm3584_vm10, %v3773_v38, %v3772_v45  ;;  %v7276_v49 = vld [vmem:[%s10704_s26 + $0x2b0] ss:$8 sps:$4 sm:$0xff]   ;;  %v7284_v21 = vld [vmem:[%s10704_s26 + $0x2a4] ss:$8 sps:$4 sm:$0xff]   ;;  %v7282_v58 = vld [vmem:[%s10704_s26 + $0x2a0] ss:$8 sps:$4 sm:$0xff]  }
 0x4ce   :  { %5368 = vmatpush1.bf16.msra.mxu0 %v7234_v31  ;;  %5409 = vmatpush1.bf16.msra.mxu1 %v7237_v56  ;;  %v9931_v8 = vsel %vm3587_vm11, %v3775_v22, %v3774_v30  ;;  %v7279_v19 = vld [vmem:[%s10704_s26 + $0x3b0] ss:$8 sps:$4 sm:$0xff]   ;;  %v7287_v26 = vld [vmem:[%s10704_s26 + $0x3a4] ss:$8 sps:$4 sm:$0xff]   ;;  %v7285_v54 = vld [vmem:[%s10704_s26 + $0x3a0] ss:$8 sps:$4 sm:$0xff]   ;;  %v3812_v31 = vpack.c.bf16 %v9757_v33, %v9757_v33  ;;  %v3814_v56 = vpack.c.bf16 %v9760_v5, %v9760_v5 }
 0x4cf   :  { %5369 = vmatprep.subr.bf16.mxu0 %v7242_v9  ;;  %5410 = vmatprep.subr.bf16.mxu1 %v7245_v15  ;;  %v7290_v6 = vld [vmem:[%s10704_s26 + $0x294] ss:$8 sps:$4 sm:$0xff]   ;;  %v7288_v47 = vld [vmem:[%s10704_s26 + $0x290] ss:$8 sps:$4 sm:$0xff]   ;;  %v7296_v1 = vld [vmem:[%s10704_s26 + $0x284] ss:$8 sps:$4 sm:$0xff]   ;;  %v3819_v5 = vpack.c.bf16 %v9793_v42, %v9793_v42 }
 0x4d0   :  { %v7293_v55 = vld [vmem:[%s10704_s26 + $0x394] ss:$8 sps:$4 sm:$0xff]   ;;  %v7291_v32 = vld [vmem:[%s10704_s26 + $0x390] ss:$8 sps:$4 sm:$0xff]   ;;  %v7299_v61 = vld [vmem:[%s10704_s26 + $0x384] ss:$8 sps:$4 sm:$0xff]  }
 0x4d1   :  { %v7294_v16 = vld [vmem:[%s10704_s26 + $0x280] ss:$8 sps:$4 sm:$0xff]   ;;  %v7302_v62 = vld [vmem:[%s10704_s26 + $0x474] ss:$8 sps:$4 sm:$0xff]   ;;  %v7300_v18 = vld [vmem:[%s10704_s26 + $0x470] ss:$8 sps:$4 sm:$0xff]  }
 0x4d2   :  { %5370 = vmatpush1.bf16.msra.mxu0 %v7240_v63  ;;  %5411 = vmatpush1.bf16.msra.mxu1 %v7243_v57  ;;  %v7297_v7 = vld [vmem:[%s10704_s26 + $0x380] ss:$8 sps:$4 sm:$0xff]   ;;  %v7305_v2 = vld [vmem:[%s10704_s26 + $0x574] ss:$8 sps:$4 sm:$0xff]   ;;  %v7303_v53 = vld [vmem:[%s10704_s26 + $0x570] ss:$8 sps:$4 sm:$0xff]  }
 0x4d3   :  { %5371 = vmatprep.subr.bf16.mxu0 %v7248_v59  ;;  %5412 = vmatprep.subr.bf16.mxu1 %v7251_v51  ;;  %v7308_v9 = vld [vmem:[%s10704_s26 + $0x464] ss:$8 sps:$4 sm:$0xff]   ;;  %v7306_v15 = vld [vmem:[%s10704_s26 + $0x460] ss:$8 sps:$4 sm:$0xff]   ;;  %v7314_v27 = vld [vmem:[%s10704_s26 + $0x454] ss:$8 sps:$4 sm:$0xff]  }
 0x4d4   :  { %v7311_v33 = vld [vmem:[%s10704_s26 + $0x564] ss:$8 sps:$4 sm:$0xff]   ;;  %v7309_v44 = vld [vmem:[%s10704_s26 + $0x560] ss:$8 sps:$4 sm:$0xff]   ;;  %v7317_v42 = vld [vmem:[%s10704_s26 + $0x554] ss:$8 sps:$4 sm:$0xff]  }
 0x4d5   :  { %v7312_v38 = vld [vmem:[%s10704_s26 + $0x450] ss:$8 sps:$4 sm:$0xff]   ;;  %v7320_v22 = vld [vmem:[%s10704_s26 + $0x444] ss:$8 sps:$4 sm:$0xff]   ;;  %v7318_v63 = vld [vmem:[%s10704_s26 + $0x440] ss:$8 sps:$4 sm:$0xff]  }
 0x4d6   :  { %5372 = vmatpush1.bf16.msra.mxu0 %v7246_v43  ;;  %5413 = vmatpush1.bf16.msra.mxu1 %v7249_v39  ;;  %v7315_v52 = vld [vmem:[%s10704_s26 + $0x550] ss:$8 sps:$4 sm:$0xff]   ;;  %v7323_v4 = vld [vmem:[%s10704_s26 + $0x544] ss:$8 sps:$4 sm:$0xff]   ;;  %v7321_v57 = vld [vmem:[%s10704_s26 + $0x540] ss:$8 sps:$4 sm:$0xff]  }
 0x4d7   :  { %5373 = vmatprep.subr.bf16.mxu0 %v7254_v17  ;;  %5414 = vmatprep.subr.bf16.mxu1 %v7257_v12  ;;  %v7326_v45 = vld [vmem:[%s10704_s26 + $0x434] ss:$8 sps:$4 sm:$0xff]   ;;  %v7324_v51 = vld [vmem:[%s10704_s26 + $0x430] ss:$8 sps:$4 sm:$0xff]   ;;  %v7332_v43 = vld [vmem:[%s10704_s26 + $0x424] ss:$8 sps:$4 sm:$0xff]  }
 0x4d8   :  { %v7329_v59 = vld [vmem:[%s10704_s26 + $0x534] ss:$8 sps:$4 sm:$0xff]   ;;  %v7327_v30 = vld [vmem:[%s10704_s26 + $0x530] ss:$8 sps:$4 sm:$0xff]   ;;  %v7335_v39 = vld [vmem:[%s10704_s26 + $0x524] ss:$8 sps:$4 sm:$0xff]  }
 0x4d9   :  { %v7330_v17 = vld [vmem:[%s10704_s26 + $0x420] ss:$8 sps:$4 sm:$0xff]  }
 0x4da   :  { %5374 = vmatpush2.bf16.msra.mxu0 %v7252_v20  ;;  %5415 = vmatpush2.bf16.msra.mxu1 %v7255_v35  ;;  %v7333_v12 = vld [vmem:[%s10704_s26 + $0x520] ss:$8 sps:$4 sm:$0xff]   ;;  %v7338_v20 = vld [vmem:[%s10704_s26 + $0x414] ss:$8 sps:$4 sm:$0xff]  }
 0x4db   :  { %5375 = vmatprep.subr.bf16.mxu0 %v7260_v48  ;;  %5416 = vmatprep.subr.bf16.mxu1 %v7263_v14  ;;  %v7341_v35 = vld [vmem:[%s10704_s26 + $0x514] ss:$8 sps:$4 sm:$0xff]   ;;  %v7336_v48 = vld [vmem:[%s10704_s26 + $0x410] ss:$8 sps:$4 sm:$0xff]  }
 0x4dc   :  { %v7339_v14 = vld [vmem:[%s10704_s26 + $0x510] ss:$8 sps:$4 sm:$0xff]  }
 0x4de   :  { %5376 = vmatpush2.bf16.msra.mxu0 %v7258_v10  ;;  %5417 = vmatpush2.bf16.msra.mxu1 %v7261_v25  ;;  %v7344_v10 = vld [vmem:[%s10704_s26 + $0x404] ss:$8 sps:$4 sm:$0xff]  }
 0x4df   :  { %5377 = vmatprep.subr.bf16.mxu0 %v7266_v34  ;;  %5418 = vmatprep.subr.bf16.mxu1 %v7269_v37  ;;  %v7347_v25 = vld [vmem:[%s10704_s26 + $0x504] ss:$8 sps:$4 sm:$0xff]   ;;  %v7342_v34 = vld [vmem:[%s10704_s26 + $0x400] ss:$8 sps:$4 sm:$0xff]  }
 0x4e0   :  { %v7345_v37 = vld [vmem:[%s10704_s26 + $0x500] ss:$8 sps:$4 sm:$0xff]  }
 0x4e2   :  { %5378 = vmatpush2.bf16.msra.mxu0 %v7264_v50  ;;  %5419 = vmatpush2.bf16.msra.mxu1 %v7267_v46  ;;  %v7350_v50 = vld [vmem:[%s10704_s26 + $0x4f4] ss:$8 sps:$4 sm:$0xff]  }
 0x4e3   :  { %5379 = vmatprep.subr.bf16.mxu0 %v7272_v29  ;;  %5420 = vmatprep.subr.bf16.mxu1 %v7275_v41  ;;  %v7353_v46 = vld [vmem:[%s10704_s26 + $0x5f4] ss:$8 sps:$4 sm:$0xff]   ;;  %v7348_v29 = vld [vmem:[%s10704_s26 + $0x4f0] ss:$8 sps:$4 sm:$0xff]  }
 0x4e4   :  { %v7351_v41 = vld [vmem:[%s10704_s26 + $0x5f0] ss:$8 sps:$4 sm:$0xff]  }
 0x4e6   :  { %5380 = vmatpush2.bf16.msra.mxu0 %v7270_v60  ;;  %5421 = vmatpush2.bf16.msra.mxu1 %v7273_v23  ;;  %v7356_v60 = vld [vmem:[%s10704_s26 + $0x4e4] ss:$8 sps:$4 sm:$0xff]  }
 0x4e7   :  { %5381 = vmatprep.subr.bf16.mxu0 %v7278_v36  ;;  %5422 = vmatprep.subr.bf16.mxu1 %v7281_v11  ;;  %v7359_v23 = vld [vmem:[%s10704_s26 + $0x5e4] ss:$8 sps:$4 sm:$0xff]   ;;  %v7354_v36 = vld [vmem:[%s10704_s26 + $0x4e0] ss:$8 sps:$4 sm:$0xff]  }
 0x4e8   :  { %v7357_v11 = vld [vmem:[%s10704_s26 + $0x5e0] ss:$8 sps:$4 sm:$0xff]  }
 0x4ea   :  { %5382 = vmatpush2.bf16.msra.mxu0 %v7276_v49  ;;  %5423 = vmatpush2.bf16.msra.mxu1 %v7279_v19  ;;  %v7362_v49 = vld [vmem:[%s10704_s26 + $0x4d4] ss:$8 sps:$4 sm:$0xff]  }
 0x4eb   :  { %5383 = vmatprep.subr.bf16.mxu0 %v7284_v21  ;;  %5424 = vmatprep.subr.bf16.mxu1 %v7287_v26  ;;  %v7365_v19 = vld [vmem:[%s10704_s26 + $0x5d4] ss:$8 sps:$4 sm:$0xff]   ;;  %v7360_v21 = vld [vmem:[%s10704_s26 + $0x4d0] ss:$8 sps:$4 sm:$0xff]  }
 0x4ec   :  { %v7363_v26 = vld [vmem:[%s10704_s26 + $0x5d0] ss:$8 sps:$4 sm:$0xff]  }
 0x4ee   :  { %5384 = vmatpush2.bf16.msra.mxu0 %v7282_v58  ;;  %5425 = vmatpush2.bf16.msra.mxu1 %v7285_v54  ;;  %v7368_v58 = vld [vmem:[%s10704_s26 + $0x4c4] ss:$8 sps:$4 sm:$0xff]  }
 0x4ef   :  { %5385 = vmatprep.subr.bf16.mxu0 %v7290_v6  ;;  %5426 = vmatprep.subr.bf16.mxu1 %v7293_v55  ;;  %v7371_v54 = vld [vmem:[%s10704_s26 + $0x5c4] ss:$8 sps:$4 sm:$0xff]   ;;  %v7366_v6 = vld [vmem:[%s10704_s26 + $0x4c0] ss:$8 sps:$4 sm:$0xff]  }
 0x4f0   :  { %v7369_v55 = vld [vmem:[%s10704_s26 + $0x5c0] ss:$8 sps:$4 sm:$0xff]  }
 0x4f2   :  { %5386 = vmatpush2.bf16.msra.mxu0 %v7288_v47  ;;  %5427 = vmatpush2.bf16.msra.mxu1 %v7291_v32  ;;  %v7374_v47 = vld [vmem:[%s10704_s26 + $0x4b4] ss:$8 sps:$4 sm:$0xff]  }
 0x4f3   :  { %5387 = vmatprep.subr.bf16.mxu0 %v7296_v1  ;;  %5428 = vmatprep.subr.bf16.mxu1 %v7299_v61  ;;  %v7377_v32 = vld [vmem:[%s10704_s26 + $0x5b4] ss:$8 sps:$4 sm:$0xff]   ;;  %v7372_v1 = vld [vmem:[%s10704_s26 + $0x4b0] ss:$8 sps:$4 sm:$0xff]  }
 0x4f4   :  { %v7375_v61 = vld [vmem:[%s10704_s26 + $0x5b0] ss:$8 sps:$4 sm:$0xff]  }
 0x4f6   :  { %5388 = vmatpush2.bf16.msra.mxu0 %v7294_v16  ;;  %5429 = vmatpush2.bf16.msra.mxu1 %v7297_v7  ;;  %v7380_v16 = vld [vmem:[%s10704_s26 + $0x4a4] ss:$8 sps:$4 sm:$0xff]  }
 0x4f7   :  { %5439 = vmatprep.subr.bf16.mxu0 %v7302_v62  ;;  %5480 = vmatprep.subr.bf16.mxu1 %v7305_v2  ;;  %v7383_v7 = vld [vmem:[%s10704_s26 + $0x5a4] ss:$8 sps:$4 sm:$0xff]   ;;  %v7378_v62 = vld [vmem:[%s10704_s26 + $0x4a0] ss:$8 sps:$4 sm:$0xff]  }
 0x4f8   :  { %v7381_v2 = vld [vmem:[%s10704_s26 + $0x5a0] ss:$8 sps:$4 sm:$0xff]  }
 0x4f9   :  { %5390 = vmatmul.mubr.bf16.vlgmr.msra.gmra.mxu0 %v3812_v31  ;;  %5431 = vmatmul.mubr.bf16.vlgmr.msra.gmra.mxu1 %v3814_v56  ;;  %v7389_v31 = vld [vmem:[%s10704_s26 + $0x594] ss:$8 sps:$4 sm:$0xff]   ;;  %v7384_v56 = vld [vmem:[%s10704_s26 + $0x490] ss:$8 sps:$4 sm:$0xff]  }
 0x4fa   :  { %5440 = vmatpush1.bf16.msra.mxu0 %v7300_v18  ;;  %5471 = vmatprep.mubr.bf16.mxu0 %v3817_v3  ;;  %v7386_v18 = vld [vmem:[%s10704_s26 + $0x494] ss:$8 sps:$4 sm:$0xff]   ;;  %v7392_v3 = vld [vmem:[%s10704_s26 + $0x484] ss:$8 sps:$4 sm:$0xff]  }
 0x4fb   :  { %5481 = vmatpush1.bf16.msra.mxu1 %v7303_v53  ;;  %5512 = vmatprep.mubr.bf16.mxu1 %v3819_v5  ;;  %v7387_v53 = vld [vmem:[%s10704_s26 + $0x590] ss:$8 sps:$4 sm:$0xff]   ;;  %v7393_v5 = vld [vmem:[%s10704_s26 + $0x580] ss:$8 sps:$4 sm:$0xff]  }
 0x4fc   :  { %5441 = vmatprep.subr.bf16.mxu0 %v7308_v9  ;;  %5482 = vmatprep.subr.bf16.mxu1 %v7311_v33  ;;  %v7395_v9 = vld [vmem:[%s10704_s26 + $0x584] ss:$8 sps:$4 sm:$0xff]   ;;  %v7390_v33 = vld [vmem:[%s10704_s26 + $0x480] ss:$8 sps:$4 sm:$0xff]  }
 0x4fe   :  { %5442 = vmatpush1.bf16.msra.mxu0 %v7306_v15  ;;  %v7398_v15 = vld [vmem:[%s10704_s26 + $0x674] ss:$8 sps:$4 sm:$0xff]  }
 0x4ff   :  { %5483 = vmatpush1.bf16.msra.mxu1 %v7309_v44  ;;  %5443 = vmatprep.subr.bf16.mxu0 %v7314_v27  ;;  %v7401_v44 = vld [vmem:[%s10704_s26 + $0x774] ss:$8 sps:$4 sm:$0xff]   ;;  %v7396_v27 = vld [vmem:[%s10704_s26 + $0x670] ss:$8 sps:$4 sm:$0xff]  }
 0x500   :  { %5484 = vmatprep.subr.bf16.mxu1 %v7317_v42  ;;  %v3816_v42 = vpack.c.bf16 %v9823_v24, %v9823_v24  ;;  %v3821_v24 = vpack.c.bf16 %v9883_v0, %v9883_v0  ;;  %v7413_v0 = vld [vmem:[%s10704_s26 + $0x754] ss:$8 sps:$4 sm:$0xff]  }
 0x502   :  { %5444 = vmatpush1.bf16.msra.mxu0 %v7312_v38  ;;  %v7399_v38 = vld [vmem:[%s10704_s26 + $0x770] ss:$8 sps:$4 sm:$0xff]  }
 0x503   :  { %5485 = vmatpush1.bf16.msra.mxu1 %v7315_v52  ;;  %5445 = vmatprep.subr.bf16.mxu0 %v7320_v22  ;;  %v3818_v52 = vpack.c.bf16 %v9857_v28, %v9857_v28  ;;  %v7404_v22 = vld [vmem:[%s10704_s26 + $0x664] ss:$8 sps:$4 sm:$0xff]   ;;  %v7405_v28 = vld [vmem:[%s10704_s26 + $0x760] ss:$8 sps:$4 sm:$0xff]  }
 0x504   :  { %5486 = vmatprep.subr.bf16.mxu1 %v7323_v4  ;;  %v7407_v4 = vld [vmem:[%s10704_s26 + $0x764] ss:$8 sps:$4 sm:$0xff]  }
 0x506   :  { %5446 = vmatpush1.bf16.msra.mxu0 %v7318_v63  ;;  %v7402_v63 = vld [vmem:[%s10704_s26 + $0x660] ss:$8 sps:$4 sm:$0xff]  }
 0x507   :  { %5487 = vmatpush1.bf16.msra.mxu1 %v7321_v57  ;;  %5447 = vmatprep.subr.bf16.mxu0 %v7326_v45  ;;  %v7410_v57 = vld [vmem:[%s10704_s26 + $0x654] ss:$8 sps:$4 sm:$0xff]   ;;  %v7408_v45 = vld [vmem:[%s10704_s26 + $0x650] ss:$8 sps:$4 sm:$0xff]  }
 0x508   :  { %5488 = vmatprep.subr.bf16.mxu1 %v7329_v59  ;;  %v7411_v59 = vld [vmem:[%s10704_s26 + $0x750] ss:$8 sps:$4 sm:$0xff]  }
 0x50a   :  { %5448 = vmatpush1.bf16.msra.mxu0 %v7324_v51  ;;  %v7416_v51 = vld [vmem:[%s10704_s26 + $0x644] ss:$8 sps:$4 sm:$0xff]  }
 0x50b   :  { %5489 = vmatpush1.bf16.msra.mxu1 %v7327_v30  ;;  %5449 = vmatprep.subr.bf16.mxu0 %v7332_v43  ;;  %v5715_v30 = vld [vmem:[%s10643_s1] sm:$0xff] }
 0x50c   :  { %5490 = vmatprep.subr.bf16.mxu1 %v7335_v39  ;;  %5719 = vperm.xlu0 %6842, %v5715_v30   ;;  %v7414_v43 = vld [vmem:[%s10704_s26 + $0x640] ss:$8 sps:$4 sm:$0xff]  }
 0x50d   :  { %v7417_v39 = vld [vmem:[%s10704_s26 + $0x740] ss:$8 sps:$4 sm:$0xff]  }
 0x50e   :  { %5450 = vmatpush1.bf16.msra.mxu0 %v7330_v17  ;;  %v7422_v17 = vld [vmem:[%s10704_s26 + $0x634] ss:$8 sps:$4 sm:$0xff]  }
 0x50f   :  { %5491 = vmatpush1.bf16.msra.mxu1 %v7333_v12  ;;  %5451 = vmatprep.subr.bf16.mxu0 %v7338_v20  ;;  %v7425_v12 = vld [vmem:[%s10704_s26 + $0x734] ss:$8 sps:$4 sm:$0xff]   ;;  %v7531_v20 = vmov 1  }
 0x510   :  { %5492 = vmatprep.subr.bf16.mxu1 %v7341_v35  ;;  %6843 = vset.pattern.permute.xlu0 %v7531_v20  ;;  %v7420_v35 = vld [vmem:[%s10704_s26 + $0x630] ss:$8 sps:$4 sm:$0xff]   ;;  %v5630_v20 = vld [vmem:[%s10645_s8 + $0xc8] sm:$0xff] }
 0x511   :  { %5728 = vperm.xlu0 %6843, %v5715_v30   ;;  %v5617_v30 = vld [vmem:[%s10645_s8 + $0x60] sm:$0xff] }
 0x512   :  { %5452 = vmatpush1.bf16.msra.mxu0 %v7336_v48  ;;  %v7423_v48 = vld [vmem:[%s10704_s26 + $0x730] ss:$8 sps:$4 sm:$0xff]  }
 0x513   :  { %5493 = vmatpush1.bf16.msra.mxu1 %v7339_v14  ;;  %5453 = vmatprep.subr.bf16.mxu0 %v7344_v10  ;;  %v7428_v14 = vld [vmem:[%s10704_s26 + $0x624] ss:$8 sps:$4 sm:$0xff]  }
 0x514   :  { %5494 = vmatprep.subr.bf16.mxu1 %v7347_v25  ;;  %v7431_v10 = vld [vmem:[%s10704_s26 + $0x724] ss:$8 sps:$4 sm:$0xff]   ;;  %v7426_v25 = vld [vmem:[%s10704_s26 + $0x620] ss:$8 sps:$4 sm:$0xff]  }
 0x516   :  { %5454 = vmatpush1.bf16.msra.mxu0 %v7342_v34  ;;  %v7429_v34 = vld [vmem:[%s10704_s26 + $0x720] ss:$8 sps:$4 sm:$0xff]  }
 0x517   :  { %5495 = vmatpush1.bf16.msra.mxu1 %v7345_v37  ;;  %5455 = vmatprep.subr.bf16.mxu0 %v7350_v50  ;;  %v7434_v37 = vld [vmem:[%s10704_s26 + $0x614] ss:$8 sps:$4 sm:$0xff]  }
 0x518   :  { %5496 = vmatprep.subr.bf16.mxu1 %v7353_v46  ;;  %v7437_v50 = vld [vmem:[%s10704_s26 + $0x714] ss:$8 sps:$4 sm:$0xff]   ;;  %v7432_v46 = vld [vmem:[%s10704_s26 + $0x610] ss:$8 sps:$4 sm:$0xff]  }
 0x51a   :  { %5456 = vmatpush2.bf16.msra.mxu0 %v7348_v29  ;;  %v7435_v29 = vld [vmem:[%s10704_s26 + $0x710] ss:$8 sps:$4 sm:$0xff]  }
 0x51b   :  { %5497 = vmatpush2.bf16.msra.mxu1 %v7351_v41  ;;  %5457 = vmatprep.subr.bf16.mxu0 %v7356_v60  ;;  %v7440_v41 = vld [vmem:[%s10704_s26 + $0x604] ss:$8 sps:$4 sm:$0xff]  }
 0x51c   :  { %5498 = vmatprep.subr.bf16.mxu1 %v7359_v23  ;;  %v7443_v60 = vld [vmem:[%s10704_s26 + $0x704] ss:$8 sps:$4 sm:$0xff]   ;;  %v7438_v23 = vld [vmem:[%s10704_s26 + $0x600] ss:$8 sps:$4 sm:$0xff]  }
 0x51e   :  { %5458 = vmatpush2.bf16.msra.mxu0 %v7354_v36  ;;  %v7441_v36 = vld [vmem:[%s10704_s26 + $0x700] ss:$8 sps:$4 sm:$0xff]  }
 0x51f   :  { %5499 = vmatpush2.bf16.msra.mxu1 %v7357_v11  ;;  %5459 = vmatprep.subr.bf16.mxu0 %v7362_v49  ;;  %v7446_v11 = vld [vmem:[%s10704_s26 + $0x6f4] ss:$8 sps:$4 sm:$0xff]   ;;  %v7444_v49 = vld [vmem:[%s10704_s26 + $0x6f0] ss:$8 sps:$4 sm:$0xff]  }
 0x520   :  { %5500 = vmatprep.subr.bf16.mxu1 %v7365_v19  ;;  %v7449_v19 = vld [vmem:[%s10704_s26 + $0x6e4] ss:$8 sps:$4 sm:$0xff]  }
 0x522   :  { %5460 = vmatpush2.bf16.msra.mxu0 %v7360_v21  ;;  %v3822_v21 = vpack.c.bf16 %v9900_v13, %v9900_v13  ;;  %v7455_v13 = vld [vmem:[%s10704_s26 + $0x6c4] ss:$8 sps:$4 sm:$0xff]  }
 0x523   :  { %5501 = vmatpush2.bf16.msra.mxu1 %v7363_v26  ;;  %5461 = vmatprep.subr.bf16.mxu0 %v7368_v58  ;;  %v7447_v26 = vld [vmem:[%s10704_s26 + $0x6e0] ss:$8 sps:$4 sm:$0xff]   ;;  %v7452_v58 = vld [vmem:[%s10704_s26 + $0x6d4] ss:$8 sps:$4 sm:$0xff]  }
 0x524   :  { %5502 = vmatprep.subr.bf16.mxu1 %v7371_v54  ;;  %v7450_v54 = vld [vmem:[%s10704_s26 + $0x6d0] ss:$8 sps:$4 sm:$0xff]  }
 0x526   :  { %5462 = vmatpush2.bf16.msra.mxu0 %v7366_v6  ;;  %v7453_v6 = vld [vmem:[%s10704_s26 + $0x6c0] ss:$8 sps:$4 sm:$0xff]  }
 0x527   :  { %5503 = vmatpush2.bf16.msra.mxu1 %v7369_v55  ;;  %5463 = vmatprep.subr.bf16.mxu0 %v7374_v47  ;;  %v7458_v55 = vld [vmem:[%s10704_s26 + $0x6b4] ss:$8 sps:$4 sm:$0xff]   ;;  %v7456_v47 = vld [vmem:[%s10704_s26 + $0x6b0] ss:$8 sps:$4 sm:$0xff]  }
 0x528   :  { %5504 = vmatprep.subr.bf16.mxu1 %v7377_v32  ;;  %v7461_v32 = vld [vmem:[%s10704_s26 + $0x6a4] ss:$8 sps:$4 sm:$0xff]  }
 0x52a   :  { %5464 = vmatpush2.bf16.msra.mxu0 %v7372_v1  ;;  %v7459_v1 = vld [vmem:[%s10704_s26 + $0x6a0] ss:$8 sps:$4 sm:$0xff]  }
 0x52b   :  { %5505 = vmatpush2.bf16.msra.mxu1 %v7375_v61  ;;  %5465 = vmatprep.subr.bf16.mxu0 %v7380_v16  ;;  %v4065_v61 = vlaneseq  ;;  %v7464_v16 = vld [vmem:[%s10704_s26 + $0x694] ss:$8 sps:$4 sm:$0xff]  }
 0x52c   :  { %5506 = vmatprep.subr.bf16.mxu1 %v7383_v7  ;;  %v7462_v7 = vld [vmem:[%s10704_s26 + $0x690] ss:$8 sps:$4 sm:$0xff]  }
 0x52e   :  { %5466 = vmatpush2.bf16.msra.mxu0 %v7378_v62  ;;  %v10385_v62 = vshrl.u32 %v4065_v61, 7  ;;  %v5622_v61 = vld [vmem:[%s10645_s8 + $0x88] sm:$0xff] }
 0x52f   :  { %5507 = vmatpush2.bf16.msra.mxu1 %v7381_v2  ;;  %5467 = vmatprep.subr.bf16.mxu0 %v7386_v18  ;;  %v7467_v2 = vld [vmem:[%s10704_s26 + $0x684] ss:$8 sps:$4 sm:$0xff]   ;;  %v7465_v18 = vld [vmem:[%s10704_s26 + $0x680] ss:$8 sps:$4 sm:$0xff]  }
 0x530   :  { %5508 = vmatprep.subr.bf16.mxu1 %v7389_v31  ;;  %v4067_v31 = vsub.s32 0, %v10385_v62 }
 0x532   :  { %5468 = vmatpush2.bf16.msra.mxu0 %v7384_v56  ;;  %v4063_v56 = vld [vmem:[%s10644_s7] sm:$0x3] }
 0x533   :  { %5509 = vmatpush2.bf16.msra.mxu1 %v7387_v53  ;;  %5469 = vmatprep.subr.bf16.mxu0 %v7392_v3  ;;  %v4071_v53 = vsub.s32 1, %v10385_v62  ;;  %v4068_v3 = vrot.slane %v4063_v56, %v4067_v31 }
 0x534   :  { %5510 = vmatprep.subr.bf16.mxu1 %v7395_v9  ;;  %v3820_v9 = vpack.c.bf16 %v9931_v8, %v9931_v8  ;;  %v5636_v8 = vld [vmem:[%s10645_s8 + $0xf8] sm:$0xff] }
 0x536   :  { %5470 = vmatpush2.bf16.msra.mxu0 %v7390_v33  ;;  %v4072_v33 = vrot.slane %v4063_v56, %v4071_v53 }
 0x537   :  { %5511 = vmatpush2.bf16.msra.mxu1 %v7393_v5  ;;  %5521 = vmatprep.subr.bf16.mxu0 %v7398_v15 }
 0x538   :  { %5562 = vmatprep.subr.bf16.mxu1 %v7401_v44 }
 0x539   :  { %5472 = vmatmul.mubr.bf16.vlgmr.msra.gmra.mxu0 %v3816_v42 }
 0x53a   :  { %5513 = vmatmul.mubr.bf16.vlgmr.msra.gmra.mxu1 %v3818_v52  ;;  %5522 = vmatpush1.bf16.msra.mxu0 %v7396_v27 }
 0x53b   :  { %5553 = vmatprep.mubr.bf16.mxu0 %v3821_v24  ;;  %5563 = vmatpush1.bf16.msra.mxu1 %v7399_v38 }
 0x53c   :  { %5523 = vmatprep.subr.bf16.mxu0 %v7404_v22  ;;  %5564 = vmatprep.subr.bf16.mxu1 %v7407_v4 }
 0x53d   :  { %5594 = vmatprep.mubr.bf16.mxu1 %v10699_v40  ;;  %v7419_v40 = vld [vmem:[%s10704_s26 + $0x744] ss:$8 sps:$4 sm:$0xff]  }
 0x53e   :  { %5524 = vmatpush1.bf16.msra.mxu0 %v7402_v63 }
 0x53f   :  { %5565 = vmatpush1.bf16.msra.mxu1 %v7405_v28  ;;  %5525 = vmatprep.subr.bf16.mxu0 %v7410_v57  ;;  %v5620_v57 = vld [vmem:[%s10645_s8 + $0x78] sm:$0xff] }
 0x540   :  { %5566 = vmatprep.subr.bf16.mxu1 %v7413_v0  ;;  %v5635_v0 = vld [vmem:[%s10645_s8 + $0xf0] sm:$0xff] }
 0x542   :  { %5526 = vmatpush1.bf16.msra.mxu0 %v7408_v45  ;;  %v5619_v45 = vld [vmem:[%s10645_s8 + $0x70] sm:$0xff] }
 0x543   :  { %5567 = vmatpush1.bf16.msra.mxu1 %v7411_v59  ;;  %5527 = vmatprep.subr.bf16.mxu0 %v7416_v51  ;;  %v5634_v59 = vld [vmem:[%s10645_s8 + $0xe8] sm:$0xff] }
 0x544   :  { %5568 = vmatprep.subr.bf16.mxu1 %v7419_v40  ;;  %v5618_v51 = vld [vmem:[%s10645_s8 + $0x68] sm:$0xff]  ;;  %v5633_v40 = vld [vmem:[%s10645_s8 + $0xe0] sm:$0xff] }
 0x546   :  { %5528 = vmatpush1.bf16.msra.mxu0 %v7414_v43  ;;  %v5632_v43 = vld [vmem:[%s10645_s8 + $0xd8] sm:$0xff] }
 0x547   :  { %5569 = vmatpush1.bf16.msra.mxu1 %v7417_v39  ;;  %5529 = vmatprep.subr.bf16.mxu0 %v7422_v17  ;;  %v5616_v39 = vld [vmem:[%s10645_s8 + $0x58] sm:$0xff]  ;;  %v5631_v17 = vld [vmem:[%s10645_s8 + $0xd0] sm:$0xff] }
 0x548   :  { %5570 = vmatprep.subr.bf16.mxu1 %v7425_v12  ;;  %v5615_v12 = vld [vmem:[%s10645_s8 + $0x50] sm:$0xff] }
 0x54a   :  { %5530 = vmatpush1.bf16.msra.mxu0 %v7420_v35  ;;  %v5614_v35 = vld [vmem:[%s10645_s8 + $0x48] sm:$0xff] }
 0x54b   :  { %5571 = vmatpush1.bf16.msra.mxu1 %v7423_v48  ;;  %5531 = vmatprep.subr.bf16.mxu0 %v7428_v14  ;;  %v5629_v48 = vld [vmem:[%s10645_s8 + $0xc0] sm:$0xff] }
 0x54c   :  { %5572 = vmatprep.subr.bf16.mxu1 %v7431_v10  ;;  %v5613_v14 = vld [vmem:[%s10645_s8 + $0x40] sm:$0xff]  ;;  %v5628_v10 = vld [vmem:[%s10645_s8 + $0xb8] sm:$0xff] }
 0x54e   :  { %5532 = vmatpush1.bf16.msra.mxu0 %v7426_v25  ;;  %v5612_v25 = vld [vmem:[%s10645_s8 + $0x38] sm:$0xff] }
 0x54f   :  { %5573 = vmatpush1.bf16.msra.mxu1 %v7429_v34  ;;  %5533 = vmatprep.subr.bf16.mxu0 %v7434_v37  ;;  %v5627_v34 = vld [vmem:[%s10645_s8 + $0xb0] sm:$0xff] }
 0x550   :  { %5574 = vmatprep.subr.bf16.mxu1 %v7437_v50  ;;  %v5611_v37 = vld [vmem:[%s10645_s8 + $0x30] sm:$0xff]  ;;  %v5626_v50 = vld [vmem:[%s10645_s8 + $0xa8] sm:$0xff] }
 0x552   :  { %5534 = vmatpush1.bf16.msra.mxu0 %v7432_v46  ;;  %v5610_v46 = vld [vmem:[%s10645_s8 + $0x28] sm:$0xff] }
 0x553   :  { %5575 = vmatpush1.bf16.msra.mxu1 %v7435_v29  ;;  %5535 = vmatprep.subr.bf16.mxu0 %v7440_v41 }
 0x554   :  { %5576 = vmatprep.subr.bf16.mxu1 %v7443_v60 }
 0x556   :  { %5536 = vmatpush1.bf16.msra.mxu0 %v7438_v23 }
 0x557   :  { %5577 = vmatpush1.bf16.msra.mxu1 %v7441_v36  ;;  %5537 = vmatprep.subr.bf16.mxu0 %v7446_v11 }
 0x55a   :  { %5595 = vmatmul.mubr.bf16.vlgmr.msra.gmra.mxu1 %v3822_v21  ;;  %5538 = vmatpush2.bf16.msra.mxu0 %v7444_v49 }
 0x55b   :  { %5539 = vmatprep.subr.bf16.mxu0 %v7449_v19 }
 0x55e   :  { %5540 = vmatpush2.bf16.msra.mxu0 %v7447_v26 }
 0x55f   :  { %5541 = vmatprep.subr.bf16.mxu0 %v7452_v58  ;;  %v5625_v58 = vld [vmem:[%s10645_s8 + $0xa0] sm:$0xff] }
 0x562   :  { %5542 = vmatpush2.bf16.msra.mxu0 %v7450_v54  ;;  %v5609_v54 = vld [vmem:[%s10645_s8 + $0x20] sm:$0xff] }
 0x563   :  { %5543 = vmatprep.subr.bf16.mxu0 %v7455_v13 }
 0x566   :  { %5544 = vmatpush2.bf16.msra.mxu0 %v7453_v6 }
 0x567   :  { %5545 = vmatprep.subr.bf16.mxu0 %v7458_v55  ;;  %v5624_v55 = vld [vmem:[%s10645_s8 + $0x98] sm:$0xff] }
 0x56a   :  { %5546 = vmatpush2.bf16.msra.mxu0 %v7456_v47  ;;  %v5608_v47 = vld [vmem:[%s10645_s8 + $0x18] sm:$0xff] }
 0x56b   :  { %5547 = vmatprep.subr.bf16.mxu0 %v7461_v32  ;;  %v5623_v32 = vld [vmem:[%s10645_s8 + $0x90] sm:$0xff] }
 0x56e   :  { %5548 = vmatpush2.bf16.msra.mxu0 %v7459_v1  ;;  %v5607_v1 = vld [vmem:[%s10645_s8 + $0x10] sm:$0xff] }
 0x56f   :  { %5549 = vmatprep.subr.bf16.mxu0 %v7464_v16  ;;  %v5606_v16 = vld [vmem:[%s10645_s8 + $0x8] sm:$0xff] }
 0x572   :  { %5550 = vmatpush2.bf16.msra.mxu0 %v7462_v7  ;;  %v5621_v7 = vld [vmem:[%s10645_s8 + $0x80] sm:$0xff] }
 0x573   :  { %5551 = vmatprep.subr.bf16.mxu0 %v7467_v2  ;;  %v7532_v2 = vmov 0.0  }
 0x574   :  { %6784 = vmatprep.subr.mxu1 %v7532_v2  ;;  %6792 = vmatprep.mubr.msk.f32.mxu1 %vm7533_vm12, %v7532_v2 }
 0x576   :  { %5552 = vmatpush2.bf16.msra.mxu0 %v7465_v18  ;;  %v5605_v18 = vld [vmem:[%s10645_s8] sm:$0xff] }
 0x577   :  { %6682 = vmatprep.subr.mxu0 %v5636_v8 }
 0x579   :  { %5554 = vmatmul.mubr.bf16.vlgmr.msra.gmra.mxu0 %v3820_v9  ;;  %v5309_v5 = vpop.f32.mrf.mxu0  ;;  %v5350_v15 = vpop.f32.mrf.mxu1 }
 0x57a   :  { %v5310_v44 = vadd.f32 %v5309_v5, %v4068_v3  ;;  %6683 = vmatpush3.msra.mxu0 %v5620_v57 }
 0x57b   :  { %v5311_v27 = vpop.f32.mrf.mxu0  ;;  %v5352_v42 = vpop.f32.mrf.mxu1  ;;  %6684 = vmatprep.subr.mxu0 %v5635_v0 }
 0x57c   :  { %v5351_v38 = vadd.f32 %v5350_v15, %v5310_v44  ;;  %v5312_v52 = vadd.f32 %v5311_v27, %v4072_v33  ;;  %6685 = vmatpush3.msra.mxu0 %v5619_v45 }
 0x57d   :  { %v5313_v22 = vpop.f32.mrf.mxu0  ;;  %v5354_v4 = vpop.f32.mrf.mxu1  ;;  %6686 = vmatprep.subr.mxu0 %v5634_v59 }
 0x57e   :  { %v5353_v24 = vadd.f32 %v5352_v42, %v5312_v52  ;;  %6687 = vmatpush3.msra.mxu0 %v5618_v51 }
 0x57f   :  { %v5314_v63 = vpop.f32.mrf.mxu0  ;;  %v5355_v28 = vpop.f32.mrf.mxu1  ;;  %6688 = vmatprep.subr.mxu0 %v5633_v40 }
 0x580   :  { %6689 = vmatpush3.msra.mxu0 %v5617_v30  ;;  %v5716_v28 = vld [vmem:[%s10646_s10] sm:$0x3] }
 0x581   :  { %6690 = vmatprep.subr.mxu0 %v5632_v43  ;;  %v5725_v8 = vrot.slane %v5716_v28, %v4067_v31  ;;  %v5734_v57 = vrot.slane %v5716_v28, %v4071_v53 }
 0x582   :  { %6691 = vmatpush3.msra.mxu0 %v5616_v39 }
 0x583   :  { %6692 = vmatprep.subr.mxu0 %v5631_v17 }
 0x584   :  { %6693 = vmatpush3.msra.mxu0 %v5615_v12 }
 0x585   :  { %6694 = vmatprep.subr.mxu0 %v5630_v20  ;;  %v6657_v20 = vld [vmem:[%s10647_s11] ss:$0 sm:$0xff] }
 0x586   :  { %6695 = vmatpush3.msra.mxu0 %v5614_v35 }
 0x587   :  { %6696 = vmatprep.subr.mxu0 %v5629_v48  ;;  %v5720_v63 = vpop.permute.xlu0 %5719 }
 0x588   :  { %6697 = vmatpush3.msra.mxu0 %v5613_v14  ;;  %v5726_v59 = vmul.f32 %v5725_v8, %v5720_v63 }
 0x589   :  { %6698 = vmatprep.subr.mxu0 %v5628_v10 }
 0x58a   :  { %6699 = vmatpush3.msra.mxu0 %v5612_v25  ;;  %v5747_v25 = vld [vmem:[%s10648_s12 + $0x8] sm:$0xff] }
 0x58b   :  { %6700 = vmatprep.subr.mxu0 %v5627_v34 }
 0x58c   :  { %6701 = vmatpush3.msra.mxu0 %v5611_v37  ;;  %v5729_v0 = vpop.permute.xlu0 %5728  ;;  %v5746_v37 = vld [vmem:[%s10648_s12] sm:$0xff] }
 0x58d   :  { %6702 = vmatprep.subr.mxu0 %v5626_v50  ;;  %v5735_v51 = vmul.f32 %v5734_v57, %v5729_v0  ;;  %v5831_v50 = vld [vmem:[%s10649_s14 + $0x8] sm:$0xff]  ;;  %v26_v57 = vstv %s10655_s20 }
 0x58e   :  { %6703 = vmatpush3.msra.mxu0 %v5610_v46  ;;  %v5835_v46 = vld [vmem:[%s10650_s15 + $0x18] sm:$0xff]  ;;  %27 = vst [vmem:[#allocation2] sm:$0x1] %v26_v57 }
 0x58f   :  { %6704 = vmatprep.subr.mxu0 %v5625_v58  ;;  %v5736_v17 = vadd.f32 %v5735_v51, %v5726_v59  ;;  %6785 = vmatpush3.msra.mxu1 %v5835_v46  ;;  %v6664_v51 = vld [vmem:[%s10657_s19] ss:$0 sm:$0xff] }
 0x590   :  { %6705 = vmatpush3.msra.mxu0 %v5609_v54  ;;  %6786 = vmatprep.subr.mxu1 %v7532_v2 }
 0x591   :  { %6706 = vmatprep.subr.mxu0 %v5624_v55  ;;  %v5744_v62 = vadd.f32 %v6657_v20, %v5736_v17  ;;  %v6007_v55 = vld [vmem:[%s10653_s17 + $0x78] sm:$0xff] }
 0x592   :  { %6707 = vmatpush3.msra.mxu0 %v5608_v47 }
 0x593   :  { %6708 = vmatprep.subr.mxu0 %v5623_v32  ;;  %v5745_v34 = vmax.f32 %v5744_v62, 0.0  ;;  %v6006_v32 = vld [vmem:[%s10653_s17 + $0x70] sm:$0xff] }
 0x594   :  { %6709 = vmatpush3.msra.mxu0 %v5607_v1  ;;  %v6005_v1 = vld [vmem:[%s10653_s17 + $0x68] sm:$0xff] }
 0x595   :  { %6710 = vmatprep.subr.mxu0 %v5622_v61  ;;  %v6004_v61 = vld [vmem:[%s10653_s17 + $0x60] sm:$0xff] }
 0x596   :  { %6711 = vmatpush3.msra.mxu0 %v5606_v16  ;;  %v6003_v16 = vld [vmem:[%s10653_s17 + $0x58] sm:$0xff] }
 0x597   :  { %6712 = vmatprep.subr.mxu0 %v5621_v7  ;;  %v6002_v7 = vld [vmem:[%s10653_s17 + $0x50] sm:$0xff] }
 0x598   :  { %6713 = vmatpush3.msra.mxu0 %v5605_v18  ;;  %v6001_v18 = vld [vmem:[%s10653_s17 + $0x48] sm:$0xff] }
 0x599   :  { %6777 = vmatprep.subr.mxu0 %v7532_v2 }
 0x5b9   :  { %v5391_v29 = vpop.f32.mrf.mxu0  ;;  %v5432_v41 = vpop.f32.mrf.mxu1 }
 0x5ba   :  { %v5392_v60 = vadd.f32 %v5391_v29, %v5351_v38  ;;  %v5830_v29 = vld [vmem:[%s10649_s14] sm:$0xff] }
 0x5bb   :  { %v5393_v23 = vpop.f32.mrf.mxu0  ;;  %v5434_v36 = vpop.f32.mrf.mxu1 }
 0x5bc   :  { %v5433_v11 = vadd.f32 %v5432_v41, %v5392_v60  ;;  %v5394_v49 = vadd.f32 %v5393_v23, %v5353_v24  ;;  %v5834_v41 = vld [vmem:[%s10650_s15 + $0x10] sm:$0xff]  ;;  %v5833_v60 = vld [vmem:[%s10650_s15 + $0x8] sm:$0xff]  ;;  %v5832_v23 = vld [vmem:[%s10650_s15] sm:$0xff] }
 0x5bd   :  { %v5395_v19 = vpop.f32.mrf.mxu0  ;;  %v5436_v21 = vpop.f32.mrf.mxu1  ;;  %6787 = vmatpush3.msra.mxu1 %v5834_v41 }
 0x5be   :  { %v5435_v26 = vadd.f32 %v5434_v36, %v5394_v49  ;;  %6788 = vmatprep.subr.mxu1 %v7532_v2  ;;  %v6658_v19 = vld [vmem:[%s10652_s13] ss:$0 sm:$0xff] }
 0x5bf   :  { %v5396_v13 = vpop.f32.mrf.mxu0  ;;  %v5437_v6 = vpop.f32.mrf.mxu1  ;;  %6789 = vmatpush3.msra.mxu1 %v5833_v60 }
 0x5c0   :  { %6790 = vmatprep.subr.mxu1 %v7532_v2 }
 0x5c1   :  { %6791 = vmatpush3.msra.mxu1 %v5832_v23 }
 0x5c2   :  { %6802 = vmatprep.subr.mxu1 %v7532_v2 }
 0x5f9   :  { %v5473_v56 = vpop.f32.mrf.mxu0 }
 0x5fa   :  { %v5474_v3 = vadd.f32 %v5473_v56, %v5433_v11  ;;  %v5514_v9 = vpop.f32.mrf.mxu1  ;;  %v6656_v11 = vld [vmem:[%s10651_s9] ss:$0 sm:$0xff] }
 0x5fb   :  { %v5475_v33 = vpop.f32.mrf.mxu0  ;;  %v6000_v56 = vld [vmem:[%s10653_s17 + $0x40] sm:$0xff] }
 0x5fc   :  { %v5515_v5 = vadd.f32 %v5514_v9, %v5474_v3  ;;  %v5516_v15 = vpop.f32.mrf.mxu1  ;;  %v5476_v45 = vadd.f32 %v5475_v33, %v5435_v26  ;;  %v5999_v3 = vld [vmem:[%s10653_s17 + $0x38] sm:$0xff]  ;;  %v5998_v9 = vld [vmem:[%s10653_s17 + $0x30] sm:$0xff]  ;;  %v5997_v33 = vld [vmem:[%s10653_s17 + $0x28] sm:$0xff] }
 0x5fd   :  { %v5477_v44 = vpop.f32.mrf.mxu0 }
 0x5fe   :  { %v5518_v27 = vpop.f32.mrf.mxu1  ;;  %v5517_v30 = vadd.f32 %v5516_v15, %v5476_v45  ;;  %v5995_v15 = vld [vmem:[%s10653_s17 + $0x18] sm:$0xff]  ;;  %v5994_v44 = vld [vmem:[%s10653_s17 + $0x10] sm:$0xff] }
 0x5ff   :  { %v5478_v42 = vpop.f32.mrf.mxu0  ;;  %v5993_v27 = vld [vmem:[%s10653_s17 + $0x8] sm:$0xff] }
 0x600   :  { %v5519_v38 = vpop.f32.mrf.mxu1  ;;  %v5992_v42 = vld [vmem:[%s10653_s17] sm:$0xff] }
 0x61a   :  { %v5596_v52 = vpop.f32.mrf.mxu1 }
 0x61c   :  { %v5598_v22 = vpop.f32.mrf.mxu1 }
 0x61e   :  { %v5600_v4 = vpop.f32.mrf.mxu1 }
 0x61f   :  { %v6662_v4 = vld [vmem:[%s10654_s16] ss:$0 sm:$0xff] }
 0x620   :  { %v5601_v24 = vpop.f32.mrf.mxu1 }
 0x639   :  { %v5555_v40 = vpop.f32.mrf.mxu0 }
 0x63a   :  { %v5556_v43 = vadd.f32 %v5555_v40, %v5515_v5  ;;  %v5996_v5 = vld [vmem:[%s10653_s17 + $0x20] sm:$0xff] }
 0x63b   :  { %v5557_v39 = vpop.f32.mrf.mxu0 }
 0x63c   :  { %v5558_v12 = vadd.f32 %v5557_v39, %v5517_v30  ;;  %v5597_v35 = vadd.f32 %v5596_v52, %v5556_v43  ;;  %v6665_v43 = vld [vmem:[#allocation2] ss:$0 sm:$0xff] }
 0x63d   :  { %v5559_v48 = vpop.f32.mrf.mxu0 }
 0x63e   :  { %v5599_v31 = vadd.f32 %v5598_v22, %v5558_v12  ;;  %v5603_v10 = vmax.f32 %v5597_v35, 0.0 }
 0x63f   :  { %v5560_v14 = vpop.f32.mrf.mxu0 }
 0x640   :  { %v5604_v53 = vmax.f32 %v5599_v31, 0.0 }
 0x642   :  { %5708 = vmatprep.mubr.f32.mxu0 %v5604_v53 }
 0x643   :  { %5709 = vmatmul.mubr.f32.vlgmr.msra.gmra.mxu0 %v5603_v10 }
 0x644   :  { %6778 = vmatpush3.msra.mxu0 %v5747_v25  ;;  %6781 = vmatprep.mubr.msk.f32.mxu0 %vm7533_vm12, %v7532_v2 }
 0x645   :  { %6779 = vmatprep.subr.mxu0 %v7532_v2 }
 0x646   :  { %6780 = vmatpush3.msra.mxu0 %v5746_v37 }
 0x647   :  { %6782 = vmatmul.mubr.msk.f32.vlgmr.msra.gmra.mxu0 %vm5755_vm13, %v5745_v34  ;;  %6795 = vmatprep.subr.mxu0 %v7532_v2 }
 0x648   :  { %6799 = vmatprep.mubr.msk.f32.mxu0 %vm7533_vm12, %v7532_v2  ;;  %6796 = vmatpush3.msra.mxu0 %v5831_v50 }
 0x649   :  { %6797 = vmatprep.subr.mxu0 %v7532_v2 }
 0x64a   :  { %6798 = vmatpush3.msra.mxu0 %v5830_v29 }
 0x703   :  { %v6714_v36 = vpop.f32.mrf.mxu0 }
 0x705   :  { %v6715_v49 = vpop.f32.mrf.mxu0 }
 0x706   :  { %v6716_v21 = vadd.f32 %v6715_v49, %v6714_v36 }
 0x707   :  { %v5825_v26 = vpop.f32.mrf.mxu0 }
 0x708   :  { %v5711_v58 = vadd.f32 %v6716_v21, %v6656_v11  ;;  %v5826_v54 = vadd.f32 %v6658_v19, %v5825_v26 }
 0x709   :  { %v6783_v13 = vpop.f32.mrf.mxu0 }
 0x70a   :  { %7468 = vtanh.f32 %v5711_v58  ;;  %v5829_v6 = vmax.f32 %v5826_v54, 0.0 }
 0x70c   :  { %6800 = vmatmul.mubr.msk.f32.vlgmr.msra.gmra.mxu0 %vm5755_vm13, %v5829_v6 }
 0x717   :  { %v7469_v47 = vpop.eup %7468 }
 0x718   :  { %6793 = vmatmul.mubr.msk.f32.vlgmr.msra.gmra.mxu1 %vm5836_vm14, %v7469_v47 }
 0x719   :  { %6803 = vmatpush3.msra.mxu1 %v6007_v55  ;;  %6834 = vmatprep.mubr.msk.f32.mxu1 %vm7533_vm12, %v7532_v2 }
 0x71a   :  { %6804 = vmatprep.subr.mxu1 %v7532_v2 }
 0x71b   :  { %6805 = vmatpush3.msra.mxu1 %v6006_v32 }
 0x71c   :  { %6806 = vmatprep.subr.mxu1 %v7532_v2 }
 0x71d   :  { %6807 = vmatpush3.msra.mxu1 %v6005_v1 }
 0x71e   :  { %6808 = vmatprep.subr.mxu1 %v7532_v2 }
 0x71f   :  { %6809 = vmatpush3.msra.mxu1 %v6004_v61 }
 0x720   :  { %6810 = vmatprep.subr.mxu1 %v7532_v2 }
 0x721   :  { %6811 = vmatpush3.msra.mxu1 %v6003_v16 }
 0x722   :  { %6812 = vmatprep.subr.mxu1 %v7532_v2 }
 0x723   :  { %6813 = vmatpush3.msra.mxu1 %v6002_v7 }
 0x724   :  { %6814 = vmatprep.subr.mxu1 %v7532_v2 }
 0x725   :  { %6815 = vmatpush3.msra.mxu1 %v6001_v18 }
 0x726   :  { %6816 = vmatprep.subr.mxu1 %v7532_v2 }
 0x727   :  { %6817 = vmatpush3.msra.mxu1 %v6000_v56 }
 0x728   :  { %6818 = vmatprep.subr.mxu1 %v7532_v2 }
 0x729   :  { %6819 = vmatpush3.msra.mxu1 %v5999_v3 }
 0x72a   :  { %6820 = vmatprep.subr.mxu1 %v7532_v2 }
 0x72b   :  { %6821 = vmatpush3.msra.mxu1 %v5998_v9 }
 0x72c   :  { %6822 = vmatprep.subr.mxu1 %v7532_v2 }
 0x72d   :  { %6823 = vmatpush3.msra.mxu1 %v5997_v33 }
 0x72e   :  { %6824 = vmatprep.subr.mxu1 %v7532_v2 }
 0x72f   :  { %6825 = vmatpush3.msra.mxu1 %v5996_v5 }
 0x730   :  { %6826 = vmatprep.subr.mxu1 %v7532_v2 }
 0x731   :  { %6827 = vmatpush3.msra.mxu1 %v5995_v15 }
 0x732   :  { %6828 = vmatprep.subr.mxu1 %v7532_v2 }
 0x733   :  { %6829 = vmatpush3.msra.mxu1 %v5994_v44 }
 0x734   :  { %6830 = vmatprep.subr.mxu1 %v7532_v2 }
 0x735   :  { %6831 = vmatpush3.msra.mxu1 %v5993_v27 }
 0x736   :  { %6832 = vmatprep.subr.mxu1 %v7532_v2  ;;  %v6663_v2 = vld [vmem:[%s10656_s18] ss:$0 sm:$0xff] }
 0x737   :  { %6833 = vmatpush3.msra.mxu1 %v5992_v42 }
 0x7cc   :  { %v5979_v38 = vpop.f32.mrf.mxu0 }
 0x7ce   :  { %v6801_v52 = vpop.f32.mrf.mxu0 }
 0x7d8   :  { %v5906_v22 = vpop.f32.mrf.mxu1 }
 0x7d9   :  { %v5980_v24 = vadd.f32 %v5979_v38, %v5906_v22 }
 0x7da   :  { %v6794_v63 = vpop.f32.mrf.mxu1 }
 0x7db   :  { %v5990_v28 = vadd.f32 %v6662_v4, %v5980_v24 }
 0x7dd   :  { %v5991_v8 = vmax.f32 %v5990_v28, 0.0 }
 0x7df   :  { %6835 = vmatmul.mubr.f32.vlgmr.msra.gmra.mxu1 %v5991_v8 }
 0x89f   :  { %v6081_v0 = vpop.f32.mrf.mxu1 }
 0x8a0   :  { %v6082_v45 = vadd.f32 %v6663_v2, %v6081_v0 }
 0x8a1   :  { %v6836_v59 = vpop.f32.mrf.mxu1 }
 0x8a2   :  { %v6085_v40 = vmax.f32 %v6082_v45, 0.0 }
 0x8a4   :  { %v6093_v30 = vmul.f32 %v6664_v51, %v6085_v40 }
 0x8a6   :  { %6094 = vadd.xlane.f32.xlu1 %v6093_v30 }
 0x92f   :  { %v6095_v39 = vpop.xlane.xlu1 %6094 }
 0x930   :  { %v6103_v17 = vadd.f32 %v6665_v43, %v6095_v39 }
 0x932   :  { %6105 = vst.msk [vmem:[%s10658_s21] sm:$0xff] %vm6104_vm15, %v6103_v17 }

</bundles_post_ra>
